<compile_context>
chip_gen: v7x
topology: tpu7x:2x2x1
jax: 0.10.0
libtpu: 0.0.40
codegen_flags: <defaults>
</compile_context>

<pallas_src>
import numpy as np

import jax
import jax.numpy as jnp
from jax import lax
from jax.experimental import pallas as pl
from jax.experimental.pallas import tpu as pltpu


NUM_CLASSES = 340
L = 500
D = 128
K_ATT = 1


def _vmem_spec():
    return pl.BlockSpec(memory_space=pltpu.MemorySpace.VMEM)


# ----------------------------------------------------------------------------
# Pallas kernel: fused conv (im2col matmul) + bias + ReLU + 2x2 maxpool
# ----------------------------------------------------------------------------
def _conv_relu_pool_kernel(pt_ref, wt_ref, b_ref, o_ref):
    """pt:(4,K,TM) pool-candidate patches, wt:(Cout,K), b:(Cout,1), o:(Cout,TM).

    o = relu(max_over_candidates(wt @ pt[c]) + b)   (bias/relu commute w/ max).
    """
    wt = wt_ref[...]
    acc = jnp.dot(wt, pt_ref[0], preferred_element_type=jnp.float32)
    for cand in range(1, 4):
        acc = jnp.maximum(
            acc, jnp.dot(wt, pt_ref[cand], preferred_element_type=jnp.float32))
    o_ref[...] = jnp.maximum(acc + b_ref[...], 0.0)


def _pick_tile(m):
    """Largest lane-dense tile (multiple of 128) dividing m; whole array otherwise."""
    for t in (2048, 1024, 768, 640, 512, 384, 256, 128):
        if m % t == 0:
            return t
    return m


def conv_relu_pool(pt, wt, b):
    four, k, m = pt.shape
    cout = wt.shape[0]
    tile_m = _pick_tile(m)
    return pl.pallas_call(
        _conv_relu_pool_kernel,
        out_shape=jax.ShapeDtypeStruct((cout, m), jnp.float32),
        grid=(m // tile_m,),
        in_specs=[
            pl.BlockSpec((four, k, tile_m), lambda j: (0, 0, j)),
            pl.BlockSpec((cout, k), lambda j: (0, 0)),
            pl.BlockSpec((cout, 1), lambda j: (0, 0)),
        ],
        out_specs=pl.BlockSpec((cout, tile_m), lambda j: (0, j)),
        compiler_params=pltpu.CompilerParams(
            dimension_semantics=("parallel",),
            vmem_limit_bytes=32 * 1024 * 1024,
        ),
    )(pt, wt, b)


# ----------------------------------------------------------------------------
# Pallas kernel: fused MIL tail
#   fc1+ReLU -> att1+tanh -> att2 -> softmax over bag -> A@H -> classifier
# ----------------------------------------------------------------------------
def _mil_tail_kernel(h_ref, wf_ref, bf_ref, wa1_ref, ba1_ref, wa2_ref, ba2_ref,
                     wc_ref, bc_ref, y_ref, attn_ref):
    h = jnp.dot(h_ref[...], wf_ref[...], preferred_element_type=jnp.float32)
    h = jnp.maximum(h + bf_ref[...], 0.0)                               # (N, 500)

    a = jnp.dot(h, wa1_ref[...], preferred_element_type=jnp.float32)
    a = jnp.tanh(a + ba1_ref[...])                                      # (N, 128)

    logits = jnp.dot(a, wa2_ref[...], preferred_element_type=jnp.float32)
    logits = logits + ba2_ref[...]                                      # (N, 1)

    # softmax over the bag (instances live on the sublane axis)
    lmax = jnp.max(logits)
    e = jnp.exp(logits - lmax)
    attn = e / jnp.sum(e)                                               # (N, 1)
    attn_ref[...] = attn

    # attention pooling M = A @ H, done as a weighted sublane reduction
    m = jnp.sum(attn * h, axis=0, keepdims=True)                        # (1, 500)

    y = jnp.dot(m, wc_ref[...], preferred_element_type=jnp.float32)
    y_ref[...] = y + bc_ref[...]                                        # (1, 340)


def mil_tail(hflat, params):
    n = hflat.shape[0]
    return pl.pallas_call(
        _mil_tail_kernel,
        out_shape=(
            jax.ShapeDtypeStruct((1, NUM_CLASSES), jnp.float32),
            jax.ShapeDtypeStruct((n, 1), jnp.float32),
        ),
        in_specs=[_vmem_spec() for _ in range(9)],
        out_specs=(_vmem_spec(), _vmem_spec()),
    )(hflat, params["w_fc1"], params["b_fc1"],
      params["w_att1"], params["b_att1"],
      params["w_att2"], params["b_att2"],
      params["w_cls"], params["b_cls"])


# ----------------------------------------------------------------------------
# XLA glue: pool-ordered, transposed im2col (layout only)
# ----------------------------------------------------------------------------
def _im2col_pooled_t(x_cf, k):
    """x_cf: (C, N, H, W) channel-first activations.

    Returns (4, C*k*k, N*Ho2*Wo2): axis 0 enumerates the 2x2 maxpool
    candidates (a, b); axis 1 is the patch feature in torch's (c_in, kh, kw)
    order; axis 2 enumerates pooled output positions (n, r, s) row-major.
    Matches Conv2d(kernel=k, stride=1, valid) followed by MaxPool2d(2, 2).
    """
    c, n, h, w = x_cf.shape
    ho, wo = h - k + 1, w - k + 1
    ho2, wo2 = ho // 2, wo // 2
    cands = []
    for a in range(2):
        for b in range(2):
            feats = []
            for di in range(k):
                for dj in range(k):
                    sl = x_cf[:, :,
                              a + di: a + di + 2 * ho2 - 1: 2,
                              b + dj: b + dj + 2 * wo2 - 1: 2]   # (C,N,ho2,wo2)
                    feats.append(sl)
            f = jnp.stack(feats, axis=1)                         # (C,k*k,N,ho2,wo2)
            cands.append(f.reshape(c * k * k, n * ho2 * wo2))
    return jnp.stack(cands, axis=0)                              # (4,C*k*k,M)


# ----------------------------------------------------------------------------
# Model
# ----------------------------------------------------------------------------
def init_params(key):
    def dense(k, fan_in, shape):
        return jax.random.normal(k, shape, jnp.float32) / jnp.sqrt(fan_in)

    ks = jax.random.split(key, 12)
    p = {}
    # conv1: torch weight (20,1,5,5) -> (20, 25); bias pre-shaped (20,1)
    p["w_conv1"] = dense(ks[0], 25, (20, 25))
    p["b_conv1"] = dense(ks[1], 25, (20, 1))
    # conv2: torch weight (50,20,5,5) -> (50, 500); bias (50,1)
    p["w_conv2"] = dense(ks[2], 500, (50, 500))
    p["b_conv2"] = dense(ks[3], 500, (50, 1))
    # fc1: Linear(800, 500)
    p["w_fc1"] = dense(ks[4], 800, (800, L))
    p["b_fc1"] = dense(ks[5], 800, (1, L))
    # attention: Linear(500,128), Linear(128,1)
    p["w_att1"] = dense(ks[6], L, (L, D))
    p["b_att1"] = dense(ks[7], L, (1, D))
    p["w_att2"] = dense(ks[8], D, (D, K_ATT))
    p["b_att2"] = dense(ks[9], D, (1, K_ATT))
    # classifier: Linear(500, 340)
    p["w_cls"] = dense(ks[10], L * K_ATT, (L * K_ATT, NUM_CLASSES))
    p["b_cls"] = dense(ks[11], L * K_ATT, (1, NUM_CLASSES))
    return p


def simple_classify_mil_forward(params, x):
    """x: (1, N_bag, 1, 28, 28) float32, NCHW like the torch module."""
    x = x[0]                                     # squeeze(0) -> (N, 1, 28, 28)
    n = x.shape[0]
    x_cf = jnp.transpose(x, (1, 0, 2, 3))        # channel-first (1, N, 28, 28)

    # Conv2d(1,20,5) + ReLU + MaxPool2d(2,2)  -> (20, N*144), channel-major
    p1 = _im2col_pooled_t(x_cf, 5)                               # (4, 25, N*144)
    h1 = conv_relu_pool(p1, params["w_conv1"], params["b_conv1"])

    # Conv2d(20,50,5) + ReLU + MaxPool2d(2,2) -> (50, N*16), channel-major
    h1_cf = h1.reshape(20, n, 12, 12)
    p2 = _im2col_pooled_t(h1_cf, 5)                              # (4, 500, N*16)
    h2 = conv_relu_pool(p2, params["w_conv2"], params["b_conv2"])

    # torch H.view(-1, 50*4*4) flattens NCHW (channel-major) order.
    hflat = jnp.transpose(h2.reshape(50, n, 16), (1, 0, 2)).reshape(n, 800)

    # Fused tail: fc1 + attention + softmax + A@H + classifier.
    y_prob, attn_col = mil_tail(hflat, params)                   # (1,340), (N,1)
    return y_prob, attn_col.reshape(1, n)


# ----------------------------------------------------------------------------
# Plain-JAX/XLA reference (for correctness check)
# ----------------------------------------------------------------------------
def reference_forward(params, x):
    hi = lax.Precision.HIGHEST
    xs = x[0]                                                    # (N,1,28,28)
    w1 = params["w_conv1"].reshape(20, 1, 5, 5)
    w2 = params["w_conv2"].reshape(50, 20, 5, 5)

    def conv(z, w, b):
        y = lax.conv_general_dilated(
            z, w, (1, 1), "VALID",
            dimension_numbers=("NCHW", "OIHW", "NCHW"), precision=hi)
        return y + b.reshape(1, -1, 1, 1)

    def pool(z):
        return lax.reduce_window(z, -jnp.inf, lax.max,
                                 (1, 1, 2, 2), (1, 1, 2, 2), "VALID")

    h = pool(jnp.maximum(conv(xs, w1, params["b_conv1"]), 0.0))
    h = pool(jnp.maximum(conv(h, w2, params["b_conv2"]), 0.0))
    hflat = h.reshape(h.shape[0], -1)
    hh = jnp.maximum(jnp.dot(hflat, params["w_fc1"], precision=hi)
                     + params["b_fc1"], 0.0)
    a1 = jnp.tanh(jnp.dot(hh, params["w_att1"], precision=hi) + params["b_att1"])
    a2 = jnp.dot(a1, params["w_att2"], precision=hi) + params["b_att2"]
    a = jax.nn.softmax(jnp.transpose(a2, (1, 0)), axis=1)
    m = jnp.dot(a, hh, precision=hi)
    y = jnp.dot(m, params["w_cls"], precision=hi) + params["b_cls"]
    return y, a


if __name__ == "__main__":
    key = jax.random.PRNGKey(0)
    k_param, k_data = jax.random.split(key)

    params = init_params(k_param)
    # Bag of 8 instances, each a 1x28x28 image (28x28 is forced by the
    # module's view(-1, 50*4*4)).
    x = jax.random.normal(k_data, (1, 8, 1, 28, 28), jnp.float32)

    fwd = jax.jit(simple_classify_mil_forward)
    y_prob, attn = fwd(params, x)
    jax.block_until_ready((y_prob, attn))

    assert y_prob.shape == (1, NUM_CLASSES)
    assert attn.shape == (1, 8)
    assert abs(float(jnp.sum(attn)) - 1.0) < 1e-4  # attention weights sum to 1

    # Cross-check against the plain-XLA reference (loose tol: MXU vs XLA conv).
    y_ref, a_ref = jax.jit(reference_forward)(params, x)
    jax.block_until_ready((y_ref, a_ref))
    assert np.allclose(np.asarray(attn), np.asarray(a_ref), atol=3e-2, rtol=3e-2)
    assert np.allclose(np.asarray(y_prob), np.asarray(y_ref), atol=1e-1, rtol=1e-1)

    print("KERNEL_OK")
</pallas_src>

<mosaic_0001>
module attributes {stable_mosaic.version = 11 : i64} {
  func.func @_conv_relu_pool_kernel(%arg0: i32, %arg1: memref<4x25x384xf32, #tpu.memory_space<vmem>>, %arg2: memref<20x25xf32, #tpu.memory_space<vmem>>, %arg3: memref<20x1xf32, #tpu.memory_space<vmem>>, %arg4: memref<20x384xf32, #tpu.memory_space<vmem>>) attributes {dimension_semantics = [#tpu.dimension_semantics<parallel>], iteration_bounds = array<i64: 3>, scalar_prefetch = 0 : i64, scratch_operands = 0 : i64, tpu.core_type = #tpu.core_type<tc>, window_params = [{transform_indices = @transform_0, window_bounds = array<i64: 4, 25, 384>}, {pipeline_mode = #tpu.pipeline_mode<synchronous>, transform_indices = @transform_1, window_bounds = array<i64: 20, 25>}, {pipeline_mode = #tpu.pipeline_mode<synchronous>, transform_indices = @transform_2, window_bounds = array<i64: 20, 1>}, {transform_indices = @transform_3, window_bounds = array<i64: 20, 384>}]} {
    %c0 = arith.constant 0 : index
    %c0_0 = arith.constant 0 : index
    %0 = vector.load %arg2[%c0, %c0_0] : memref<20x25xf32, #tpu.memory_space<vmem>>, vector<20x25xf32>
    %c0_1 = arith.constant 0 : index
    %c0_2 = arith.constant 0 : index
    %c0_3 = arith.constant 0 : index
    %1 = vector.load %arg1[%c0_1, %c0_2, %c0_3] : memref<4x25x384xf32, #tpu.memory_space<vmem>>, vector<1x25x384xf32>
    %2 = vector.shape_cast %1 : vector<1x25x384xf32> to vector<25x384xf32>
    %cst = arith.constant dense<0.000000e+00> : vector<20x384xf32>
    %3 = tpu.matmul %0, %2, %cst {dimension_numbers = #tpu.dot_dimension_numbers<[1], [0], [0], [1], [0, 0, 1, 1], [], []>} : vector<20x25xf32>, vector<25x384xf32>, vector<20x384xf32> -> vector<20x384xf32>
    %c1 = arith.constant 1 : index
    %c0_4 = arith.constant 0 : index
    %c0_5 = arith.constant 0 : index
    %4 = vector.load %arg1[%c1, %c0_4, %c0_5] : memref<4x25x384xf32, #tpu.memory_space<vmem>>, vector<1x25x384xf32>
    %5 = vector.shape_cast %4 : vector<1x25x384xf32> to vector<25x384xf32>
    %cst_6 = arith.constant dense<0.000000e+00> : vector<20x384xf32>
    %6 = tpu.matmul %0, %5, %cst_6 {dimension_numbers = #tpu.dot_dimension_numbers<[1], [0], [0], [1], [0, 0, 1, 1], [], []>} : vector<20x25xf32>, vector<25x384xf32>, vector<20x384xf32> -> vector<20x384xf32>
    %7 = arith.maximumf %3, %6 : vector<20x384xf32>
    %c2 = arith.constant 2 : index
    %c0_7 = arith.constant 0 : index
    %c0_8 = arith.constant 0 : index
    %8 = vector.load %arg1[%c2, %c0_7, %c0_8] : memref<4x25x384xf32, #tpu.memory_space<vmem>>, vector<1x25x384xf32>
    %9 = vector.shape_cast %8 : vector<1x25x384xf32> to vector<25x384xf32>
    %cst_9 = arith.constant dense<0.000000e+00> : vector<20x384xf32>
    %10 = tpu.matmul %0, %9, %cst_9 {dimension_numbers = #tpu.dot_dimension_numbers<[1], [0], [0], [1], [0, 0, 1, 1], [], []>} : vector<20x25xf32>, vector<25x384xf32>, vector<20x384xf32> -> vector<20x384xf32>
    %11 = arith.maximumf %7, %10 : vector<20x384xf32>
    %c3 = arith.constant 3 : index
    %c0_10 = arith.constant 0 : index
    %c0_11 = arith.constant 0 : index
    %12 = vector.load %arg1[%c3, %c0_10, %c0_11] : memref<4x25x384xf32, #tpu.memory_space<vmem>>, vector<1x25x384xf32>
    %13 = vector.shape_cast %12 : vector<1x25x384xf32> to vector<25x384xf32>
    %cst_12 = arith.constant dense<0.000000e+00> : vector<20x384xf32>
    %14 = tpu.matmul %0, %13, %cst_12 {dimension_numbers = #tpu.dot_dimension_numbers<[1], [0], [0], [1], [0, 0, 1, 1], [], []>} : vector<20x25xf32>, vector<25x384xf32>, vector<20x384xf32> -> vector<20x384xf32>
    %15 = arith.maximumf %11, %14 : vector<20x384xf32>
    %c0_13 = arith.constant 0 : index
    %c0_14 = arith.constant 0 : index
    %16 = vector.load %arg3[%c0_13, %c0_14] : memref<20x1xf32, #tpu.memory_space<vmem>>, vector<20x1xf32>
    %17 = vector.broadcast %16 : vector<20x1xf32> to vector<20x384xf32>
    %18 = arith.addf %15, %17 : vector<20x384xf32>
    %cst_15 = arith.constant 0.000000e+00 : f32
    %19 = vector.broadcast %cst_15 : f32 to vector<20x384xf32>
    %20 = arith.maximumf %18, %19 : vector<20x384xf32>
    %c0_16 = arith.constant 0 : index
    %c0_17 = arith.constant 0 : index
    %21 = vector.load %arg4[%c0_16, %c0_17] : memref<20x384xf32, #tpu.memory_space<vmem>>, vector<20x384xf32>
    tpu.vector_store %arg4[%c0_16, %c0_17], %20 {strides = array<i32>} : memref<20x384xf32, #tpu.memory_space<vmem>>, vector<20x384xf32>,
    return
  }
  func.func @transform_0(%arg0: i32) -> (i32, i32, i32) {
    %c0_i32 = arith.constant 0 : i32
    %c0_i32_0 = arith.constant 0 : i32
    %c0_i32_1 = arith.constant 0 : i32
    return %c0_i32, %c0_i32_0, %arg0 : i32, i32, i32
  }
  func.func @transform_1(%arg0: i32) -> (i32, i32) {
    %c0_i32 = arith.constant 0 : i32
    %c0_i32_0 = arith.constant 0 : i32
    %c0_i32_1 = arith.constant 0 : i32
    return %c0_i32, %c0_i32_0 : i32, i32
  }
  func.func @transform_2(%arg0: i32) -> (i32, i32) {
    %c0_i32 = arith.constant 0 : i32
    %c0_i32_0 = arith.constant 0 : i32
    %c0_i32_1 = arith.constant 0 : i32
    return %c0_i32, %c0_i32_0 : i32, i32
  }
  func.func @transform_3(%arg0: i32) -> (i32, i32) {
    %c0_i32 = arith.constant 0 : i32
    %c0_i32_0 = arith.constant 0 : i32
    return %c0_i32, %arg0 : i32, i32
  }
}

module attributes {stable_mosaic.version = 11 : i64} {
  func.func @_conv_relu_pool_kernel(%arg0: i32, %arg1: memref<4x500x128xf32, #tpu.memory_space<vmem>>, %arg2: memref<50x500xf32, #tpu.memory_space<vmem>>, %arg3: memref<50x1xf32, #tpu.memory_space<vmem>>, %arg4: memref<50x128xf32, #tpu.memory_space<vmem>>) attributes {dimension_semantics = [#tpu.dimension_semantics<parallel>], iteration_bounds = array<i64: 1>, scalar_prefetch = 0 : i64, scratch_operands = 0 : i64, tpu.core_type = #tpu.core_type<tc>, window_params = [{transform_indices = @transform_0, window_bounds = array<i64: 4, 500, 128>}, {pipeline_mode = #tpu.pipeline_mode<synchronous>, transform_indices = @transform_1, window_bounds = array<i64: 50, 500>}, {pipeline_mode = #tpu.pipeline_mode<synchronous>, transform_indices = @transform_2, window_bounds = array<i64: 50, 1>}, {transform_indices = @transform_3, window_bounds = array<i64: 50, 128>}]} {
    %c0 = arith.constant 0 : index
    %c0_0 = arith.constant 0 : index
    %0 = vector.load %arg2[%c0, %c0_0] : memref<50x500xf32, #tpu.memory_space<vmem>>, vector<50x500xf32>
    %c0_1 = arith.constant 0 : index
    %c0_2 = arith.constant 0 : index
    %c0_3 = arith.constant 0 : index
    %1 = vector.load %arg1[%c0_1, %c0_2, %c0_3] : memref<4x500x128xf32, #tpu.memory_space<vmem>>, vector<1x500x128xf32>
    %2 = vector.shape_cast %1 : vector<1x500x128xf32> to vector<500x128xf32>
    %cst = arith.constant dense<0.000000e+00> : vector<50x128xf32>
    %3 = tpu.matmul %0, %2, %cst {dimension_numbers = #tpu.dot_dimension_numbers<[1], [0], [0], [1], [0, 0, 1, 1], [], []>} : vector<50x500xf32>, vector<500x128xf32>, vector<50x128xf32> -> vector<50x128xf32>
    %c1 = arith.constant 1 : index
    %c0_4 = arith.constant 0 : index
    %c0_5 = arith.constant 0 : index
    %4 = vector.load %arg1[%c1, %c0_4, %c0_5] : memref<4x500x128xf32, #tpu.memory_space<vmem>>, vector<1x500x128xf32>
    %5 = vector.shape_cast %4 : vector<1x500x128xf32> to vector<500x128xf32>
    %cst_6 = arith.constant dense<0.000000e+00> : vector<50x128xf32>
    %6 = tpu.matmul %0, %5, %cst_6 {dimension_numbers = #tpu.dot_dimension_numbers<[1], [0], [0], [1], [0, 0, 1, 1], [], []>} : vector<50x500xf32>, vector<500x128xf32>, vector<50x128xf32> -> vector<50x128xf32>
    %7 = arith.maximumf %3, %6 : vector<50x128xf32>
    %c2 = arith.constant 2 : index
    %c0_7 = arith.constant 0 : index
    %c0_8 = arith.constant 0 : index
    %8 = vector.load %arg1[%c2, %c0_7, %c0_8] : memref<4x500x128xf32, #tpu.memory_space<vmem>>, vector<1x500x128xf32>
    %9 = vector.shape_cast %8 : vector<1x500x128xf32> to vector<500x128xf32>
    %cst_9 = arith.constant dense<0.000000e+00> : vector<50x128xf32>
    %10 = tpu.matmul %0, %9, %cst_9 {dimension_numbers = #tpu.dot_dimension_numbers<[1], [0], [0], [1], [0, 0, 1, 1], [], []>} : vector<50x500xf32>, vector<500x128xf32>, vector<50x128xf32> -> vector<50x128xf32>
    %11 = arith.maximumf %7, %10 : vector<50x128xf32>
    %c3 = arith.constant 3 : index
    %c0_10 = arith.constant 0 : index
    %c0_11 = arith.constant 0 : index
    %12 = vector.load %arg1[%c3, %c0_10, %c0_11] : memref<4x500x128xf32, #tpu.memory_space<vmem>>, vector<1x500x128xf32>
    %13 = vector.shape_cast %12 : vector<1x500x128xf32> to vector<500x128xf32>
    %cst_12 = arith.constant dense<0.000000e+00> : vector<50x128xf32>
    %14 = tpu.matmul %0, %13, %cst_12 {dimension_numbers = #tpu.dot_dimension_numbers<[1], [0], [0], [1], [0, 0, 1, 1], [], []>} : vector<50x500xf32>, vector<500x128xf32>, vector<50x128xf32> -> vector<50x128xf32>
    %15 = arith.maximumf %11, %14 : vector<50x128xf32>
    %c0_13 = arith.constant 0 : index
    %c0_14 = arith.constant 0 : index
    %16 = vector.load %arg3[%c0_13, %c0_14] : memref<50x1xf32, #tpu.memory_space<vmem>>, vector<50x1xf32>
    %17 = vector.broadcast %16 : vector<50x1xf32> to vector<50x128xf32>
    %18 = arith.addf %15, %17 : vector<50x128xf32>
    %cst_15 = arith.constant 0.000000e+00 : f32
    %19 = vector.broadcast %cst_15 : f32 to vector<50x128xf32>
    %20 = arith.maximumf %18, %19 : vector<50x128xf32>
    %c0_16 = arith.constant 0 : index
    %c0_17 = arith.constant 0 : index
    %21 = vector.load %arg4[%c0_16, %c0_17] : memref<50x128xf32, #tpu.memory_space<vmem>>, vector<50x128xf32>
    tpu.vector_store %arg4[%c0_16, %c0_17], %20 {strides = array<i32>} : memref<50x128xf32, #tpu.memory_space<vmem>>, vector<50x128xf32>,
    return
  }
  func.func @transform_0(%arg0: i32) -> (i32, i32, i32) {
    %c0_i32 = arith.constant 0 : i32
    %c0_i32_0 = arith.constant 0 : i32
    %c0_i32_1 = arith.constant 0 : i32
    return %c0_i32, %c0_i32_0, %arg0 : i32, i32, i32
  }
  func.func @transform_1(%arg0: i32) -> (i32, i32) {
    %c0_i32 = arith.constant 0 : i32
    %c0_i32_0 = arith.constant 0 : i32
    %c0_i32_1 = arith.constant 0 : i32
    return %c0_i32, %c0_i32_0 : i32, i32
  }
  func.func @transform_2(%arg0: i32) -> (i32, i32) {
    %c0_i32 = arith.constant 0 : i32
    %c0_i32_0 = arith.constant 0 : i32
    %c0_i32_1 = arith.constant 0 : i32
    return %c0_i32, %c0_i32_0 : i32, i32
  }
  func.func @transform_3(%arg0: i32) -> (i32, i32) {
    %c0_i32 = arith.constant 0 : i32
    %c0_i32_0 = arith.constant 0 : i32
    return %c0_i32, %arg0 : i32, i32
  }
}

module attributes {stable_mosaic.version = 11 : i64} {
  func.func @_mil_tail_kernel(%arg0: memref<8x800xf32, #tpu.memory_space<vmem>>, %arg1: memref<800x500xf32, #tpu.memory_space<vmem>>, %arg2: memref<1x500xf32, #tpu.memory_space<vmem>>, %arg3: memref<500x128xf32, #tpu.memory_space<vmem>>, %arg4: memref<1x128xf32, #tpu.memory_space<vmem>>, %arg5: memref<128x1xf32, #tpu.memory_space<vmem>>, %arg6: memref<1x1xf32, #tpu.memory_space<vmem>>, %arg7: memref<500x340xf32, #tpu.memory_space<vmem>>, %arg8: memref<1x340xf32, #tpu.memory_space<vmem>>, %arg9: memref<1x340xf32, #tpu.memory_space<vmem>>, %arg10: memref<8x1xf32, #tpu.memory_space<vmem>>) attributes {dimension_semantics = [], scalar_prefetch = 0 : i64, scratch_operands = 0 : i64, tpu.core_type = #tpu.core_type<tc>} {
    %c0 = arith.constant 0 : index
    %c0_0 = arith.constant 0 : index
    %0 = vector.load %arg0[%c0, %c0_0] : memref<8x800xf32, #tpu.memory_space<vmem>>, vector<8x800xf32>
    %c0_1 = arith.constant 0 : index
    %c0_2 = arith.constant 0 : index
    %1 = vector.load %arg1[%c0_1, %c0_2] : memref<800x500xf32, #tpu.memory_space<vmem>>, vector<800x500xf32>
    %cst = arith.constant dense<0.000000e+00> : vector<8x500xf32>
    %2 = tpu.matmul %0, %1, %cst {dimension_numbers = #tpu.dot_dimension_numbers<[1], [0], [0], [1], [0, 0, 1, 1], [], []>} : vector<8x800xf32>, vector<800x500xf32>, vector<8x500xf32> -> vector<8x500xf32>
    %c0_3 = arith.constant 0 : index
    %c0_4 = arith.constant 0 : index
    %3 = vector.load %arg2[%c0_3, %c0_4] : memref<1x500xf32, #tpu.memory_space<vmem>>, vector<1x500xf32>
    %4 = vector.broadcast %3 : vector<1x500xf32> to vector<8x500xf32>
    %5 = arith.addf %2, %4 : vector<8x500xf32>
    %cst_5 = arith.constant 0.000000e+00 : f32
    %6 = vector.broadcast %cst_5 : f32 to vector<8x500xf32>
    %7 = arith.maximumf %5, %6 : vector<8x500xf32>
    %c0_6 = arith.constant 0 : index
    %c0_7 = arith.constant 0 : index
    %8 = vector.load %arg3[%c0_6, %c0_7] : memref<500x128xf32, #tpu.memory_space<vmem>>, vector<500x128xf32>
    %cst_8 = arith.constant dense<0.000000e+00> : vector<8x128xf32>
    %9 = tpu.matmul %7, %8, %cst_8 {dimension_numbers = #tpu.dot_dimension_numbers<[1], [0], [0], [1], [0, 0, 1, 1], [], []>} : vector<8x500xf32>, vector<500x128xf32>, vector<8x128xf32> -> vector<8x128xf32>
    %c0_9 = arith.constant 0 : index
    %c0_10 = arith.constant 0 : index
    %10 = vector.load %arg4[%c0_9, %c0_10] : memref<1x128xf32, #tpu.memory_space<vmem>>, vector<1x128xf32>
    %11 = vector.broadcast %10 : vector<1x128xf32> to vector<8x128xf32>
    %12 = arith.addf %9, %11 : vector<8x128xf32>
    %13 = math.tanh %12 : vector<8x128xf32>
    %c0_11 = arith.constant 0 : index
    %c0_12 = arith.constant 0 : index
    %14 = vector.load %arg5[%c0_11, %c0_12] : memref<128x1xf32, #tpu.memory_space<vmem>>, vector<128x1xf32>
    %cst_13 = arith.constant dense<0.000000e+00> : vector<8x1xf32>
    %15 = tpu.matmul %13, %14, %cst_13 {dimension_numbers = #tpu.dot_dimension_numbers<[1], [0], [0], [1], [0, 0, 1, 1], [], []>} : vector<8x128xf32>, vector<128x1xf32>, vector<8x1xf32> -> vector<8x1xf32>
    %c0_14 = arith.constant 0 : index
    %c0_15 = arith.constant 0 : index
    %16 = vector.load %arg6[%c0_14, %c0_15] : memref<1x1xf32, #tpu.memory_space<vmem>>, vector<1x1xf32>
    %17 = vector.broadcast %16 : vector<1x1xf32> to vector<8x1xf32>
    %18 = arith.addf %15, %17 : vector<8x1xf32>
    %19 = vector.shape_cast %18 : vector<8x1xf32> to vector<1x8x1xf32>
    %cst_16 = arith.constant dense<0xFF800000> : vector<1xf32>
    %20 = vector.multi_reduction <maximumf>, %19, %cst_16 [1, 2] : vector<1x8x1xf32> to vector<1xf32>
    %21 = vector.shape_cast %20 : vector<1xf32> to vector<1x1x1xf32>
    %22 = vector.extract %21[0, 0, 0] : f32 from vector<1x1x1xf32>
    %23 = vector.broadcast %22 : f32 to vector<8x1xf32>
    %24 = arith.subf %18, %23 : vector<8x1xf32>
    %25 = math.exp %24 : vector<8x1xf32>
    %26 = vector.shape_cast %25 : vector<8x1xf32> to vector<1x8x1xf32>
    %cst_17 = arith.constant dense<0.000000e+00> : vector<1xf32>
    %27 = vector.multi_reduction <add>, %26, %cst_17 [1, 2] : vector<1x8x1xf32> to vector<1xf32>
    %28 = vector.shape_cast %27 : vector<1xf32> to vector<1x1x1xf32>
    %29 = vector.extract %28[0, 0, 0] : f32 from vector<1x1x1xf32>
    %30 = vector.broadcast %29 : f32 to vector<8x1xf32>
    %31 = arith.divf %25, %30 : vector<8x1xf32>
    %c0_18 = arith.constant 0 : index
    %c0_19 = arith.constant 0 : index
    %32 = vector.load %arg10[%c0_18, %c0_19] : memref<8x1xf32, #tpu.memory_space<vmem>>, vector<8x1xf32>
    tpu.vector_store %arg10[%c0_18, %c0_19], %31 {strides = array<i32>} : memref<8x1xf32, #tpu.memory_space<vmem>>, vector<8x1xf32>,
    %33 = vector.broadcast %31 : vector<8x1xf32> to vector<8x500xf32>
    %34 = arith.mulf %33, %7 : vector<8x500xf32>
    %cst_20 = arith.constant dense<0.000000e+00> : vector<500xf32>
    %35 = vector.multi_reduction <add>, %34, %cst_20 [0] : vector<8x500xf32> to vector<500xf32>
    %36 = vector.shape_cast %35 : vector<500xf32> to vector<1x500xf32>
    %c0_21 = arith.constant 0 : index
    %c0_22 = arith.constant 0 : index
    %37 = vector.load %arg7[%c0_21, %c0_22] : memref<500x340xf32, #tpu.memory_space<vmem>>, vector<500x340xf32>
    %cst_23 = arith.constant dense<0.000000e+00> : vector<1x340xf32>
    %38 = tpu.matmul %36, %37, %cst_23 {dimension_numbers = #tpu.dot_dimension_numbers<[1], [0], [0], [1], [0, 0, 1, 1], [], []>} : vector<1x500xf32>, vector<500x340xf32>, vector<1x340xf32> -> vector<1x340xf32>
    %c0_24 = arith.constant 0 : index
    %c0_25 = arith.constant 0 : index
    %39 = vector.load %arg8[%c0_24, %c0_25] : memref<1x340xf32, #tpu.memory_space<vmem>>, vector<1x340xf32>
    %40 = arith.addf %38, %39 : vector<1x340xf32>
    %c0_26 = arith.constant 0 : index
    %c0_27 = arith.constant 0 : index
    %41 = vector.load %arg9[%c0_26, %c0_27] : memref<1x340xf32, #tpu.memory_space<vmem>>, vector<1x340xf32>
    tpu.vector_store %arg9[%c0_26, %c0_27], %40 {strides = array<i32>} : memref<1x340xf32, #tpu.memory_space<vmem>>, vector<1x340xf32>,
    return
  }
}

</mosaic_0001>

<bundles_post_ra>
// kernel: simple_classify_mil_forward.3
= control target key start
LH: loop header
LB: loop body
LE: loop exit
PB: predicated region body
PF: predicated region fallthrough
CT: control target
= control target key end

     0   :  { %s1535_s12 = smov 0   ;;  %s1537_s13 = smov 0   ;;  %s1913_s0 = inlined_call_operand.vmem [shape: f32[4,25,1152], index: 0, kind: input, shape index: {}]   ;;  %s1914_s1 = inlined_call_operand.vmem [shape: f32[20,25], index: 1, kind: input, shape index: {}]   ;;  %s1915_s2 = inlined_call_operand.vmem [shape: f32[20,1], index: 2, kind: input, shape index: {}]   ;;  %s1916_s3 = inlined_call_operand.vmem [shape: f32[20,1152], index: 3, kind: output, shape index: {}]  }
   0x1   :  { %s1539_s14 = smov 0  }
   0x2 LB: > { %s1205_s15 = sadd.s32 4294967295, %s1508_s14   ;;  %s1552_s16 = sadd.s32 1, %s1508_s14   ;;  %s1508_s14 = sphi %s1539_s14, %s1922_s14   ;;  %s1504_s13 = sphi %s1537_s13, %s1921_s13   ;;  %s1500_s12 = sphi %s1535_s12, %s1920_s12  }
   0x3   : > { %s17_s17 = ssub.s32 %s1508_s14, %s1552_s16  ;;  %s20_s18 = sadd.s32 1, %s1504_s13 }
   0x4   : > { %p18_p0 = scmp.eq.s32.totalorder %s17_s17, 0  ;;  %p27_p1 = scmp.ne.s32.totalorder %s1504_s13, %s1500_s12 }
   0x5   : > { %p28_p2 = scmp.eq.s32.totalorder %s1508_s14, 0  ;;  %p99_p3 = scmp.eq.s32.totalorder %s1205_s15, 2 }
   0x6   : > { %s1563_s19 = scalar_select %p18_p0, %s1504_s13, %s20_s18  }
   0x7   : > { %p29_p4 = por %p28_p2, %p27_p1  ;;  %p1565_p5 = por %p99_p3, %p27_p1 }
   0x8   : > { %p1208_p6 = scmp.ge.s32.totalorder %s1508_s14, 3 }
   0xa   : > { %127 = sbr.rel (%p1208_p6) target bundleno = 46 (0x2e), region = 24 }
  0x11   : > { %130 = sbr.rel (!%p29_p4) target bundleno = 46 (0x2e), region = 28  ;;  %s132_s21 = sand.u32 (%p29_p4), 1, %s1504_s13  }
  0x12   : > { %s1286_s22 = smul.u32 (%p29_p4), 24, %s1508_s14 }
  0x13   : > { %s1452_s23 = smul.u32 (%p29_p4), 384, %s132_s21 }
  0x14   : > { %s1575_s26 = scalar_lea.vmem (%p29_p4), %s1913_s0, %s1286_s22 }
  0x15   : > { %v150_v0 = vld [vmem:[%s1575_s26] sm:$0xff] (%p29_p4)  ;;  %v152_v1 = vld [vmem:[%s1575_s26 + $0x8] sm:$0xff] (%p29_p4)  ;;  %v154_v2 = vld [vmem:[%s1575_s26 + $0x10] sm:$0xff] (%p29_p4)  ;;  %s1580_s27 = scalar_lea.vmem (%p29_p4), [#allocation2], %s1452_s23 }
  0x16   : > { %151 = vst [vmem:[%s1580_s27] sm:$0xff] (%p29_p4), %v150_v0  ;;  %153 = vst [vmem:[%s1580_s27 + $0x8] sm:$0xff] (%p29_p4), %v152_v1  ;;  %v156_v3 = vld [vmem:[%s1575_s26 + $0x48] sm:$0xff] (%p29_p4)  ;;  %v158_v4 = vld [vmem:[%s1575_s26 + $0x50] sm:$0xff] (%p29_p4) }
  0x17   : > { %155 = vst [vmem:[%s1580_s27 + $0x10] sm:$0xff] (%p29_p4), %v154_v2  ;;  %v160_v5 = vld [vmem:[%s1575_s26 + $0x58] sm:$0xff] (%p29_p4)  ;;  %157 = vst [vmem:[%s1580_s27 + $0x18] sm:$0xff] (%p29_p4), %v156_v3  ;;  %v162_v6 = vld [vmem:[%s1575_s26 + $0x90] sm:$0xff] (%p29_p4) }
  0x18   : > { %159 = vst [vmem:[%s1580_s27 + $0x20] sm:$0xff] %v158_v4  ;;  %161 = vst [vmem:[%s1580_s27 + $0x28] sm:$0xff] %v160_v5  ;;  %v164_v7 = vld [vmem:[%s1575_s26 + $0x98] sm:$0xff]  ;;  %v166_v8 = vld [vmem:[%s1575_s26 + $0xa0] sm:$0xff] }
  0x19   : > { %163 = vst [vmem:[%s1580_s27 + $0x30] sm:$0xff] %v162_v6  ;;  %165 = vst [vmem:[%s1580_s27 + $0x38] sm:$0xff] %v164_v7  ;;  %v168_v9 = vld [vmem:[%s1575_s26 + $0xd8] sm:$0xff]  ;;  %v170_v10 = vld [vmem:[%s1575_s26 + $0xe0] sm:$0xff] }
  0x1a   : > { %167 = vst [vmem:[%s1580_s27 + $0x40] sm:$0xff] %v166_v8  ;;  %v172_v11 = vld [vmem:[%s1575_s26 + $0xe8] sm:$0xff]  ;;  %169 = vst [vmem:[%s1580_s27 + $0x48] sm:$0xff] %v168_v9  ;;  %v174_v12 = vld [vmem:[%s1575_s26 + $0x120] sm:$0xff] }
  0x1b   : > { %171 = vst [vmem:[%s1580_s27 + $0x50] sm:$0xff] %v170_v10  ;;  %173 = vst [vmem:[%s1580_s27 + $0x58] sm:$0xff] %v172_v11  ;;  %v176_v13 = vld [vmem:[%s1575_s26 + $0x128] sm:$0xff]  ;;  %v178_v14 = vld [vmem:[%s1575_s26 + $0x130] sm:$0xff] }
  0x1c   : > { %175 = vst [vmem:[%s1580_s27 + $0x60] sm:$0xff] %v174_v12  ;;  %177 = vst [vmem:[%s1580_s27 + $0x68] sm:$0xff] %v176_v13  ;;  %v180_v15 = vld [vmem:[%s1575_s26 + $0x168] sm:$0xff]  ;;  %v182_v16 = vld [vmem:[%s1575_s26 + $0x170] sm:$0xff] }
  0x1d   : > { %179 = vst [vmem:[%s1580_s27 + $0x70] sm:$0xff] %v178_v14  ;;  %v184_v17 = vld [vmem:[%s1575_s26 + $0x178] sm:$0xff]  ;;  %181 = vst [vmem:[%s1580_s27 + $0x78] sm:$0xff] %v180_v15  ;;  %v186_v18 = vld [vmem:[%s1575_s26 + $0x1b0] sm:$0xff] }
  0x1e   : > { %183 = vst [vmem:[%s1580_s27 + $0x80] sm:$0xff] %v182_v16  ;;  %185 = vst [vmem:[%s1580_s27 + $0x88] sm:$0xff] %v184_v17  ;;  %v188_v19 = vld [vmem:[%s1575_s26 + $0x1b8] sm:$0xff]  ;;  %v190_v20 = vld [vmem:[%s1575_s26 + $0x1c0] sm:$0xff] }
  0x1f   : > { %187 = vst [vmem:[%s1580_s27 + $0x90] sm:$0xff] %v186_v18  ;;  %189 = vst [vmem:[%s1580_s27 + $0x98] sm:$0xff] %v188_v19  ;;  %v192_v21 = vld [vmem:[%s1575_s26 + $0x1f8] sm:$0xff]  ;;  %v194_v22 = vld [vmem:[%s1575_s26 + $0x200] sm:$0xff] }
  0x20   : > { %191 = vst [vmem:[%s1580_s27 + $0xa0] sm:$0xff] %v190_v20  ;;  %v196_v23 = vld [vmem:[%s1575_s26 + $0x208] sm:$0xff]  ;;  %193 = vst [vmem:[%s1580_s27 + $0xa8] sm:$0xff] %v192_v21  ;;  %v198_v24 = vld [vmem:[%s1575_s26 + $0x240] sm:$0xff] }
  0x21   : > { %195 = vst [vmem:[%s1580_s27 + $0xb0] sm:$0xff] %v194_v22  ;;  %197 = vst [vmem:[%s1580_s27 + $0xb8] sm:$0xff] %v196_v23  ;;  %v200_v25 = vld [vmem:[%s1575_s26 + $0x248] sm:$0xff]  ;;  %v202_v26 = vld [vmem:[%s1575_s26 + $0x250] sm:$0xff] }
  0x22   : > { %199 = vst [vmem:[%s1580_s27 + $0xc0] sm:$0xff] %v198_v24  ;;  %201 = vst [vmem:[%s1580_s27 + $0xc8] sm:$0xff] %v200_v25  ;;  %v204_v27 = vld [vmem:[%s1575_s26 + $0x288] sm:$0xff]  ;;  %v206_v28 = vld [vmem:[%s1575_s26 + $0x290] sm:$0xff] }
  0x23   : > { %203 = vst [vmem:[%s1580_s27 + $0xd0] sm:$0xff] %v202_v26  ;;  %v208_v29 = vld [vmem:[%s1575_s26 + $0x298] sm:$0xff]  ;;  %205 = vst [vmem:[%s1580_s27 + $0xd8] sm:$0xff] %v204_v27  ;;  %v210_v30 = vld [vmem:[%s1575_s26 + $0x2d0] sm:$0xff] }
  0x24   : > { %207 = vst [vmem:[%s1580_s27 + $0xe0] sm:$0xff] %v206_v28  ;;  %209 = vst [vmem:[%s1580_s27 + $0xe8] sm:$0xff] %v208_v29  ;;  %v212_v31 = vld [vmem:[%s1575_s26 + $0x2d8] sm:$0xff]  ;;  %v214_v32 = vld [vmem:[%s1575_s26 + $0x2e0] sm:$0xff] }
  0x25   : > { %211 = vst [vmem:[%s1580_s27 + $0xf0] sm:$0xff] %v210_v30  ;;  %213 = vst [vmem:[%s1580_s27 + $0xf8] sm:$0xff] %v212_v31  ;;  %v216_v33 = vld [vmem:[%s1575_s26 + $0x318] sm:$0xff]  ;;  %v218_v34 = vld [vmem:[%s1575_s26 + $0x320] sm:$0xff] }
  0x26   : > { %215 = vst [vmem:[%s1580_s27 + $0x100] sm:$0xff] %v214_v32  ;;  %v220_v35 = vld [vmem:[%s1575_s26 + $0x328] sm:$0xff]  ;;  %217 = vst [vmem:[%s1580_s27 + $0x108] sm:$0xff] %v216_v33  ;;  %v222_v36 = vld [vmem:[%s1575_s26 + $0x360] sm:$0xff] }
  0x27   : > { %219 = vst [vmem:[%s1580_s27 + $0x110] sm:$0xff] %v218_v34  ;;  %221 = vst [vmem:[%s1580_s27 + $0x118] sm:$0xff] %v220_v35  ;;  %v224_v37 = vld [vmem:[%s1575_s26 + $0x368] sm:$0xff]  ;;  %v226_v38 = vld [vmem:[%s1575_s26 + $0x370] sm:$0xff] }
  0x28   : > { %223 = vst [vmem:[%s1580_s27 + $0x120] sm:$0xff] %v222_v36  ;;  %225 = vst [vmem:[%s1580_s27 + $0x128] sm:$0xff] %v224_v37  ;;  %v228_v39 = vld [vmem:[%s1575_s26 + $0x3a8] sm:$0xff]  ;;  %v230_v40 = vld [vmem:[%s1575_s26 + $0x3b0] sm:$0xff] }
  0x29   : > { %227 = vst [vmem:[%s1580_s27 + $0x130] sm:$0xff] %v226_v38  ;;  %v232_v41 = vld [vmem:[%s1575_s26 + $0x3b8] sm:$0xff]  ;;  %229 = vst [vmem:[%s1580_s27 + $0x138] sm:$0xff] %v228_v39  ;;  %v234_v42 = vld [vmem:[%s1575_s26 + $0x3f0] sm:$0xff] }
  0x2a   : > { %231 = vst [vmem:[%s1580_s27 + $0x140] sm:$0xff] %v230_v40  ;;  %233 = vst [vmem:[%s1580_s27 + $0x148] sm:$0xff] %v232_v41  ;;  %v236_v43 = vld [vmem:[%s1575_s26 + $0x3f8] sm:$0xff]  ;;  %v238_v44 = vld [vmem:[%s1575_s26 + $0x400] sm:$0xff] }
  0x2b   : > { %235 = vst [vmem:[%s1580_s27 + $0x150] sm:$0xff] %v234_v42  ;;  %237 = vst [vmem:[%s1580_s27 + $0x158] sm:$0xff] %v236_v43  ;;  %v240_v45 = vld [vmem:[%s1575_s26 + $0x438] sm:$0xff]  ;;  %v242_v46 = vld [vmem:[%s1575_s26 + $0x440] sm:$0xff] }
  0x2c   : > { %239 = vst [vmem:[%s1580_s27 + $0x160] sm:$0xff] %v238_v44  ;;  %v244_v47 = vld [vmem:[%s1575_s26 + $0x448] sm:$0xff]  ;;  %241 = vst [vmem:[%s1580_s27 + $0x168] sm:$0xff] %v240_v45 }
  0x2d   : > { %243 = vst [vmem:[%s1580_s27 + $0x170] sm:$0xff] %v242_v46  ;;  %245 = vst [vmem:[%s1580_s27 + $0x178] sm:$0xff] %v244_v47 }
  0x2e PF: > { %p1210_p7 = scmp.ge.s32.totalorder %s1508_s14, 1  ;;  %p250_p8 = scmp.lt.s32.totalorder %s1508_s14, 4 }
  0x30   : > { %p251_p9 = pnand %p1210_p7, %p250_p8 }
  0x31   : > { %s257_s28 = sand.u32 (!%p251_p9), 1, %s1500_s12   ;;  %vm306_vm0 = vcmask (!%p251_p9), 1040384   ;;  %v1510_v48 = vmov (!%p251_p9), 0.0|0.0   ;;  %v1511_v49 = vmov (!%p251_p9), 0.0   ;;  %vm1512_vm1 = vmmov (!%p251_p9), 0   ;;  %v1061_v50 = vld [vmem:[%s1915_s2] sm:$0xff] (!%p251_p9) }
  0x32   : > { %254 = sbr.rel (%p251_p9) target bundleno = 337 (0x151), region = 51  ;;  %1394 = vmatprep.subr.bf16.mxu1 (!%p251_p9), %v1510_v48  ;;  %380 = vmatprep.mubr.f32.mxu0 (!%p251_p9), %v1511_v49  ;;  %v1063_v51 = vld [vmem:[%s1915_s2 + $0x10] sm:$0xf] (!%p251_p9)  ;;  %vm1513_vm2 = vmmov (!%p251_p9), 1   ;;  %v1514_v53 = vmov (!%p251_p9), 0   ;;  %v1062_v61 = vld [vmem:[%s1915_s2 + $0x8] sm:$0xff] (!%p251_p9) }
  0x33   : > { %s1453_s29 = smul.u32 (!%p251_p9), 384, %s257_s28  ;;  %1324 = vmatprep.mubr.msk.f32.mxu1 (!%p251_p9), %vm1512_vm1, %v1511_v49  ;;  %vm1690_vm3 = vmpackc.low (!%p251_p9), %vm306_vm0, %vm1513_vm2  ;;  %1484 = vset.pattern.permute.xlu0 (!%p251_p9), %v1514_v53  ;;  %v1729_v18 = vld [vmem:[%s1914_s1] sm:$0xff] (!%p251_p9)  ;;  %vm296_vm4 = vcmask (!%p251_p9), 203776   ;;  %v1747_v28 = vld [vmem:[%s1914_s1 + $0x8] sm:$0xff] (!%p251_p9) }
  0x34   : > { %1485 = vset.pattern.permute.xlu1 (!%p251_p9), %v1514_v53  ;;  %1066 = vperm.xlu0 (!%p251_p9), %1484, %v1061_v50   ;;  %v1763_v32 = vld [vmem:[%s1914_s1 + $0x10] sm:$0xf] (!%p251_p9)  ;;  %s1454_s23 = smul.u32 (!%p251_p9), 72, %s257_s28 }
  0x35   : > { %s1694_s7 = scalar_lea.vmem (!%p251_p9), [#allocation2], %s1453_s29  ;;  %1076 = vperm.xlu1 (!%p251_p9), %1485, %v1063_v51  }
  0x36   : > { %v285_v54 = vld [vmem:[%s1694_s7 + $0x8] sm:$0xff] (!%p251_p9)  ;;  %v288_v55 = vld [vmem:[%s1694_s7 + $0x20] sm:$0xff] (!%p251_p9)  ;;  %v286_v56 = vld [vmem:[%s1694_s7 + $0x10] sm:$0xff] (!%p251_p9)  ;;  %s1876_s12 = scalar_lea.vmem (!%p251_p9), [#allocation3], %s1454_s23 }
  0x37   : > { %v1384_v57 = vpack.c.bf16 (!%p251_p9), %v288_v55, %v285_v54  ;;  %v289_v58 = vld [vmem:[%s1694_s7 + $0x28] sm:$0xff] (!%p251_p9)  ;;  %v284_v59 = vld [vmem:[%s1694_s7] sm:$0xff] (!%p251_p9)  ;;  %v287_v60 = vld [vmem:[%s1694_s7 + $0x18] sm:$0xff] (!%p251_p9) }
  0x38   : > { %v1395_v62 = vpack.c.bf16 (!%p251_p9), %v289_v58, %v286_v56  ;;  %v1386_v63 = vpack.c.bf16 (!%p251_p9), %v287_v60, %v284_v59  ;;  %v291_v0 = vld [vmem:[%s1694_s7 + $0x38] sm:$0xff] (!%p251_p9)  ;;  %v294_v1 = vld [vmem:[%s1694_s7 + $0x50] sm:$0x1] (!%p251_p9)  ;;  %v292_v2 = vld [vmem:[%s1694_s7 + $0x40] sm:$0xff] (!%p251_p9)  ;;  %1071 = vperm.xlu0 (!%p251_p9), %1484, %v1062_v61  }
  0x39   : > { %1385 = vmatprep.subr.bf16.mxu0 %v1384_v57  ;;  %v1388_v3 = vpack.c.bf16 %v294_v1, %v291_v0  ;;  %v295_v4 = vld [vmem:[%s1694_s7 + $0x58] sm:$0x1]  ;;  %v290_v5 = vld [vmem:[%s1694_s7 + $0x30] sm:$0xff]  ;;  %v293_v6 = vld [vmem:[%s1694_s7 + $0x48] sm:$0x1]  ;;  %s1287_s24 = smul.u32 (%p1565_p5), 24, %s1205_s15 }
  0x3a   : > { %1396 = vmatpush3.bf16.msra.mxu1 %v1395_v62  ;;  %1387 = vmatpush1.bf16.msra.mxu0 %v1386_v63  ;;  %v1398_v7 = vpack.c.bf16 %v295_v4, %v292_v2  ;;  %v1391_v8 = vpack.c.bf16 %v293_v6, %v290_v5  ;;  %v1221_v9 = vld [vmem:[%s1694_s7 + $0x68] sm:$0xff]  ;;  %v1224_v10 = vld [vmem:[%s1694_s7 + $0x80] sm:$0xff]  ;;  %v1223_v13 = vld [vmem:[%s1694_s7 + $0x78] sm:$0xff] }
  0x3b   : > { %1397 = vmatprep.subr.bf16.mxu1 %v1510_v48  ;;  %1390 = vmatprep.subr.msk.bf16.mxu0 %vm1690_vm3, %v1388_v3  ;;  %v1401_v11 = vpack.c.bf16 %v1224_v10, %v1221_v9  ;;  %v1220_v12 = vld [vmem:[%s1694_s7 + $0x60] sm:$0xff]  ;;  %v1222_v14 = vld [vmem:[%s1694_s7 + $0x70] sm:$0xff]  ;;  %v1225_v15 = vld [vmem:[%s1694_s7 + $0x88] sm:$0xff]  ;;  %s1115_s14 = scalar_lea.vmem (%p1565_p5), %s1916_s3, %s1287_s24 }
  0x3c   : > { %v1227_v16 = vld [vmem:[%s1694_s7 + $0x98] sm:$0xff]  ;;  %v1230_v17 = vld [vmem:[%s1694_s7 + $0xb0] sm:$0x1]  ;;  %v1403_v19 = vpack.c.bf16 %v1223_v13, %v1220_v12  ;;  %v1412_v20 = vpack.c.bf16 %v1225_v15, %v1222_v14  ;;  %v1229_v23 = vld [vmem:[%s1694_s7 + $0xa8] sm:$0x1] }
  0x3d   : > { %v1226_v21 = vld [vmem:[%s1694_s7 + $0x90] sm:$0xff]  ;;  %v1405_v22 = vpack.c.bf16 %v1230_v17, %v1227_v16  ;;  %v1228_v24 = vld [vmem:[%s1694_s7 + $0xa0] sm:$0xff]  ;;  %v1231_v25 = vld [vmem:[%s1694_s7 + $0xb8] sm:$0x1] }
  0x3e   : > { %1400 = vmatpush3.bf16.msk.msra.mxu1 %vm1690_vm3, %v1398_v7  ;;  %1393 = vmatpush1.bf16.msk.msra.mxu0 %vm1690_vm3, %v1391_v8  ;;  %v1242_v26 = vld [vmem:[%s1694_s7 + $0xc8] sm:$0xff]  ;;  %v1245_v27 = vld [vmem:[%s1694_s7 + $0xe0] sm:$0xff]  ;;  %v1408_v29 = vpack.c.bf16 %v1229_v23, %v1226_v21  ;;  %v1415_v30 = vpack.c.bf16 %v1231_v25, %v1228_v24  ;;  %v1244_v34 = vld [vmem:[%s1694_s7 + $0xd8] sm:$0xff] }
  0x3f   : > { %1402 = vmatprep.subr.bf16.mxu0 %v1401_v11  ;;  %1411 = vmatprep.subr.bf16.mxu1 %v1510_v48  ;;  %v1418_v31 = vpack.c.bf16 %v1245_v27, %v1242_v26  ;;  %v1241_v33 = vld [vmem:[%s1694_s7 + $0xc0] sm:$0xff]  ;;  %v1243_v35 = vld [vmem:[%s1694_s7 + $0xd0] sm:$0xff]  ;;  %v1246_v36 = vld [vmem:[%s1694_s7 + $0xe8] sm:$0xff] }
  0x40   : > { %v1248_v37 = vld [vmem:[%s1694_s7 + $0xf8] sm:$0xff]  ;;  %v1251_v38 = vld [vmem:[%s1694_s7 + $0x110] sm:$0x1]  ;;  %v1420_v39 = vpack.c.bf16 %v1244_v34, %v1241_v33  ;;  %v1429_v40 = vpack.c.bf16 %v1246_v36, %v1243_v35  ;;  %v1250_v43 = vld [vmem:[%s1694_s7 + $0x108] sm:$0x1] }
  0x41   : > { %1325 = vmatmul.mubr.msk.f32.vlgmr.msra.gmra.mrb[0].mxu1 %vm296_vm4, %v1729_v18  ;;  %1213 = vmatmul.mubr.msk.f32.vlgmr.msra.gmra.mrb[0].mxu0 %vm296_vm4, %v1729_v18  ;;  %v1247_v41 = vld [vmem:[%s1694_s7 + $0xf0] sm:$0xff]  ;;  %v1422_v42 = vpack.c.bf16 %v1251_v38, %v1248_v37  ;;  %v1249_v44 = vld [vmem:[%s1694_s7 + $0x100] sm:$0xff]  ;;  %v1252_v45 = vld [vmem:[%s1694_s7 + $0x118] sm:$0x1] }
  0x42   : > { %1404 = vmatpush1.bf16.msra.mxu0 %v1403_v19  ;;  %1327 = vmatprep.mubr.msk.f32.mxu1 %vm1512_vm1, %v1511_v49  ;;  %v1263_v46 = vld [vmem:[%s1694_s7 + $0x128] sm:$0xff]  ;;  %v1266_v47 = vld [vmem:[%s1694_s7 + $0x140] sm:$0xff]  ;;  %v1425_v50 = vpack.c.bf16 %v1250_v43, %v1247_v41  ;;  %v1432_v51 = vpack.c.bf16 %v1252_v45, %v1249_v44  ;;  %v1265_v55 = vld [vmem:[%s1694_s7 + $0x138] sm:$0xff] }
  0x43   : > { %1413 = vmatpush3.bf16.msra.mxu1 %v1412_v20  ;;  %386 = vmatprep.mubr.f32.mxu0 %v1511_v49  ;;  %v1435_v53 = vpack.c.bf16 %v1266_v47, %v1263_v46  ;;  %v1262_v54 = vld [vmem:[%s1694_s7 + $0x120] sm:$0xff]  ;;  %v1264_v56 = vld [vmem:[%s1694_s7 + $0x130] sm:$0xff]  ;;  %v1267_v57 = vld [vmem:[%s1694_s7 + $0x148] sm:$0xff] }
  0x44   : > { %1407 = vmatprep.subr.msk.bf16.mxu0 %vm1690_vm3, %v1405_v22  ;;  %1414 = vmatprep.subr.bf16.mxu1 %v1510_v48  ;;  %v1269_v58 = vld [vmem:[%s1694_s7 + $0x158] sm:$0xff]  ;;  %v1272_v59 = vld [vmem:[%s1694_s7 + $0x170] sm:$0x1]  ;;  %v1437_v60 = vpack.c.bf16 %v1265_v55, %v1262_v54  ;;  %v1446_v61 = vpack.c.bf16 %v1267_v57, %v1264_v56  ;;  %v1271_v0 = vld [vmem:[%s1694_s7 + $0x168] sm:$0x1] }
  0x45   : > { %1328 = vmatmul.mubr.msk.f32.gmra.mrb[2].mxu1 %vm296_vm4, %v1747_v28  ;;  %1214 = vmatmul.mubr.msk.f32.gmra.mrb[2].mxu0 %vm296_vm4, %v1747_v28  ;;  %v1268_v62 = vld [vmem:[%s1694_s7 + $0x150] sm:$0xff]  ;;  %v1439_v63 = vpack.c.bf16 %v1272_v59, %v1269_v58  ;;  %v1270_v1 = vld [vmem:[%s1694_s7 + $0x160] sm:$0xff]  ;;  %v1273_v2 = vld [vmem:[%s1694_s7 + $0x178] sm:$0x1] }
  0x46   : > { %1330 = vmatprep.mubr.msk.f32.mxu1 %vm1512_vm1, %v1511_v49  ;;  %392 = vmatprep.mubr.f32.mxu0 %v1511_v49  ;;  %v1442_v3 = vpack.c.bf16 %v1271_v0, %v1268_v62  ;;  %v1449_v4 = vpack.c.bf16 %v1273_v2, %v1270_v1 }
  0x47   : > { %1410 = vmatpush1.bf16.msk.msra.mxu0 %vm1690_vm3, %v1408_v29  ;;  %1417 = vmatpush3.bf16.msk.msra.mxu1 %vm1690_vm3, %v1415_v30 }
  0x48   : > { %1419 = vmatprep.subr.bf16.mxu0 %v1418_v31  ;;  %1428 = vmatprep.subr.bf16.mxu1 %v1510_v48 }
  0x49   : > { %1331 = vmatmul.mubr.msk.f32.gmra.mrb[4].mxu1 %vm296_vm4, %v1763_v32  ;;  %1215 = vmatmul.mubr.msk.f32.gmra.mrb[4].mxu0 %vm296_vm4, %v1763_v32 }
  0x4a   : > { %1341 = vmatprep.mubr.msk.f32.mxu1 %vm1512_vm1, %v1511_v49  ;;  %565 = vmatprep.mubr.f32.mxu0 %v1511_v49 }
  0x4d   : > { %1342 = vmatmul.mubr.msk.f32.vlgmr.msra.gmra.mrb[6].mxu1 %vm296_vm4, %v1729_v18  ;;  %1234 = vmatmul.mubr.msk.f32.vlgmr.msra.gmra.mrb[6].mxu0 %vm296_vm4, %v1729_v18 }
  0x4e   : > { %1421 = vmatpush1.bf16.msra.mxu0 %v1420_v39  ;;  %1344 = vmatprep.mubr.msk.f32.mxu1 %vm1512_vm1, %v1511_v49 }
  0x4f   : > { %1430 = vmatpush3.bf16.msra.mxu1 %v1429_v40  ;;  %571 = vmatprep.mubr.f32.mxu0 %v1511_v49 }
  0x50   : > { %1424 = vmatprep.subr.msk.bf16.mxu0 %vm1690_vm3, %v1422_v42  ;;  %1431 = vmatprep.subr.bf16.mxu1 %v1510_v48 }
  0x51   : > { %1345 = vmatmul.mubr.msk.f32.gmra.mrb[8].mxu1 %vm296_vm4, %v1747_v28  ;;  %1235 = vmatmul.mubr.msk.f32.gmra.mrb[8].mxu0 %vm296_vm4, %v1747_v28 }
  0x52   : > { %1347 = vmatprep.mubr.msk.f32.mxu1 %vm1512_vm1, %v1511_v49  ;;  %577 = vmatprep.mubr.f32.mxu0 %v1511_v49 }
  0x53   : > { %1427 = vmatpush1.bf16.msk.msra.mxu0 %vm1690_vm3, %v1425_v50  ;;  %1434 = vmatpush3.bf16.msk.msra.mxu1 %vm1690_vm3, %v1432_v51 }
  0x54   : > { %1436 = vmatprep.subr.bf16.mxu0 %v1435_v53  ;;  %1445 = vmatprep.subr.bf16.mxu1 %v1510_v48 }
  0x55   : > { %1348 = vmatmul.mubr.msk.f32.gmra.mrb[10].mxu1 %vm296_vm4, %v1763_v32  ;;  %1236 = vmatmul.mubr.msk.f32.gmra.mrb[10].mxu0 %vm296_vm4, %v1763_v32 }
  0x56   : > { %1358 = vmatprep.mubr.msk.f32.mxu1 %vm1512_vm1, %v1511_v49  ;;  %759 = vmatprep.mubr.f32.mxu0 %v1511_v49 }
  0x59   : > { %1359 = vmatmul.mubr.msk.f32.vlgmr.msra.gmra.mrb[12].mxu1 %vm296_vm4, %v1729_v18  ;;  %1255 = vmatmul.mubr.msk.f32.vlgmr.msra.gmra.mrb[12].mxu0 %vm296_vm4, %v1729_v18 }
  0x5a   : > { %1438 = vmatpush1.bf16.msra.mxu0 %v1437_v60  ;;  %1361 = vmatprep.mubr.msk.f32.mxu1 %vm1512_vm1, %v1511_v49 }
  0x5b   : > { %1447 = vmatpush3.bf16.msra.mxu1 %v1446_v61  ;;  %765 = vmatprep.mubr.f32.mxu0 %v1511_v49 }
  0x5c   : > { %1441 = vmatprep.subr.msk.bf16.mxu0 %vm1690_vm3, %v1439_v63  ;;  %1448 = vmatprep.subr.bf16.mxu1 %v1510_v48 }
  0x5d   : > { %1362 = vmatmul.mubr.msk.f32.gmra.mrb[14].mxu1 %vm296_vm4, %v1747_v28  ;;  %1256 = vmatmul.mubr.msk.f32.gmra.mrb[14].mxu0 %vm296_vm4, %v1747_v28 }
  0x5e   : > { %1364 = vmatprep.mubr.msk.f32.mxu1 %vm1512_vm1, %v1511_v49  ;;  %771 = vmatprep.mubr.f32.mxu0 %v1511_v49 }
  0x5f   : > { %1444 = vmatpush1.bf16.msk.msra.mxu0 %vm1690_vm3, %v1442_v3  ;;  %1451 = vmatpush3.bf16.msk.msra.mxu1 %vm1690_vm3, %v1449_v4 }
  0x61   : > { %1365 = vmatmul.mubr.msk.f32.gmra.mrb[16].mxu1 %vm296_vm4, %v1763_v32  ;;  %1257 = vmatmul.mubr.msk.f32.gmra.mrb[16].mxu0 %vm296_vm4, %v1763_v32 }
  0x62   : > { %1375 = vmatprep.mubr.msk.f32.mxu1 %vm1512_vm1, %v1511_v49  ;;  %953 = vmatprep.mubr.f32.mxu0 %v1511_v49 }
  0x65   : > { %1376 = vmatmul.mubr.msk.f32.vlgmr.msra.gmra.mrb[18].mxu1 %vm296_vm4, %v1729_v18  ;;  %1276 = vmatmul.mubr.msk.f32.vlgmr.msra.gmra.mrb[18].mxu0 %vm296_vm4, %v1729_v18 }
  0x66   : > { %1378 = vmatprep.mubr.msk.f32.mxu1 %vm1512_vm1, %v1511_v49  ;;  %959 = vmatprep.mubr.f32.mxu0 %v1511_v49 }
  0x69   : > { %1379 = vmatmul.mubr.msk.f32.gmra.mrb[20].mxu1 %vm296_vm4, %v1747_v28  ;;  %1277 = vmatmul.mubr.msk.f32.gmra.mrb[20].mxu0 %vm296_vm4, %v1747_v28 }
  0x6a   : > { %1381 = vmatprep.mubr.msk.f32.mxu1 %vm1512_vm1, %v1511_v49  ;;  %965 = vmatprep.mubr.f32.mxu0 %v1511_v49 }
  0x6d   : > { %1382 = vmatmul.mubr.msk.f32.gmra.mrb[22].mxu1 %vm296_vm4, %v1763_v32  ;;  %1278 = vmatmul.mubr.msk.f32.gmra.mrb[22].mxu0 %vm296_vm4, %v1763_v32 }
  0xb3   : > { %v1067_v51 = vpop.permute.xlu0 %1066 }
 0x114   : > { %v382_v48 = vpop.f32.mrb[0].mxu0  ;;  %v465_v52 = vpop.f32.mrb[0].mxu1 }
 0x115   : > { %v384_v5 = vpop.f32.mrb[1].mxu0  ;;  %v1326_v6 = vpop.f32.mrb[1].mxu1 }
 0x118   : > { %v388_v7 = vpop.f32.mrb[2].mxu0  ;;  %v470_v8 = vpop.f32.mrb[2].mxu1 }
 0x119   : > { %v390_v9 = vpop.f32.mrb[3].mxu0  ;;  %v1329_v10 = vpop.f32.mrb[3].mxu1 }
 0x11c   : > { %v394_v11 = vpop.f32.mrb[4].mxu0  ;;  %v475_v12 = vpop.f32.mrb[4].mxu1 }
 0x11d   : > { %v396_v13 = vpop.f32.mrb[5].mxu0  ;;  %v1332_v14 = vpop.f32.mrb[5].mxu1 }
 0x120   : > { %v650_v15 = vpop.f32.mrb[6].mxu1  ;;  %v567_v49 = vpop.f32.mrb[6].mxu0 }
 0x121   : > { %v666_v16 = vmax.f32 %v465_v52, %v650_v15  ;;  %v664_v17 = vmax.f32 %v382_v48, %v567_v49  ;;  %v569_v18 = vpop.f32.mrb[7].mxu0  ;;  %v1343_v19 = vpop.f32.mrb[7].mxu1 }
 0x122   : > { %v665_v20 = vmax.f32 %v384_v5, %v569_v18  ;;  %v1072_v48 = vpop.permute.xlu0 %1071 }
 0x124   : > { %v655_v21 = vpop.f32.mrb[8].mxu1  ;;  %v573_v22 = vpop.f32.mrb[8].mxu0 }
 0x125   : > { %v669_v23 = vmax.f32 %v470_v8, %v655_v21  ;;  %v667_v24 = vmax.f32 %v388_v7, %v573_v22  ;;  %v575_v25 = vpop.f32.mrb[9].mxu0  ;;  %v1346_v26 = vpop.f32.mrb[9].mxu1 }
 0x126   : > { %v668_v27 = vmax.f32 %v390_v9, %v575_v25 }
 0x128   : > { %v660_v28 = vpop.f32.mrb[10].mxu1  ;;  %v579_v29 = vpop.f32.mrb[10].mxu0 }
 0x129   : > { %v672_v30 = vmax.f32 %v475_v12, %v660_v28  ;;  %v670_v31 = vmax.f32 %v394_v11, %v579_v29  ;;  %v581_v32 = vpop.f32.mrb[11].mxu0  ;;  %v1349_v33 = vpop.f32.mrb[11].mxu1 }
 0x12a   : > { %v671_v34 = vmax.f32 %v396_v13, %v581_v32 }
 0x12c   : > { %v844_v35 = vpop.f32.mrb[12].mxu1  ;;  %v761_v36 = vpop.f32.mrb[12].mxu0 }
 0x12d   : > { %v860_v37 = vmax.f32 %v666_v16, %v844_v35  ;;  %v858_v38 = vmax.f32 %v664_v17, %v761_v36  ;;  %v763_v39 = vpop.f32.mrb[13].mxu0  ;;  %v1360_v40 = vpop.f32.mrb[13].mxu1 }
 0x12e   : > { %v859_v41 = vmax.f32 %v665_v20, %v763_v39  ;;  %v1077_v16 = vpop.permute.xlu1 %1076 }
 0x130   : > { %v849_v42 = vpop.f32.mrb[14].mxu1  ;;  %v767_v43 = vpop.f32.mrb[14].mxu0 }
 0x131   : > { %v863_v44 = vmax.f32 %v669_v23, %v849_v42  ;;  %v861_v45 = vmax.f32 %v667_v24, %v767_v43  ;;  %v769_v46 = vpop.f32.mrb[15].mxu0  ;;  %v1363_v47 = vpop.f32.mrb[15].mxu1 }
 0x132   : > { %v862_v50 = vmax.f32 %v668_v27, %v769_v46 }
 0x134   : > { %v854_v53 = vpop.f32.mrb[16].mxu1  ;;  %v773_v54 = vpop.f32.mrb[16].mxu0 }
 0x135   : > { %v866_v55 = vmax.f32 %v672_v30, %v854_v53  ;;  %v864_v56 = vmax.f32 %v670_v31, %v773_v54  ;;  %v775_v57 = vpop.f32.mrb[17].mxu0  ;;  %v1366_v58 = vpop.f32.mrb[17].mxu1 }
 0x136   : > { %v865_v59 = vmax.f32 %v671_v34, %v775_v57 }
 0x138   : > { %v1038_v60 = vpop.f32.mrb[18].mxu1  ;;  %v955_v61 = vpop.f32.mrb[18].mxu0 }
 0x139   : > { %v1054_v62 = vmax.f32 %v860_v37, %v1038_v60  ;;  %v1052_v63 = vmax.f32 %v858_v38, %v955_v61  ;;  %v957_v0 = vpop.f32.mrb[19].mxu0  ;;  %v1377_v1 = vpop.f32.mrb[19].mxu1 }
 0x13a   : > { %v1053_v2 = vmax.f32 %v859_v41, %v957_v0 }
 0x13b   : > { %v1079_v3 = vadd.f32 %v1067_v51, %v1052_v63  ;;  %v1081_v4 = vadd.f32 %v1067_v51, %v1054_v62 }
 0x13c   : > { %v1080_v52 = vadd.f32 %v1067_v51, %v1053_v2  ;;  %v1043_v5 = vpop.f32.mrb[20].mxu1  ;;  %v961_v6 = vpop.f32.mrb[20].mxu0 }
 0x13d   : > { %v1088_v7 = vmax.f32 %v1079_v3, 0.0  ;;  %v1090_v8 = vmax.f32 %v1081_v4, 0.0  ;;  %v1057_v9 = vmax.f32 %v863_v44, %v1043_v5  ;;  %v1055_v10 = vmax.f32 %v861_v45, %v961_v6  ;;  %v963_v11 = vpop.f32.mrb[21].mxu0  ;;  %v1380_v12 = vpop.f32.mrb[21].mxu1 }
 0x13e   : > { %v1089_v13 = vmax.f32 %v1080_v52, 0.0  ;;  %v1056_v14 = vmax.f32 %v862_v50, %v963_v11 }
 0x13f   : > { %1097 = vst [vmem:[%s1876_s12] sm:$0xff] %v1088_v7  ;;  %1099 = vst [vmem:[%s1876_s12 + $0x10] sm:$0xff] %v1090_v8  ;;  %v1082_v15 = vadd.f32 %v1072_v48, %v1055_v10  ;;  %v1084_v49 = vadd.f32 %v1072_v48, %v1057_v9 }
 0x140   : > { %1098 = vst [vmem:[%s1876_s12 + $0x8] sm:$0xff] %v1089_v13  ;;  %v1083_v17 = vadd.f32 %v1072_v48, %v1056_v14  ;;  %v1048_v18 = vpop.f32.mrb[22].mxu1  ;;  %v967_v19 = vpop.f32.mrb[22].mxu0 }
 0x141   : > { %v1091_v20 = vmax.f32 %v1082_v15, 0.0  ;;  %v1093_v21 = vmax.f32 %v1084_v49, 0.0  ;;  %v1060_v22 = vmax.f32 %v866_v55, %v1048_v18  ;;  %v1058_v23 = vmax.f32 %v864_v56, %v967_v19  ;;  %v969_v24 = vpop.f32.mrb[23].mxu0  ;;  %v1383_v25 = vpop.f32.mrb[23].mxu1 }
 0x142   : > { %v1092_v26 = vmax.f32 %v1083_v17, 0.0  ;;  %v1059_v27 = vmax.f32 %v865_v59, %v969_v24  ;;  %1112 = sbr.rel (!%p1565_p5) target bundleno = 337 (0x151), region = 59 }
 0x143   : > { %1100 = vst [vmem:[%s1876_s12 + $0x18] sm:$0xff] %v1091_v20  ;;  %1102 = vst [vmem:[%s1876_s12 + $0x28] sm:$0xff] %v1093_v21  ;;  %v1085_v28 = vadd.f32 %v1077_v16, %v1058_v23  ;;  %v1087_v29 = vadd.f32 %v1077_v16, %v1060_v22 }
 0x144   : > { %1101 = vst [vmem:[%s1876_s12 + $0x20] sm:$0xff] %v1092_v26  ;;  %v1086_v30 = vadd.f32 %v1077_v16, %v1059_v27 }
 0x145   : > { %v1094_v31 = vmax.f32 %v1085_v28, 0.0  ;;  %v1096_v32 = vmax.f32 %v1087_v29, 0.0 }
 0x146   : > { %v1095_v33 = vmax.f32 %v1086_v30, 0.0  ;;  %v1128_v34 = vld [vmem:[%s1876_s12] sm:$0xff] (%p1565_p5)  ;;  %v1132_v36 = vld [vmem:[%s1876_s12 + $0x10] sm:$0xff] (%p1565_p5) }
 0x147   : > { %1103 = vst [vmem:[%s1876_s12 + $0x30] sm:$0xf] %v1094_v31  ;;  %1105 = vst [vmem:[%s1876_s12 + $0x40] sm:$0xf] %v1096_v32  ;;  %v1130_v35 = vld [vmem:[%s1876_s12 + $0x8] sm:$0xff] (%p1565_p5) }
 0x148   : > { %1104 = vst [vmem:[%s1876_s12 + $0x38] sm:$0xf] %v1095_v33  ;;  %1129 = vst [vmem:[%s1115_s14] sm:$0xff] (%p1565_p5), %v1128_v34 }
 0x149   : > { %1131 = vst [vmem:[%s1115_s14 + $0x8] sm:$0xff] %v1130_v35  ;;  %1133 = vst [vmem:[%s1115_s14 + $0x10] sm:$0xff] %v1132_v36 }
 0x14a   : > { %v1134_v37 = vld [vmem:[%s1876_s12 + $0x18] sm:$0xff]  ;;  %v1138_v39 = vld [vmem:[%s1876_s12 + $0x28] sm:$0xff] }
 0x14b   : > { %v1136_v38 = vld [vmem:[%s1876_s12 + $0x20] sm:$0xff]  ;;  %1135 = vst [vmem:[%s1115_s14 + $0x48] sm:$0xff] %v1134_v37  ;;  %1139 = vst [vmem:[%s1115_s14 + $0x58] sm:$0xff] %v1138_v39 }
 0x14c   : > { %1137 = vst [vmem:[%s1115_s14 + $0x50] sm:$0xff] %v1136_v38 }
 0x14e   : > { %v1140_v40 = vld [vmem:[%s1876_s12 + $0x30] sm:$0xff]  ;;  %v1144_v42 = vld [vmem:[%s1876_s12 + $0x40] sm:$0xff] }
 0x14f   : > { %v1142_v41 = vld [vmem:[%s1876_s12 + $0x38] sm:$0xff]  ;;  %1141 = vst [vmem:[%s1115_s14 + $0x90] sm:$0xff] %v1140_v40  ;;  %1145 = vst [vmem:[%s1115_s14 + $0xa0] sm:$0xff] %v1144_v42 }
 0x150   : > { %1143 = vst [vmem:[%s1115_s14 + $0x98] sm:$0xff] %v1142_v41 }
 0x151 PF: > { %p10_p10 = scmp.ge.s32.totalorder %s1552_s16, 5   ;;  %s1920_s12 = smov %s1504_s13 }
 0x152   : > { %s1921_s13 = smov %s1563_s19  ;;  %s1922_s14 = smov %s1552_s16 }
 0x153   :  { %12 = sbr.rel (!%p10_p10) target bundleno = 2 (0x2), region = 116 }

// kernel: simple_classify_mil_forward.4
= control target key start
LH: loop header
LB: loop body
LE: loop exit
PB: predicated region body
PF: predicated region fallthrough
CT: control target
= control target key end

     0   :  { %v1978_v0 = vmov 0.0|0.0   ;;  %vm105_vm0 = vcmask 949248   ;;  %vm127_vm1 = vcmask 1043456   ;;  %s3204_s0 = inlined_call_operand.vmem [shape: f32[4,500,128], index: 0, kind: input, shape index: {}]   ;;  %s3205_s1 = inlined_call_operand.vmem [shape: f32[50,500], index: 1, kind: input, shape index: {}]   ;;  %s3206_s2 = inlined_call_operand.vmem [shape: f32[50,1], index: 2, kind: input, shape index: {}]   ;;  %s3207_s3 = inlined_call_operand.vmem [shape: f32[50,128], index: 3, kind: output, shape index: {}]  }
   0x1   :  { %1685 = vmatprep.subr.bf16.mxu1 %v1978_v0  ;;  %v58_v1 = vld [vmem:[%s3204_s0 + $0x80] sm:$0xff]  ;;  %v59_v2 = vld [vmem:[%s3204_s0 + $0x88] sm:$0xff]  ;;  %v60_v10 = vld [vmem:[%s3204_s0 + $0x90] sm:$0xff] }
   0x2   :  { %v74_v3 = vld [vmem:[%s3204_s0 + $0x100] sm:$0xff]  ;;  %v1653_v4 = vpack.c.bf16 %v59_v2, %v58_v1  ;;  %v75_v5 = vld [vmem:[%s3204_s0 + $0x108] sm:$0xff]  ;;  %v61_v11 = vld [vmem:[%s3204_s0 + $0x98] sm:$0xff] }
   0x3   :  { %v42_v6 = vld [vmem:[%s3204_s0] sm:$0xff]  ;;  %v43_v7 = vld [vmem:[%s3204_s0 + $0x8] sm:$0xff]  ;;  %v1686_v8 = vpack.c.bf16 %v75_v5, %v74_v3  ;;  %v76_v12 = vld [vmem:[%s3204_s0 + $0x110] sm:$0xff]  ;;  %v1657_v13 = vpack.c.bf16 %v61_v11, %v60_v10 }
   0x4   :  { %v1655_v9 = vpack.c.bf16 %v43_v7, %v42_v6  ;;  %1654 = vmatprep.subr.bf16.mxu0 %v1653_v4  ;;  %v77_v14 = vld [vmem:[%s3204_s0 + $0x118] sm:$0xff]  ;;  %v44_v15 = vld [vmem:[%s3204_s0 + $0x10] sm:$0xff]  ;;  %v62_v19 = vld [vmem:[%s3204_s0 + $0xa0] sm:$0xff] }
   0x5   :  { %v45_v16 = vld [vmem:[%s3204_s0 + $0x18] sm:$0xff]  ;;  %1687 = vmatpush1.bf16.msra.mxu1 %v1686_v8  ;;  %v1689_v17 = vpack.c.bf16 %v77_v14, %v76_v12  ;;  %v63_v20 = vld [vmem:[%s3204_s0 + $0xa8] sm:$0xff]  ;;  %v78_v21 = vld [vmem:[%s3204_s0 + $0x120] sm:$0xff] }
   0x6   :  { %1656 = vmatpush3.bf16.msra.mxu0 %v1655_v9  ;;  %v1659_v18 = vpack.c.bf16 %v45_v16, %v44_v15  ;;  %1688 = vmatprep.subr.bf16.mxu1 %v1978_v0  ;;  %v1661_v22 = vpack.c.bf16 %v63_v20, %v62_v19  ;;  %v79_v23 = vld [vmem:[%s3204_s0 + $0x128] sm:$0xff]  ;;  %v46_v24 = vld [vmem:[%s3204_s0 + $0x20] sm:$0xff]  ;;  %v64_v26 = vld [vmem:[%s3204_s0 + $0xb0] sm:$0xff] }
   0x7   :  { %1658 = vmatprep.subr.bf16.mxu0 %v1657_v13  ;;  %v47_v25 = vld [vmem:[%s3204_s0 + $0x28] sm:$0xff]  ;;  %v65_v27 = vld [vmem:[%s3204_s0 + $0xb8] sm:$0xff]  ;;  %v1692_v28 = vpack.c.bf16 %v79_v23, %v78_v21  ;;  %v80_v30 = vld [vmem:[%s3204_s0 + $0x130] sm:$0xff] }
   0x8   :  { %v1663_v29 = vpack.c.bf16 %v47_v25, %v46_v24  ;;  %v1665_v31 = vpack.c.bf16 %v65_v27, %v64_v26  ;;  %v81_v32 = vld [vmem:[%s3204_s0 + $0x138] sm:$0xff]  ;;  %v48_v33 = vld [vmem:[%s3204_s0 + $0x30] sm:$0xff]  ;;  %v66_v35 = vld [vmem:[%s3204_s0 + $0xc0] sm:$0xff] }
   0x9   :  { %1690 = vmatpush1.bf16.msra.mxu1 %v1689_v17  ;;  %v49_v34 = vld [vmem:[%s3204_s0 + $0x38] sm:$0xff]  ;;  %v67_v36 = vld [vmem:[%s3204_s0 + $0xc8] sm:$0xff]  ;;  %v1695_v37 = vpack.c.bf16 %v81_v32, %v80_v30  ;;  %v82_v39 = vld [vmem:[%s3204_s0 + $0x140] sm:$0xff] }
   0xa   :  { %1660 = vmatpush3.bf16.msra.mxu0 %v1659_v18  ;;  %1691 = vmatprep.subr.bf16.mxu1 %v1978_v0  ;;  %v1667_v38 = vpack.c.bf16 %v49_v34, %v48_v33  ;;  %v1669_v40 = vpack.c.bf16 %v67_v36, %v66_v35  ;;  %v83_v41 = vld [vmem:[%s3204_s0 + $0x148] sm:$0xff]  ;;  %v50_v42 = vld [vmem:[%s3204_s0 + $0x40] sm:$0xff]  ;;  %v68_v44 = vld [vmem:[%s3204_s0 + $0xd0] sm:$0xff] }
   0xb   :  { %1662 = vmatprep.subr.bf16.mxu0 %v1661_v22  ;;  %v51_v43 = vld [vmem:[%s3204_s0 + $0x48] sm:$0xff]  ;;  %v69_v45 = vld [vmem:[%s3204_s0 + $0xd8] sm:$0xff]  ;;  %v1698_v46 = vpack.c.bf16 %v83_v41, %v82_v39  ;;  %v84_v48 = vld [vmem:[%s3204_s0 + $0x150] sm:$0xff] }
   0xc   :  { %v1671_v47 = vpack.c.bf16 %v51_v43, %v50_v42  ;;  %v2107_v49 = vld [vmem:[%s3205_s1 + $0x8] sm:$0xff]  ;;  %v1673_v50 = vpack.c.bf16 %v69_v45, %v68_v44  ;;  %v85_v51 = vld [vmem:[%s3204_s0 + $0x158] sm:$0xff]  ;;  %v52_v52 = vld [vmem:[%s3204_s0 + $0x50] sm:$0xff] }
   0xd   :  { %1693 = vmatpush1.bf16.msra.mxu1 %v1692_v28  ;;  %v53_v53 = vld [vmem:[%s3204_s0 + $0x58] sm:$0xff]  ;;  %v70_v54 = vld [vmem:[%s3204_s0 + $0xe0] sm:$0xff]  ;;  %v71_v55 = vld [vmem:[%s3204_s0 + $0xe8] sm:$0xff]  ;;  %195 = vmatprep.mubr.f32.mxu0 %v2107_v49  ;;  %v1701_v56 = vpack.c.bf16 %v85_v51, %v84_v48 }
   0xe   :  { %1664 = vmatpush3.bf16.msra.mxu0 %v1663_v29  ;;  %1694 = vmatprep.subr.bf16.mxu1 %v1978_v0  ;;  %v1675_v57 = vpack.c.bf16 %v53_v53, %v52_v52  ;;  %v86_v58 = vld [vmem:[%s3204_s0 + $0x160] sm:$0xff]  ;;  %v1677_v59 = vpack.c.bf16 %v71_v55, %v70_v54  ;;  %v87_v60 = vld [vmem:[%s3204_s0 + $0x168] sm:$0xff]  ;;  %v72_v63 = vld [vmem:[%s3204_s0 + $0xf0] sm:$0xff] }
   0xf   :  { %1666 = vmatprep.subr.bf16.mxu0 %v1665_v31  ;;  %v54_v61 = vld [vmem:[%s3204_s0 + $0x60] sm:$0xff]  ;;  %v55_v62 = vld [vmem:[%s3204_s0 + $0x68] sm:$0xff]  ;;  %v73_v1 = vld [vmem:[%s3204_s0 + $0xf8] sm:$0xff]  ;;  %v1704_v2 = vpack.c.bf16 %v87_v60, %v86_v58 }
  0x10   :  { %v1679_v3 = vpack.c.bf16 %v55_v62, %v54_v61  ;;  %v88_v4 = vld [vmem:[%s3204_s0 + $0x170] sm:$0xff]  ;;  %v1681_v5 = vpack.c.bf16 %v73_v1, %v72_v63  ;;  %v89_v6 = vld [vmem:[%s3204_s0 + $0x178] sm:$0xff]  ;;  %v1245_v10 = vld [vmem:[%s3204_s0 + $0x280] sm:$0xff] }
  0x11   :  { %1696 = vmatpush1.bf16.msra.mxu1 %v1695_v37  ;;  %v56_v7 = vld [vmem:[%s3204_s0 + $0x70] sm:$0xff]  ;;  %v57_v8 = vld [vmem:[%s3204_s0 + $0x78] sm:$0xff]  ;;  %v1707_v11 = vpack.c.bf16 %v89_v6, %v88_v4  ;;  %v90_v13 = vld [vmem:[%s3204_s0 + $0x180] sm:$0xff] }
  0x12   :  { %1668 = vmatpush3.bf16.msra.mxu0 %v1667_v38  ;;  %1697 = vmatprep.subr.bf16.mxu1 %v1978_v0  ;;  %v1244_v9 = vld [vmem:[%s3204_s0 + $0x278] sm:$0xff]  ;;  %v1683_v12 = vpack.c.bf16 %v57_v8, %v56_v7  ;;  %v91_v14 = vld [vmem:[%s3204_s0 + $0x188] sm:$0xff]  ;;  %v1229_v17 = vld [vmem:[%s3204_s0 + $0x200] sm:$0xff] }
  0x13   :  { %1670 = vmatprep.subr.bf16.mxu0 %v1669_v40  ;;  %v1730_v15 = vpack.c.bf16 %v1245_v10, %v1244_v9  ;;  %v1228_v16 = vld [vmem:[%s3204_s0 + $0x1f8] sm:$0xff]  ;;  %v1246_v18 = vld [vmem:[%s3204_s0 + $0x288] sm:$0xff]  ;;  %v1247_v19 = vld [vmem:[%s3204_s0 + $0x290] sm:$0xff]  ;;  %v1710_v21 = vpack.c.bf16 %v91_v14, %v90_v13 }
  0x14   :  { %v2186_v20 = vld [vmem:[%s3205_s1] sm:$0xff]  ;;  %v1732_v22 = vpack.c.bf16 %v1229_v17, %v1228_v16  ;;  %v92_v23 = vld [vmem:[%s3204_s0 + $0x190] sm:$0xff]  ;;  %v93_v24 = vld [vmem:[%s3204_s0 + $0x198] sm:$0xff]  ;;  %v1734_v25 = vpack.c.bf16 %v1247_v19, %v1246_v18 }
  0x15   :  { %1699 = vmatpush1.bf16.msra.mxu1 %v1698_v46  ;;  %v1230_v26 = vld [vmem:[%s3204_s0 + $0x208] sm:$0xff]  ;;  %v1231_v27 = vld [vmem:[%s3204_s0 + $0x210] sm:$0xff]  ;;  %v1248_v28 = vld [vmem:[%s3204_s0 + $0x298] sm:$0xff]  ;;  %v1713_v32 = vpack.c.bf16 %v93_v24, %v92_v23 }
  0x16   :  { %1672 = vmatpush3.bf16.msra.mxu0 %v1671_v47  ;;  %1700 = vmatprep.subr.bf16.mxu1 %v1978_v0  ;;  %v1249_v29 = vld [vmem:[%s3204_s0 + $0x2a0] sm:$0xff]  ;;  %v2211_v30 = vld [vmem:[%s3205_s1 + $0x28] sm:$0xff]  ;;  %v2216_v31 = vld [vmem:[%s3205_s1 + $0x18] sm:$0xff]  ;;  %v1736_v33 = vpack.c.bf16 %v1231_v27, %v1230_v26 }
  0x17   :  { %1674 = vmatprep.subr.bf16.mxu0 %v1673_v50  ;;  %v2221_v34 = vld [vmem:[%s3205_s1 + $0x20] sm:$0xff]  ;;  %v95_v36 = vld [vmem:[%s3204_s0 + $0x1a8] sm:$0xff]  ;;  %v1738_v37 = vpack.c.bf16 %v1249_v29, %v1248_v28  ;;  %v1232_v38 = vld [vmem:[%s3204_s0 + $0x218] sm:$0xff]  ;;  %1221 = vmatprep.mubr.msk.f32.mxu1 %vm105_vm0, %v2216_v31 }
  0x18   :  { %v94_v35 = vld [vmem:[%s3204_s0 + $0x1a0] sm:$0xff]  ;;  %v1250_v40 = vld [vmem:[%s3204_s0 + $0x2a8] sm:$0xff]  ;;  %v1251_v41 = vld [vmem:[%s3204_s0 + $0x2b0] sm:$0xff] }
  0x19   :  { %1702 = vmatpush1.bf16.msra.mxu1 %v1701_v56  ;;  %v1233_v39 = vld [vmem:[%s3204_s0 + $0x220] sm:$0xff]  ;;  %v2249_v42 = vld [vmem:[%s3205_s1 + $0x48] sm:$0xff]  ;;  %v1716_v43 = vpack.c.bf16 %v95_v36, %v94_v35  ;;  %v96_v46 = vld [vmem:[%s3204_s0 + $0x1b0] sm:$0xff]  ;;  %v1742_v48 = vpack.c.bf16 %v1251_v41, %v1250_v40  ;;  %v1979_v40 = vmov 0.0  }
  0x1a   :  { %1676 = vmatpush3.bf16.msra.mxu0 %v1675_v57  ;;  %1703 = vmatprep.subr.bf16.mxu1 %v1978_v0  ;;  %v1740_v44 = vpack.c.bf16 %v1233_v39, %v1232_v38  ;;  %v2254_v45 = vld [vmem:[%s3205_s1 + $0x40] sm:$0xff]  ;;  %v97_v47 = vld [vmem:[%s3204_s0 + $0x1b8] sm:$0xff]  ;;  %v1234_v50 = vld [vmem:[%s3204_s0 + $0x228] sm:$0xff] }
  0x1b   :  { %1678 = vmatprep.subr.bf16.mxu0 %v1677_v59  ;;  %v1235_v51 = vld [vmem:[%s3204_s0 + $0x230] sm:$0xff]  ;;  %v1252_v52 = vld [vmem:[%s3204_s0 + $0x2b8] sm:$0xff]  ;;  %v1253_v53 = vld [vmem:[%s3204_s0 + $0x2c0] sm:$0xff]  ;;  %v1719_v55 = vpack.c.bf16 %v97_v47, %v96_v46 }
  0x1c   :  { %v2280_v54 = vld [vmem:[%s3205_s1 + $0x68] sm:$0xff]  ;;  %v1744_v56 = vpack.c.bf16 %v1235_v51, %v1234_v50  ;;  %v2285_v57 = vld [vmem:[%s3205_s1 + $0x60] sm:$0xff]  ;;  %v1746_v60 = vpack.c.bf16 %v1253_v53, %v1252_v52  ;;  %v1236_v61 = vld [vmem:[%s3204_s0 + $0x238] sm:$0xff] }
  0x1d   :  { %1705 = vmatpush1.bf16.msra.mxu1 %v1704_v2  ;;  %v98_v58 = vld [vmem:[%s3204_s0 + $0x1c0] sm:$0xff]  ;;  %v99_v59 = vld [vmem:[%s3204_s0 + $0x1c8] sm:$0xff]  ;;  %v1255_v1 = vld [vmem:[%s3204_s0 + $0x2d0] sm:$0xff] }
  0x1e   :  { %1680 = vmatpush3.bf16.msra.mxu0 %v1679_v3  ;;  %1706 = vmatprep.subr.bf16.mxu1 %v1978_v0  ;;  %v1237_v62 = vld [vmem:[%s3204_s0 + $0x240] sm:$0xff]  ;;  %v1254_v63 = vld [vmem:[%s3204_s0 + $0x2c8] sm:$0xff]  ;;  %v1722_v3 = vpack.c.bf16 %v99_v59, %v98_v58  ;;  %v100_v6 = vld [vmem:[%s3204_s0 + $0x1d0] sm:$0xff] }
  0x1f   :  { %1682 = vmatprep.subr.bf16.mxu0 %v1681_v5  ;;  %v2311_v2 = vld [vmem:[%s3205_s1 + $0x88] sm:$0xff]  ;;  %v1748_v4 = vpack.c.bf16 %v1237_v62, %v1236_v61  ;;  %v2316_v5 = vld [vmem:[%s3205_s1 + $0x80] sm:$0xff]  ;;  %v101_v7 = vld [vmem:[%s3204_s0 + $0x1d8] sm:$0xff]  ;;  %v1750_v8 = vpack.c.bf16 %v1255_v1, %v1254_v63 }
  0x20   :  { %v1238_v9 = vld [vmem:[%s3204_s0 + $0x248] sm:$0xff]  ;;  %v1239_v10 = vld [vmem:[%s3204_s0 + $0x250] sm:$0xff]  ;;  %v1725_v14 = vpack.c.bf16 %v101_v7, %v100_v6  ;;  %v2347_v16 = vld [vmem:[%s3205_s1 + $0xa0] sm:$0xff] }
  0x21   :  { %1708 = vmatpush1.bf16.msra.mxu1 %v1707_v11  ;;  %v1256_v11 = vld [vmem:[%s3204_s0 + $0x2d8] sm:$0xff]  ;;  %v2342_v13 = vld [vmem:[%s3205_s1 + $0xa8] sm:$0xff]  ;;  %v102_v17 = vld [vmem:[%s3204_s0 + $0x1e0] sm:$0xff] }
  0x22   :  { %1684 = vmatpush3.bf16.msra.mxu0 %v1683_v12  ;;  %1709 = vmatprep.subr.bf16.mxu1 %v1978_v0  ;;  %v1257_v12 = vld [vmem:[%s3204_s0 + $0x2e0] sm:$0xff]  ;;  %v103_v18 = vld [vmem:[%s3204_s0 + $0x1e8] sm:$0xff]  ;;  %v1259_v24 = vld [vmem:[%s3204_s0 + $0x2f0] sm:$0xff] }
  0x23   :  { %1731 = vmatprep.subr.bf16.mxu0 %v1730_v15  ;;  %v1752_v15 = vpack.c.bf16 %v1239_v10, %v1238_v9  ;;  %v1754_v19 = vpack.c.bf16 %v1257_v12, %v1256_v11  ;;  %v1258_v23 = vld [vmem:[%s3204_s0 + $0x2e8] sm:$0xff]  ;;  %v1728_v26 = vpack.c.bf16 %v103_v18, %v102_v17  ;;  %v2378_v28 = vld [vmem:[%s3205_s1 + $0xc0] sm:$0x3]  ;;  %v1260_v35 = vld [vmem:[%s3204_s0 + $0x2f8] sm:$0xff] }
  0x24   :  { %v1758_v29 = vpack.c.bf16 %v1259_v24, %v1258_v23  ;;  %v1261_v36 = vld [vmem:[%s3204_s0 + $0x300] sm:$0xff]  ;;  %v1315_v38 = vld [vmem:[%s3204_s0 + $0x470] sm:$0xff]  ;;  %v1316_v39 = vld [vmem:[%s3204_s0 + $0x478] sm:$0xff] }
  0x25   :  { %196 = vmatmul.mubr.f32.vlgmr.msra.gmra.mrb[0].mxu0 %v2186_v20  ;;  %1711 = vmatpush1.bf16.msra.mxu1 %v1710_v21  ;;  %v1240_v21 = vld [vmem:[%s3204_s0 + $0x258] sm:$0xff]  ;;  %v104_v41 = vld [vmem:[%s3204_s0 + $0x1f0] sm:$0xf]  ;;  %v1763_v47 = vpack.c.bf16 %v1261_v36, %v1260_v35  ;;  %v1318_v50 = vld [vmem:[%s3204_s0 + $0x488] sm:$0xff]  ;;  %v1807_v52 = vpack.c.bf16 %v1316_v39, %v1315_v38 }
  0x26   :  { %1733 = vmatpush3.bf16.msra.mxu0 %v1732_v22  ;;  %1712 = vmatprep.subr.bf16.mxu1 %v1978_v0  ;;  %v1241_v22 = vld [vmem:[%s3204_s0 + $0x260] sm:$0xff]  ;;  %v2414_v46 = vld [vmem:[%s3205_s1 + $0x10] sm:$0xff]  ;;  %v2426_v51 = vld [vmem:[%s3205_s1 + $0x38] sm:$0xff] }
  0x27   :  { %1735 = vmatprep.subr.bf16.mxu0 %v1734_v25  ;;  %200 = vmatprep.mubr.f32.mxu0 %v2211_v30  ;;  %v2373_v25 = vld [vmem:[%s3205_s1 + $0xc8] sm:$0x3]  ;;  %v1756_v27 = vpack.c.bf16 %v1241_v22, %v1240_v21  ;;  %v1301_v59 = vld [vmem:[%s3204_s0 + $0x400] sm:$0xff]  ;;  %v2448_v61 = vld [vmem:[%s3205_s1 + $0x30] sm:$0xff] }
  0x28   :  { %v1262_v53 = vld [vmem:[%s3204_s0 + $0x308] sm:$0xff]  ;;  %v2454_v63 = vld [vmem:[%s3205_s1 + $0x58] sm:$0xff]  ;;  %v1319_v6 = vld [vmem:[%s3204_s0 + $0x490] sm:$0xff] }
  0x29   :  { %201 = vmatmul.mubr.f32.gmra.mrb[2].mxu0 %v2221_v34  ;;  %1714 = vmatpush1.bf16.msra.mxu1 %v1713_v32  ;;  %v1242_v32 = vld [vmem:[%s3204_s0 + $0x268] sm:$0xff]  ;;  %v1264_v1 = vld [vmem:[%s3204_s0 + $0x318] sm:$0xff]  ;;  %v2481_v10 = vld [vmem:[%s3205_s1 + $0x50] sm:$0xff] }
  0x2a   :  { %1737 = vmatpush3.bf16.msra.mxu0 %v1736_v33  ;;  %1715 = vmatprep.subr.bf16.mxu1 %v1978_v0  ;;  %v1243_v33 = vld [vmem:[%s3204_s0 + $0x270] sm:$0xff]  ;;  %v1320_v7 = vld [vmem:[%s3204_s0 + $0x498] sm:$0xff]  ;;  %v1322_v21 = vld [vmem:[%s3204_s0 + $0x4a8] sm:$0xff] }
  0x2b   :  { %1739 = vmatprep.subr.bf16.mxu0 %v1738_v37  ;;  %205 = vmatprep.mubr.f32.mxu0 %v2249_v42  ;;  %v1760_v37 = vpack.c.bf16 %v1243_v33, %v1242_v32  ;;  %v1304_v9 = vld [vmem:[%s3204_s0 + $0x418] sm:$0xff]  ;;  %v1267_v17 = vld [vmem:[%s3204_s0 + $0x330] sm:$0xff]  ;;  %v1305_v22 = vld [vmem:[%s3204_s0 + $0x420] sm:$0xff] }
  0x2c   :  { %v2488_v12 = vld [vmem:[%s3205_s1 + $0x78] sm:$0xff]  ;;  %v1306_v23 = vld [vmem:[%s3204_s0 + $0x428] sm:$0xff]  ;;  %v2515_v24 = vld [vmem:[%s3205_s1 + $0x70] sm:$0xff] }
  0x2d   :  { %206 = vmatmul.mubr.f32.gmra.mrb[4].mxu0 %v2254_v45  ;;  %1717 = vmatpush1.bf16.msra.mxu1 %v1716_v43  ;;  %v1299_v43 = vld [vmem:[%s3204_s0 + $0x3f0] sm:$0xff]  ;;  %v1268_v32 = vld [vmem:[%s3204_s0 + $0x338] sm:$0xff]  ;;  %v1269_v33 = vld [vmem:[%s3204_s0 + $0x340] sm:$0xff]  ;;  %v1821_v35 = vpack.c.bf16 %v1306_v23, %v1305_v22 }
  0x2e   :  { %1741 = vmatpush3.bf16.msra.mxu0 %v1740_v44  ;;  %1718 = vmatprep.subr.bf16.mxu1 %v1978_v0  ;;  %v1300_v44 = vld [vmem:[%s3204_s0 + $0x3f8] sm:$0xff]  ;;  %v1323_v36 = vld [vmem:[%s3204_s0 + $0x4b0] sm:$0xff] }
  0x2f   :  { %1743 = vmatprep.subr.bf16.mxu0 %v1742_v48  ;;  %210 = vmatprep.mubr.f32.mxu0 %v2280_v54  ;;  %v1317_v48 = vld [vmem:[%s3204_s0 + $0x480] sm:$0xff]  ;;  %v1307_v38 = vld [vmem:[%s3204_s0 + $0x430] sm:$0xff]  ;;  %v1308_v39 = vld [vmem:[%s3204_s0 + $0x438] sm:$0xff] }
  0x30   :  { %v1811_v58 = vpack.c.bf16 %v1318_v50, %v1317_v48  ;;  %v1270_v48 = vld [vmem:[%s3204_s0 + $0x348] sm:$0xff]  ;;  %v1271_v50 = vld [vmem:[%s3204_s0 + $0x350] sm:$0xff] }
  0x31   :  { %211 = vmatmul.mubr.f32.gmra.mrb[6].mxu0 %v2285_v57  ;;  %1720 = vmatpush1.bf16.msra.mxu1 %v1719_v55  ;;  %v1263_v55 = vld [vmem:[%s3204_s0 + $0x310] sm:$0xff] }
  0x32   :  { %1745 = vmatpush3.bf16.msra.mxu0 %v1744_v56  ;;  %1721 = vmatprep.subr.bf16.mxu1 %v1978_v0  ;;  %v1809_v56 = vpack.c.bf16 %v1300_v44, %v1299_v43  ;;  %v1766_v62 = vpack.c.bf16 %v1263_v55, %v1262_v53  ;;  %v1775_v43 = vpack.c.bf16 %v1269_v33, %v1268_v32  ;;  %v2555_v44 = vld [vmem:[%s3205_s1 + $0xb8] sm:$0xff]  ;;  %v1325_v53 = vld [vmem:[%s3204_s0 + $0x4c0] sm:$0xff]  ;;  %v1326_v55 = vld [vmem:[%s3204_s0 + $0x4c8] sm:$0xff] }
  0x33   :  { %1747 = vmatprep.subr.bf16.mxu0 %v1746_v60  ;;  %215 = vmatprep.mubr.f32.mxu0 %v2311_v2  ;;  %v1302_v60 = vld [vmem:[%s3204_s0 + $0x408] sm:$0xff]  ;;  %v1275_v22 = vld [vmem:[%s3204_s0 + $0x370] sm:$0xff] }
  0x34   :  { %v1314_v32 = vld [vmem:[%s3204_s0 + $0x468] sm:$0xff] }
  0x35   :  { %216 = vmatmul.mubr.f32.gmra.mrb[8].mxu0 %v2316_v5  ;;  %1723 = vmatpush1.bf16.msra.mxu1 %v1722_v3  ;;  %v1265_v3 = vld [vmem:[%s3204_s0 + $0x320] sm:$0xff] }
  0x36   :  { %1749 = vmatpush3.bf16.msra.mxu0 %v1748_v4  ;;  %1724 = vmatprep.subr.bf16.mxu1 %v1978_v0  ;;  %v1813_v4 = vpack.c.bf16 %v1302_v60, %v1301_v59  ;;  %v1769_v11 = vpack.c.bf16 %v1265_v3, %v1264_v1  ;;  %v2583_v59 = vld [vmem:[%s3205_s1 + $0xb0] sm:$0xff]  ;;  %v1778_v60 = vpack.c.bf16 %v1271_v50, %v1270_v48  ;;  %v1272_v1 = vld [vmem:[%s3204_s0 + $0x358] sm:$0xff] }
  0x37   :  { %1751 = vmatprep.subr.bf16.mxu0 %v1750_v8  ;;  %220 = vmatprep.mubr.f32.mxu0 %v2342_v13  ;;  %v1303_v8 = vld [vmem:[%s3204_s0 + $0x410] sm:$0xff]  ;;  %v1827_v3 = vpack.c.bf16 %v1326_v55, %v1325_v53  ;;  %v1280_v55 = vld [vmem:[%s3204_s0 + $0x398] sm:$0xff] }
  0x38   :  { %v1817_v18 = vpack.c.bf16 %v1304_v9, %v1303_v8  ;;  %v1311_v9 = vld [vmem:[%s3204_s0 + $0x450] sm:$0xff] }
  0x39   :  { %221 = vmatmul.mubr.f32.gmra.mrb[10].mxu0 %v2347_v16  ;;  %1726 = vmatpush1.bf16.msra.mxu1 %v1725_v14  ;;  %v1815_v14 = vpack.c.bf16 %v1320_v7, %v1319_v6  ;;  %v1327_v6 = vld [vmem:[%s3204_s0 + $0x4d0] sm:$0xff]  ;;  %v1328_v7 = vld [vmem:[%s3204_s0 + $0x4d8] sm:$0xff] }
  0x3a   :  { %1753 = vmatpush3.bf16.msra.mxu0 %v1752_v15  ;;  %1727 = vmatprep.subr.bf16.mxu1 %v1978_v0  ;;  %v1266_v15 = vld [vmem:[%s3204_s0 + $0x328] sm:$0xff]  ;;  %v1279_v48 = vld [vmem:[%s3204_s0 + $0x390] sm:$0xff] }
  0x3b   :  { %1755 = vmatprep.subr.bf16.mxu0 %v1754_v19  ;;  %225 = vmatprep.mubr.f32.mxu0 %v2373_v25  ;;  %v1321_v19 = vld [vmem:[%s3204_s0 + $0x4a0] sm:$0xff] }
  0x3d   :  { %226 = vmatmul.mubr.f32.gmra.mrb[12].mxu0 %v2378_v28  ;;  %1729 = vmatpush1.bf16.msra.mxu1 %v1728_v26  ;;  %v1772_v26 = vpack.c.bf16 %v1267_v17, %v1266_v15  ;;  %v1831_v17 = vpack.c.bf16 %v1328_v7, %v1327_v6  ;;  %v1337_v6 = vld [vmem:[%s3204_s0 + $0x520] sm:$0xff]  ;;  %v1338_v7 = vld [vmem:[%s3204_s0 + $0x528] sm:$0xff] }
  0x3e   :  { %1757 = vmatpush3.bf16.msra.mxu0 %v1756_v27  ;;  %291 = vmatprep.subr.mxu1 %v1979_v40  ;;  %v2521_v27 = vld [vmem:[%s3205_s1 + $0x98] sm:$0xff] }
  0x3f   :  { %1759 = vmatprep.subr.bf16.mxu0 %v1758_v29  ;;  %462 = vmatprep.mubr.f32.mxu0 %v2107_v49  ;;  %v1819_v29 = vpack.c.bf16 %v1322_v21, %v1321_v19  ;;  %v1330_v19 = vld [vmem:[%s3204_s0 + $0x4e8] sm:$0xff] }
  0x40   :  { %v1274_v21 = vld [vmem:[%s3204_s0 + $0x368] sm:$0xff] }
  0x41   :  { %1220 = vmatpush1.msk.msra.mxu1 %vm127_vm1, %v104_v41  ;;  %v2549_v41 = vld [vmem:[%s3205_s1 + $0x90] sm:$0xff]  ;;  %v1784_v33 = vpack.c.bf16 %v1275_v22, %v1274_v21  ;;  %v1342_v21 = vld [vmem:[%s3204_s0 + $0x548] sm:$0xff] }
  0x42   :  { %1761 = vmatpush3.bf16.msra.mxu0 %v1760_v37  ;;  %296 = vmatmul.mubr.f32.vlgmr.msra.gmra.mrb[0].mxu1 %v2414_v46  ;;  %v1324_v37 = vld [vmem:[%s3204_s0 + $0x4b8] sm:$0xff] }
  0x43   :  { %1762 = vmatprep.subr.bf16.mxu1 %v1978_v0  ;;  %1222 = vmatprep.mubr.msk.f32.mxu1 %vm105_vm0, %v2426_v51 }
  0x44   :  { %1764 = vmatpush1.bf16.msra.mxu1 %v1763_v47  ;;  %1808 = vmatprep.subr.bf16.mxu0 %v1807_v52  ;;  %v1823_v47 = vpack.c.bf16 %v1324_v37, %v1323_v36  ;;  %v1825_v52 = vpack.c.bf16 %v1308_v39, %v1307_v38  ;;  %v1277_v36 = vld [vmem:[%s3204_s0 + $0x380] sm:$0xff]  ;;  %v1331_v38 = vld [vmem:[%s3204_s0 + $0x4f0] sm:$0xff]  ;;  %v1332_v39 = vld [vmem:[%s3204_s0 + $0x4f8] sm:$0xff] }
  0x45   :  { %463 = vmatmul.mubr.f32.vlgmr.msra.gmra.mrb[14].mxu0 %v2186_v20  ;;  %1765 = vmatprep.subr.bf16.mxu1 %v1978_v0  ;;  %v1840_v50 = vpack.c.bf16 %v1332_v39, %v1331_v38  ;;  %v1347_v38 = vld [vmem:[%s3204_s0 + $0x570] sm:$0xff]  ;;  %v1348_v39 = vld [vmem:[%s3204_s0 + $0x578] sm:$0xff] }
  0x46   :  { %1810 = vmatpush3.bf16.msra.mxu0 %v1809_v56  ;;  %301 = vmatmul.mubr.f32.gmra.mrb[2].mxu1 %v2448_v61  ;;  %v1309_v56 = vld [vmem:[%s3204_s0 + $0x440] sm:$0xff] }
  0x47   :  { %1812 = vmatprep.subr.bf16.mxu0 %v1811_v58  ;;  %1223 = vmatprep.mubr.msk.f32.mxu1 %vm105_vm0, %v2454_v63  ;;  %v1310_v58 = vld [vmem:[%s3204_s0 + $0x448] sm:$0xff] }
  0x48   :  { %1767 = vmatpush1.bf16.msra.mxu1 %v1766_v62  ;;  %467 = vmatprep.mubr.f32.mxu0 %v2211_v30  ;;  %v2588_v62 = vld [vmem:[%s3205_s1 + $0xd8] sm:$0x3]  ;;  %v1829_v8 = vpack.c.bf16 %v1310_v58, %v1309_v56  ;;  %v1281_v56 = vld [vmem:[%s3204_s0 + $0x3a0] sm:$0xff] }
  0x49   :  { %1768 = vmatprep.subr.bf16.mxu1 %v1978_v0  ;;  %468 = vmatmul.mubr.f32.gmra.mrb[16].mxu0 %v2221_v34 }
  0x4a   :  { %1814 = vmatpush3.bf16.msra.mxu0 %v1813_v4  ;;  %306 = vmatmul.mubr.f32.gmra.mrb[4].mxu1 %v2481_v10  ;;  %v1273_v4 = vld [vmem:[%s3204_s0 + $0x360] sm:$0xff] }
  0x4b   :  { %1224 = vmatprep.mubr.msk.f32.mxu1 %vm105_vm0, %v2488_v12  ;;  %1816 = vmatprep.subr.bf16.mxu0 %v1815_v14  ;;  %v2617_v14 = vld [vmem:[%s3205_s1 + $0xd0] sm:$0x3]  ;;  %v1781_v15 = vpack.c.bf16 %v1273_v4, %v1272_v1  ;;  %v1793_v1 = vpack.c.bf16 %v1281_v56, %v1280_v55  ;;  %v1406_v55 = vld [vmem:[%s3204_s0 + $0x708] sm:$0xff] }
  0x4c   :  { %1770 = vmatpush1.bf16.msra.mxu1 %v1769_v11  ;;  %472 = vmatprep.mubr.f32.mxu0 %v2249_v42  ;;  %v1312_v11 = vld [vmem:[%s3204_s0 + $0x458] sm:$0xff]  ;;  %v1407_v56 = vld [vmem:[%s3204_s0 + $0x710] sm:$0xff] }
  0x4d   :  { %1771 = vmatprep.subr.bf16.mxu1 %v1978_v0  ;;  %473 = vmatmul.mubr.f32.gmra.mrb[18].mxu0 %v2254_v45  ;;  %v1833_v23 = vpack.c.bf16 %v1312_v11, %v1311_v9  ;;  %v1849_v9 = vpack.c.bf16 %v1338_v7, %v1337_v6  ;;  %v1339_v11 = vld [vmem:[%s3204_s0 + $0x530] sm:$0xff]  ;;  %v1353_v6 = vld [vmem:[%s3204_s0 + $0x5a0] sm:$0xff]  ;;  %v1354_v7 = vld [vmem:[%s3204_s0 + $0x5a8] sm:$0xff] }
  0x4e   :  { %1818 = vmatpush3.bf16.msra.mxu0 %v1817_v18  ;;  %311 = vmatmul.mubr.f32.gmra.mrb[6].mxu1 %v2515_v24  ;;  %v1329_v18 = vld [vmem:[%s3204_s0 + $0x4e0] sm:$0xff] }
  0x4f   :  { %1225 = vmatprep.mubr.msk.f32.mxu1 %vm105_vm0, %v2521_v27  ;;  %1820 = vmatprep.subr.bf16.mxu0 %v1819_v29  ;;  %v1313_v29 = vld [vmem:[%s3204_s0 + $0x460] sm:$0xff] }
  0x50   :  { %1773 = vmatpush1.bf16.msra.mxu1 %v1772_v26  ;;  %477 = vmatprep.mubr.f32.mxu0 %v2280_v54  ;;  %v1835_v26 = vpack.c.bf16 %v1330_v19, %v1329_v18  ;;  %v1837_v37 = vpack.c.bf16 %v1314_v32, %v1313_v29  ;;  %v1341_v19 = vld [vmem:[%s3204_s0 + $0x540] sm:$0xff]  ;;  %v1344_v29 = vld [vmem:[%s3204_s0 + $0x558] sm:$0xff] }
  0x51   :  { %1774 = vmatprep.subr.bf16.mxu1 %v1978_v0  ;;  %478 = vmatmul.mubr.f32.gmra.mrb[20].mxu0 %v2285_v57 }
  0x52   :  { %1822 = vmatpush3.bf16.msra.mxu0 %v1821_v35  ;;  %316 = vmatmul.mubr.f32.gmra.mrb[8].mxu1 %v2549_v41  ;;  %v1276_v35 = vld [vmem:[%s3204_s0 + $0x378] sm:$0xff] }
  0x53   :  { %1226 = vmatprep.mubr.msk.f32.mxu1 %vm105_vm0, %v2555_v44  ;;  %1824 = vmatprep.subr.bf16.mxu0 %v1823_v47  ;;  %v1278_v47 = vld [vmem:[%s3204_s0 + $0x388] sm:$0xff] }
  0x54   :  { %1776 = vmatpush1.bf16.msra.mxu1 %v1775_v43  ;;  %482 = vmatprep.mubr.f32.mxu0 %v2311_v2  ;;  %v1787_v43 = vpack.c.bf16 %v1277_v36, %v1276_v35  ;;  %v1790_v53 = vpack.c.bf16 %v1279_v48, %v1278_v47  ;;  %v1402_v35 = vld [vmem:[%s3204_s0 + $0x6e8] sm:$0xff]  ;;  %v1404_v47 = vld [vmem:[%s3204_s0 + $0x6f8] sm:$0xff]  ;;  %v1405_v48 = vld [vmem:[%s3204_s0 + $0x700] sm:$0xff] }
  0x55   :  { %1777 = vmatprep.subr.bf16.mxu1 %v1978_v0  ;;  %483 = vmatmul.mubr.f32.gmra.mrb[22].mxu0 %v2316_v5  ;;  %v1290_v36 = vld [vmem:[%s3204_s0 + $0x3e8] sm:$0xf] }
  0x56   :  { %1826 = vmatpush3.bf16.msra.mxu0 %v1825_v52  ;;  %321 = vmatmul.mubr.f32.gmra.mrb[10].mxu1 %v2583_v59  ;;  %v1333_v52 = vld [vmem:[%s3204_s0 + $0x500] sm:$0xff] }
  0x57   :  { %1227 = vmatprep.mubr.msk.f32.mxu1 %vm105_vm0, %v2588_v62  ;;  %1828 = vmatprep.subr.bf16.mxu0 %v1827_v3  ;;  %v1282_v3 = vld [vmem:[%s3204_s0 + $0x3a8] sm:$0xff] }
  0x58   :  { %1779 = vmatpush1.bf16.msra.mxu1 %v1778_v60  ;;  %487 = vmatprep.mubr.f32.mxu0 %v2342_v13  ;;  %v1336_v60 = vld [vmem:[%s3204_s0 + $0x518] sm:$0xff] }
  0x59   :  { %1780 = vmatprep.subr.bf16.mxu1 %v1978_v0  ;;  %488 = vmatmul.mubr.f32.gmra.mrb[24].mxu0 %v2347_v16 }
  0x5a   :  { %1830 = vmatpush3.bf16.msra.mxu0 %v1829_v8  ;;  %326 = vmatmul.mubr.f32.gmra.mrb[12].mxu1 %v2617_v14 }
  0x5b   :  { %1832 = vmatprep.subr.bf16.mxu0 %v1831_v17  ;;  %492 = vmatprep.mubr.f32.mxu0 %v2373_v25 }
  0x5c   :  { %1782 = vmatpush1.bf16.msra.mxu1 %v1781_v15  ;;  %1292 = vmatprep.mubr.msk.f32.mxu1 %vm105_vm0, %v2216_v31  ;;  %v1340_v15 = vld [vmem:[%s3204_s0 + $0x538] sm:$0xff] }
  0x5d   :  { %1783 = vmatprep.subr.bf16.mxu1 %v1978_v0  ;;  %493 = vmatmul.mubr.f32.gmra.mrb[26].mxu0 %v2378_v28  ;;  %v1852_v18 = vpack.c.bf16 %v1340_v15, %v1339_v11  ;;  %v1355_v11 = vld [vmem:[%s3204_s0 + $0x5b0] sm:$0xff]  ;;  %v1356_v15 = vld [vmem:[%s3204_s0 + $0x5b8] sm:$0xff] }
  0x5e   :  { %1834 = vmatpush3.bf16.msra.mxu0 %v1833_v23  ;;  %736 = vmatprep.mubr.f32.mxu0 %v2107_v49  ;;  %v1334_v49 = vld [vmem:[%s3204_s0 + $0x508] sm:$0xff]  ;;  %v1855_v23 = vpack.c.bf16 %v1342_v21, %v1341_v19  ;;  %v1357_v19 = vld [vmem:[%s3204_s0 + $0x5c0] sm:$0xff] }
  0x5f   :  { %1836 = vmatprep.subr.bf16.mxu0 %v1835_v26  ;;  %v1843_v58 = vpack.c.bf16 %v1334_v49, %v1333_v52  ;;  %v1343_v26 = vld [vmem:[%s3204_s0 + $0x550] sm:$0xff]  ;;  %v1349_v52 = vld [vmem:[%s3204_s0 + $0x580] sm:$0xff]  ;;  %v1350_v49 = vld [vmem:[%s3204_s0 + $0x588] sm:$0xff] }
  0x60   :  { %1785 = vmatpush1.bf16.msra.mxu1 %v1784_v33  ;;  %v1346_v33 = vld [vmem:[%s3204_s0 + $0x568] sm:$0xff] }
  0x61   :  { %1786 = vmatprep.subr.bf16.mxu1 %v1978_v0  ;;  %v1358_v21 = vld [vmem:[%s3204_s0 + $0x5c8] sm:$0xff] }
  0x62   :  { %1838 = vmatpush3.bf16.msra.mxu0 %v1837_v37 }
  0x63   :  { %1839 = vmatprep.subr.bf16.mxu0 %v1978_v0 }
  0x64   :  { %1788 = vmatpush1.bf16.msra.mxu1 %v1787_v43 }
  0x65   :  { %737 = vmatmul.mubr.f32.vlgmr.msra.gmra.mrb[28].mxu0 %v2186_v20  ;;  %1789 = vmatprep.subr.bf16.mxu1 %v1978_v0  ;;  %v1335_v20 = vld [vmem:[%s3204_s0 + $0x510] sm:$0xff] }
  0x66   :  { %1841 = vmatpush1.bf16.msra.mxu0 %v1840_v50  ;;  %741 = vmatprep.mubr.f32.mxu0 %v2211_v30  ;;  %v1283_v30 = vld [vmem:[%s3204_s0 + $0x3b0] sm:$0xff]  ;;  %v1846_v4 = vpack.c.bf16 %v1336_v60, %v1335_v20  ;;  %v1864_v50 = vpack.c.bf16 %v1348_v39, %v1347_v38  ;;  %v1352_v60 = vld [vmem:[%s3204_s0 + $0x598] sm:$0xff]  ;;  %v1980_v38 = vmov 0  }
  0x67   :  { %1842 = vmatprep.subr.bf16.mxu0 %v1978_v0  ;;  %v1796_v8 = vpack.c.bf16 %v1283_v30, %v1282_v3  ;;  %v1351_v20 = vld [vmem:[%s3204_s0 + $0x590] sm:$0xff]  ;;  %v1408_v3 = vld [vmem:[%s3204_s0 + $0x718] sm:$0xff]  ;;  %v1409_v30 = vld [vmem:[%s3204_s0 + $0x720] sm:$0xff]  ;;  %1964 = vset.pattern.permute.xlu0 %v1980_v38 }
  0x68   :  { %1791 = vmatpush1.bf16.msra.mxu1 %v1790_v53  ;;  %v1920_v53 = vpack.c.bf16 %v1405_v48, %v1404_v47  ;;  %v1388_v39 = vld [vmem:[%s3204_s0 + $0x678] sm:$0xff]  ;;  %1965 = vset.pattern.permute.xlu1 %v1980_v38  ;;  %v1418_v47 = vld [vmem:[%s3204_s0 + $0x768] sm:$0xff]  ;;  %v1419_v48 = vld [vmem:[%s3204_s0 + $0x770] sm:$0xff] }
  0x69   :  { %1792 = vmatprep.subr.bf16.mxu1 %v1978_v0  ;;  %742 = vmatmul.mubr.f32.gmra.mrb[30].mxu0 %v2221_v34  ;;  %v1284_v34 = vld [vmem:[%s3204_s0 + $0x3b8] sm:$0xff]  ;;  %v1397_v38 = vld [vmem:[%s3204_s0 + $0x6c0] sm:$0xff] }
  0x6a   :  { %1844 = vmatpush1.bf16.msra.mxu0 %v1843_v58  ;;  %746 = vmatprep.mubr.f32.mxu0 %v2249_v42  ;;  %v1285_v42 = vld [vmem:[%s3204_s0 + $0x3c0] sm:$0xff]  ;;  %v1867_v58 = vpack.c.bf16 %v1350_v49, %v1349_v52 }
  0x6b   :  { %1845 = vmatprep.subr.bf16.mxu0 %v1978_v0  ;;  %v1799_v17 = vpack.c.bf16 %v1285_v42, %v1284_v34  ;;  %v1410_v34 = vld [vmem:[%s3204_s0 + $0x728] sm:$0xff]  ;;  %v1411_v42 = vld [vmem:[%s3204_s0 + $0x730] sm:$0xff]  ;;  %v1361_v52 = vld [vmem:[%s3204_s0 + $0x5e0] sm:$0xf] }
  0x6c   :  { %1794 = vmatpush1.bf16.msra.mxu1 %v1793_v1  ;;  %v1923_v1 = vpack.c.bf16 %v1407_v56, %v1406_v55  ;;  %v1372_v56 = vld [vmem:[%s3204_s0 + $0x5f8] sm:$0xff] }
  0x6d   :  { %1795 = vmatprep.subr.bf16.mxu1 %v1978_v0  ;;  %747 = vmatmul.mubr.f32.gmra.mrb[32].mxu0 %v2254_v45  ;;  %v1286_v45 = vld [vmem:[%s3204_s0 + $0x3c8] sm:$0xff] }
  0x6e   :  { %1847 = vmatpush1.bf16.msra.mxu0 %v1846_v4  ;;  %751 = vmatprep.mubr.f32.mxu0 %v2280_v54  ;;  %v1287_v54 = vld [vmem:[%s3204_s0 + $0x3d0] sm:$0xff]  ;;  %v1870_v4 = vpack.c.bf16 %v1352_v60, %v1351_v20  ;;  %v1941_v20 = vpack.c.bf16 %v1419_v48, %v1418_v47  ;;  %v1390_v60 = vld [vmem:[%s3204_s0 + $0x688] sm:$0xff] }
  0x6f   :  { %1848 = vmatprep.subr.bf16.mxu0 %v1978_v0  ;;  %v1802_v22 = vpack.c.bf16 %v1287_v54, %v1286_v45  ;;  %v1412_v45 = vld [vmem:[%s3204_s0 + $0x738] sm:$0xff]  ;;  %v1413_v54 = vld [vmem:[%s3204_s0 + $0x740] sm:$0xff] }
  0x70   :  { %1797 = vmatpush1.bf16.msra.mxu1 %v1796_v8  ;;  %v1926_v8 = vpack.c.bf16 %v1409_v30, %v1408_v3  ;;  %v1420_v3 = vld [vmem:[%s3204_s0 + $0x778] sm:$0xff]  ;;  %v1421_v30 = vld [vmem:[%s3204_s0 + $0x780] sm:$0xff] }
  0x71   :  { %1798 = vmatprep.subr.bf16.mxu1 %v1978_v0  ;;  %752 = vmatmul.mubr.f32.gmra.mrb[34].mxu0 %v2285_v57  ;;  %v1288_v57 = vld [vmem:[%s3204_s0 + $0x3d8] sm:$0xff] }
  0x72   :  { %1850 = vmatpush1.bf16.msra.mxu0 %v1849_v9  ;;  %756 = vmatprep.mubr.f32.mxu0 %v2311_v2  ;;  %v1289_v2 = vld [vmem:[%s3204_s0 + $0x3e0] sm:$0xff]  ;;  %v1873_v9 = vpack.c.bf16 %v1354_v7, %v1353_v6  ;;  %v1374_v7 = vld [vmem:[%s3204_s0 + $0x608] sm:$0xff] }
  0x73   :  { %1851 = vmatprep.subr.bf16.mxu0 %v1978_v0  ;;  %v1805_v32 = vpack.c.bf16 %v1289_v2, %v1288_v57  ;;  %v1414_v57 = vld [vmem:[%s3204_s0 + $0x748] sm:$0xff]  ;;  %v1415_v2 = vld [vmem:[%s3204_s0 + $0x750] sm:$0xff] }
  0x74   :  { %1800 = vmatpush1.bf16.msra.mxu1 %v1799_v17  ;;  %v1929_v17 = vpack.c.bf16 %v1411_v42, %v1410_v34  ;;  %v1375_v34 = vld [vmem:[%s3204_s0 + $0x610] sm:$0xff]  ;;  %v1944_v42 = vpack.c.bf16 %v1421_v30, %v1420_v3 }
  0x75   :  { %1801 = vmatprep.subr.bf16.mxu1 %v1978_v0  ;;  %757 = vmatmul.mubr.f32.gmra.mrb[36].mxu0 %v2316_v5  ;;  %v1858_v5 = vpack.c.bf16 %v1344_v29, %v1343_v26  ;;  %v1359_v26 = vld [vmem:[%s3204_s0 + $0x5d0] sm:$0xff]  ;;  %v1360_v29 = vld [vmem:[%s3204_s0 + $0x5d8] sm:$0xff] }
  0x76   :  { %1853 = vmatpush1.bf16.msra.mxu0 %v1852_v18  ;;  %761 = vmatprep.mubr.f32.mxu0 %v2342_v13  ;;  %v1345_v13 = vld [vmem:[%s3204_s0 + $0x560] sm:$0xff]  ;;  %v1876_v18 = vpack.c.bf16 %v1356_v15, %v1355_v11  ;;  %v1422_v15 = vld [vmem:[%s3204_s0 + $0x788] sm:$0xff]  ;;  %v1383_v3 = vld [vmem:[%s3204_s0 + $0x650] sm:$0xff] }
  0x77   :  { %1854 = vmatprep.subr.bf16.mxu0 %v1978_v0  ;;  %v1861_v37 = vpack.c.bf16 %v1346_v33, %v1345_v13  ;;  %v1417_v13 = vld [vmem:[%s3204_s0 + $0x760] sm:$0xff]  ;;  %v1882_v33 = vpack.c.bf16 %v1360_v29, %v1359_v26  ;;  %v1424_v26 = vld [vmem:[%s3204_s0 + $0x798] sm:$0xff] }
  0x78   :  { %1803 = vmatpush1.bf16.msra.mxu1 %v1802_v22  ;;  %v1932_v22 = vpack.c.bf16 %v1413_v54, %v1412_v45  ;;  %v1393_v11 = vld [vmem:[%s3204_s0 + $0x6a0] sm:$0xff]  ;;  %v1155_v45 = vld [vmem:[%s3206_s2 + $0x10] sm:$0xff] }
  0x79   :  { %1804 = vmatprep.subr.bf16.mxu1 %v1978_v0  ;;  %762 = vmatmul.mubr.f32.gmra.mrb[38].mxu0 %v2347_v16  ;;  %v1403_v16 = vld [vmem:[%s3204_s0 + $0x6f0] sm:$0xff]  ;;  %v1157_v54 = vld [vmem:[%s3206_s2 + $0x20] sm:$0xff] }
  0x7a   :  { %1856 = vmatpush1.bf16.msra.mxu0 %v1855_v23  ;;  %766 = vmatprep.mubr.f32.mxu0 %v2373_v25  ;;  %v1917_v43 = vpack.c.bf16 %v1403_v16, %v1402_v35  ;;  %v1879_v23 = vpack.c.bf16 %v1358_v21, %v1357_v19  ;;  %v1386_v16 = vld [vmem:[%s3204_s0 + $0x668] sm:$0xff]  ;;  %v1376_v19 = vld [vmem:[%s3204_s0 + $0x618] sm:$0xff]  ;;  %v1425_v29 = vld [vmem:[%s3204_s0 + $0x7a0] sm:$0xff] }
  0x7b   :  { %1857 = vmatprep.subr.bf16.mxu0 %v1978_v0  ;;  %1172 = vperm.xlu1 %1965, %v1155_v45   ;;  %v1966_v45 = vld [vmem:[%s3205_s1 + $0x8] sm:$0xff] }
  0x7c   :  { %1806 = vmatpush1.bf16.msra.mxu1 %v1805_v32  ;;  %v1935_v32 = vpack.c.bf16 %v1415_v2, %v1414_v57  ;;  %v1394_v2 = vld [vmem:[%s3204_s0 + $0x6a8] sm:$0xff] }
  0x7d   :  { %558 = vmatprep.subr.mxu1 %v1979_v40  ;;  %767 = vmatmul.mubr.f32.gmra.mrb[40].mxu0 %v2378_v28 }
  0x7e   :  { %1859 = vmatpush1.bf16.msra.mxu0 %v1858_v5  ;;  %1363 = vmatprep.mubr.msk.f32.mxu0 %vm105_vm0, %v2216_v31  ;;  %v1416_v5 = vld [vmem:[%s3204_s0 + $0x758] sm:$0xff] }
  0x7f   :  { %1860 = vmatprep.subr.bf16.mxu0 %v1978_v0  ;;  %v1938_v35 = vpack.c.bf16 %v1417_v13, %v1416_v5  ;;  %v1159_v5 = vld [vmem:[%s3206_s2 + $0x30] sm:$0x3] }
  0x80   :  { %1291 = vmatpush1.msk.msra.mxu1 %vm127_vm1, %v1290_v36  ;;  %v1387_v36 = vld [vmem:[%s3204_s0 + $0x670] sm:$0xff] }
  0x81   :  { %563 = vmatmul.mubr.f32.vlgmr.msra.gmra.mrb[14].mxu1 %v2414_v46  ;;  %1916 = vmatprep.subr.bf16.mxu1 %v1978_v0  ;;  %v1884_v49 = vpack.c.bf16 %v1387_v36, %v1386_v16  ;;  %v1379_v16 = vld [vmem:[%s3204_s0 + $0x630] sm:$0xff]  ;;  %v1950_v36 = vpack.c.bf16 %v1425_v29, %v1424_v26 }
  0x82   :  { %1862 = vmatpush1.bf16.msra.mxu0 %v1861_v37  ;;  %1293 = vmatprep.mubr.msk.f32.mxu1 %vm105_vm0, %v2426_v51  ;;  %v1370_v37 = vld [vmem:[%s3204_s0 + $0x5e8] sm:$0xff] }
  0x83   :  { %1863 = vmatprep.subr.bf16.mxu0 %v1978_v0  ;;  %1918 = vmatpush1.bf16.msra.mxu1 %v1917_v43  ;;  %v1389_v43 = vld [vmem:[%s3204_s0 + $0x680] sm:$0xff] }
  0x84   :  { %1919 = vmatprep.subr.bf16.mxu1 %v1978_v0  ;;  %v1888_v55 = vpack.c.bf16 %v1389_v43, %v1388_v39  ;;  %v1427_v39 = vld [vmem:[%s3204_s0 + $0x7b0] sm:$0xff]  ;;  %v1158_v43 = vld [vmem:[%s3206_s2 + $0x28] sm:$0xff] }
  0x85   :  { %568 = vmatmul.mubr.f32.gmra.mrb[16].mxu1 %v2448_v61 }
  0x86   :  { %1865 = vmatpush1.bf16.msra.mxu0 %v1864_v50  ;;  %1294 = vmatprep.mubr.msk.f32.mxu1 %vm105_vm0, %v2454_v63  ;;  %v1153_v50 = vld [vmem:[%s3206_s2] sm:$0xff] }
  0x87   :  { %1866 = vmatprep.subr.bf16.mxu0 %v1978_v0  ;;  %1921 = vmatpush1.bf16.msra.mxu1 %v1920_v53 }
  0x88   :  { %1922 = vmatprep.subr.bf16.mxu1 %v1978_v0  ;;  %1162 = vperm.xlu0 %1964, %v1153_v50   ;;  %v1380_v50 = vld [vmem:[%s3204_s0 + $0x638] sm:$0xff] }
  0x89   :  { %573 = vmatmul.mubr.f32.gmra.mrb[18].mxu1 %v2481_v10 }
  0x8a   :  { %1868 = vmatpush1.bf16.msra.mxu0 %v1867_v58  ;;  %1295 = vmatprep.mubr.msk.f32.mxu1 %vm105_vm0, %v2488_v12  ;;  %v1373_v58 = vld [vmem:[%s3204_s0 + $0x600] sm:$0xff] }
  0x8b   :  { %1869 = vmatprep.subr.bf16.mxu0 %v1978_v0  ;;  %1924 = vmatpush1.bf16.msra.mxu1 %v1923_v1  ;;  %v1391_v1 = vld [vmem:[%s3204_s0 + $0x690] sm:$0xff]  ;;  %v1890_v6 = vpack.c.bf16 %v1373_v58, %v1372_v56  ;;  %v1428_v56 = vld [vmem:[%s3204_s0 + $0x7b8] sm:$0xff]  ;;  %v1429_v58 = vld [vmem:[%s3204_s0 + $0x7c0] sm:$0xff] }
  0x8c   :  { %1925 = vmatprep.subr.bf16.mxu1 %v1978_v0  ;;  %v1956_v30 = vpack.c.bf16 %v1429_v58, %v1428_v56 }
  0x8d   :  { %578 = vmatmul.mubr.f32.gmra.mrb[20].mxu1 %v2515_v24 }
  0x8e   :  { %1871 = vmatpush1.bf16.msra.mxu0 %v1870_v4  ;;  %1296 = vmatprep.mubr.msk.f32.mxu1 %vm105_vm0, %v2521_v27  ;;  %v1154_v4 = vld [vmem:[%s3206_s2 + $0x8] sm:$0xff] }
  0x8f   :  { %1872 = vmatprep.subr.bf16.mxu0 %v1978_v0  ;;  %1927 = vmatpush1.bf16.msra.mxu1 %v1926_v8  ;;  %v1892_v8 = vpack.c.bf16 %v1391_v1, %v1390_v60  ;;  %v1382_v1 = vld [vmem:[%s3204_s0 + $0x648] sm:$0xff] }
  0x90   :  { %1928 = vmatprep.subr.bf16.mxu1 %v1978_v0  ;;  %1167 = vperm.xlu0 %1964, %v1154_v4   ;;  %v1400_v4 = vld [vmem:[%s3204_s0 + $0x6d8] sm:$0xff] }
  0x91   :  { %583 = vmatmul.mubr.f32.gmra.mrb[22].mxu1 %v2549_v41 }
  0x92   :  { %1874 = vmatpush1.bf16.msra.mxu0 %v1873_v9  ;;  %1297 = vmatprep.mubr.msk.f32.mxu1 %vm105_vm0, %v2555_v44  ;;  %v1392_v9 = vld [vmem:[%s3204_s0 + $0x698] sm:$0xff] }
  0x93   :  { %1875 = vmatprep.subr.bf16.mxu0 %v1978_v0  ;;  %1930 = vmatpush1.bf16.msra.mxu1 %v1929_v17  ;;  %v1423_v17 = vld [vmem:[%s3204_s0 + $0x790] sm:$0xff]  ;;  %v1896_v21 = vpack.c.bf16 %v1393_v11, %v1392_v9  ;;  %v1384_v9 = vld [vmem:[%s3204_s0 + $0x658] sm:$0xff]  ;;  %v1385_v11 = vld [vmem:[%s3204_s0 + $0x660] sm:$0xff] }
  0x94   :  { %1931 = vmatprep.subr.bf16.mxu1 %v1978_v0  ;;  %v1947_v57 = vpack.c.bf16 %v1423_v17, %v1422_v15  ;;  %1182 = vperm.xlu0 %1964, %v1157_v54   ;;  %v1914_v17 = vpack.c.bf16 %v1385_v11, %v1384_v9  ;;  %v1432_v54 = vld [vmem:[%s3204_s0 + $0x7d8] sm:$0xf] }
  0x95   :  { %588 = vmatmul.mubr.f32.gmra.mrb[24].mxu1 %v2583_v59 }
  0x96   :  { %1877 = vmatpush1.bf16.msra.mxu0 %v1876_v18  ;;  %1298 = vmatprep.mubr.msk.f32.mxu1 %vm105_vm0, %v2588_v62  ;;  %v1894_v18 = vpack.c.bf16 %v1375_v34, %v1374_v7  ;;  %v1430_v7 = vld [vmem:[%s3204_s0 + $0x7c8] sm:$0xff]  ;;  %v1910_v34 = vpack.c.bf16 %v1383_v3, %v1382_v1 }
  0x97   :  { %1878 = vmatprep.subr.bf16.mxu0 %v1978_v0  ;;  %1933 = vmatpush1.bf16.msra.mxu1 %v1932_v22  ;;  %v1377_v22 = vld [vmem:[%s3204_s0 + $0x620] sm:$0xff] }
  0x98   :  { %1934 = vmatprep.subr.bf16.mxu1 %v1978_v0  ;;  %v1898_v13 = vpack.c.bf16 %v1377_v22, %v1376_v19  ;;  %1192 = vperm.xlu0 %1964, %v1159_v5  }
  0x99   :  { %593 = vmatmul.mubr.f32.gmra.mrb[26].mxu1 %v2617_v14 }
  0x9a   :  { %1880 = vmatpush1.bf16.msra.mxu0 %v1879_v23  ;;  %1434 = vmatprep.mubr.msk.f32.mxu1 %vm105_vm0, %v2216_v31  ;;  %v1371_v31 = vld [vmem:[%s3204_s0 + $0x5f0] sm:$0xff] }
  0x9b   :  { %1881 = vmatprep.subr.bf16.mxu0 %v1978_v0  ;;  %1936 = vmatpush1.bf16.msra.mxu1 %v1935_v32  ;;  %v1886_v53 = vpack.c.bf16 %v1371_v31, %v1370_v37  ;;  %v1395_v23 = vld [vmem:[%s3204_s0 + $0x6b0] sm:$0xff]  ;;  %v1156_v32 = vld [vmem:[%s3206_s2 + $0x18] sm:$0xff]  ;;  %v1426_v31 = vld [vmem:[%s3204_s0 + $0x7a8] sm:$0xff] }
  0x9c   :  { %1937 = vmatprep.subr.bf16.mxu1 %v1978_v0  ;;  %1177 = vperm.xlu1 %1965, %v1156_v32   ;;  %v1396_v37 = vld [vmem:[%s3204_s0 + $0x6b8] sm:$0xff] }
  0x9d   :  { %v1904_v48 = vpack.c.bf16 %v1397_v38, %v1396_v37 }
  0x9e   :  { %1883 = vmatpush1.bf16.msra.mxu0 %v1882_v33  ;;  %v1378_v33 = vld [vmem:[%s3204_s0 + $0x628] sm:$0xff] }
  0x9f   :  { %832 = vmatprep.subr.mxu0 %v1979_v40  ;;  %1939 = vmatpush1.bf16.msra.mxu1 %v1938_v35  ;;  %v1900_v35 = vpack.c.bf16 %v1395_v23, %v1394_v2  ;;  %v1902_v47 = vpack.c.bf16 %v1379_v16, %v1378_v33 }
  0xa0   :  { %1940 = vmatprep.subr.bf16.mxu1 %v1978_v0  ;;  %1187 = vperm.xlu1 %1965, %v1158_v43  }
  0xa2   :  { %1362 = vmatpush1.msk.msra.mxu0 %vm127_vm1, %v1361_v52  ;;  %v1381_v52 = vld [vmem:[%s3204_s0 + $0x640] sm:$0xff] }
  0xa3   :  { %837 = vmatmul.mubr.f32.vlgmr.msra.gmra.mrb[42].mxu0 %v2414_v46  ;;  %1885 = vmatprep.subr.bf16.mxu0 %v1884_v49  ;;  %v1953_v49 = vpack.c.bf16 %v1427_v39, %v1426_v31 }
  0xa4   :  { %1887 = vmatpush3.bf16.msra.mxu0 %v1886_v53  ;;  %1364 = vmatprep.mubr.msk.f32.mxu0 %vm105_vm0, %v2426_v51  ;;  %v1398_v53 = vld [vmem:[%s3204_s0 + $0x6c8] sm:$0xff] }
  0xa5   :  { %1889 = vmatprep.subr.bf16.mxu0 %v1888_v55  ;;  %1942 = vmatpush1.bf16.msra.mxu1 %v1941_v20  ;;  %v1399_v55 = vld [vmem:[%s3204_s0 + $0x6d0] sm:$0xff]  ;;  %v1906_v20 = vpack.c.bf16 %v1381_v52, %v1380_v50 }
  0xa6   :  { %1943 = vmatprep.subr.bf16.mxu1 %v1978_v0  ;;  %v1908_v60 = vpack.c.bf16 %v1399_v55, %v1398_v53 }
  0xa7   :  { %842 = vmatmul.mubr.f32.gmra.mrb[44].mxu0 %v2448_v61 }
  0xa8   :  { %1891 = vmatpush3.bf16.msra.mxu0 %v1890_v6  ;;  %1365 = vmatprep.mubr.msk.f32.mxu0 %vm105_vm0, %v2454_v63  ;;  %v1401_v6 = vld [vmem:[%s3204_s0 + $0x6e0] sm:$0xff] }
  0xa9   :  { %1893 = vmatprep.subr.bf16.mxu0 %v1892_v8  ;;  %1945 = vmatpush1.bf16.msra.mxu1 %v1944_v42  ;;  %v1431_v8 = vld [vmem:[%s3204_s0 + $0x7d0] sm:$0xff]  ;;  %v1912_v42 = vpack.c.bf16 %v1401_v6, %v1400_v4 }
  0xaa   :  { %1946 = vmatprep.subr.bf16.mxu1 %v1978_v0  ;;  %v1959_v15 = vpack.c.bf16 %v1431_v8, %v1430_v7 }
  0xab   :  { %847 = vmatmul.mubr.f32.gmra.mrb[46].mxu0 %v2481_v10 }
  0xac   :  { %1895 = vmatpush3.bf16.msra.mxu0 %v1894_v18  ;;  %1366 = vmatprep.mubr.msk.f32.mxu0 %vm105_vm0, %v2488_v12  ;;  %v1969_v18 = vld [vmem:[%s3205_s1 + $0x20] sm:$0xff] }
  0xad   :  { %1897 = vmatprep.subr.bf16.mxu0 %v1896_v21  ;;  %1948 = vmatpush1.bf16.msra.mxu1 %v1947_v57 }
  0xae   :  { %1949 = vmatprep.subr.bf16.mxu1 %v1978_v0 }
  0xaf   :  { %852 = vmatmul.mubr.f32.gmra.mrb[48].mxu0 %v2515_v24 }
  0xb0   :  { %1899 = vmatpush3.bf16.msra.mxu0 %v1898_v13  ;;  %1367 = vmatprep.mubr.msk.f32.mxu0 %vm105_vm0, %v2521_v27 }
  0xb1   :  { %1901 = vmatprep.subr.bf16.mxu0 %v1900_v35  ;;  %1951 = vmatpush1.bf16.msra.mxu1 %v1950_v36 }
  0xb2   :  { %1952 = vmatprep.subr.bf16.mxu1 %v1978_v0 }
  0xb3   :  { %857 = vmatmul.mubr.f32.gmra.mrb[50].mxu0 %v2549_v41 }
  0xb4   :  { %1903 = vmatpush3.bf16.msra.mxu0 %v1902_v47  ;;  %1368 = vmatprep.mubr.msk.f32.mxu0 %vm105_vm0, %v2555_v44 }
  0xb5   :  { %1905 = vmatprep.subr.bf16.mxu0 %v1904_v48  ;;  %1954 = vmatpush1.bf16.msra.mxu1 %v1953_v49 }
  0xb6   :  { %1955 = vmatprep.subr.bf16.mxu1 %v1978_v0 }
  0xb7   :  { %862 = vmatmul.mubr.f32.gmra.mrb[52].mxu0 %v2583_v59 }
  0xb8   :  { %1907 = vmatpush3.bf16.msra.mxu0 %v1906_v20  ;;  %1369 = vmatprep.mubr.msk.f32.mxu0 %vm105_vm0, %v2588_v62 }
  0xb9   :  { %1909 = vmatprep.subr.bf16.mxu0 %v1908_v60  ;;  %1957 = vmatpush1.bf16.msra.mxu1 %v1956_v30 }
  0xba   :  { %1958 = vmatprep.subr.bf16.mxu1 %v1978_v0  ;;  %v1967_v0 = vld [vmem:[%s3205_s1] sm:$0xff] }
  0xbb   :  { %867 = vmatmul.mubr.f32.gmra.mrb[54].mxu0 %v2617_v14 }
  0xbc   :  { %1911 = vmatpush3.bf16.msra.mxu0 %v1910_v34  ;;  %1010 = vmatprep.mubr.f32.mxu0 %v1966_v45 }
  0xbd   :  { %1913 = vmatprep.subr.bf16.mxu0 %v1912_v42  ;;  %1960 = vmatpush1.bf16.msra.mxu1 %v1959_v15 }
  0xbe   :  { %1106 = vmatprep.subr.mxu1 %v1979_v40  ;;  %v1968_v40 = vld [vmem:[%s3205_s1 + $0x28] sm:$0xff] }
  0xc0   :  { %1915 = vmatpush3.bf16.msra.mxu0 %v1914_v17 }
  0xc1   :  { %1433 = vmatpush1.msk.msra.mxu1 %vm127_vm1, %v1432_v54 }
  0xc2   :  { %1111 = vmatmul.mubr.f32.vlgmr.msra.gmra.mrb[28].mxu1 %v2414_v46  ;;  %v1970_v46 = vld [vmem:[%s3205_s1 + $0x48] sm:$0xff] }
  0xc3   :  { %1011 = vmatmul.mubr.f32.vlgmr.msra.gmra.mrb[56].mxu0 %v1967_v0  ;;  %1435 = vmatprep.mubr.msk.f32.mxu1 %vm105_vm0, %v2426_v51  ;;  %v1971_v51 = vld [vmem:[%s3205_s1 + $0x40] sm:$0xff] }
  0xc4   :  { %1015 = vmatprep.mubr.f32.mxu0 %v1968_v40 }
  0xc6   :  { %1116 = vmatmul.mubr.f32.gmra.mrb[30].mxu1 %v2448_v61  ;;  %v1972_v61 = vld [vmem:[%s3205_s1 + $0x68] sm:$0xff] }
  0xc7   :  { %1016 = vmatmul.mubr.f32.gmra.mrb[58].mxu0 %v1969_v18  ;;  %1436 = vmatprep.mubr.msk.f32.mxu1 %vm105_vm0, %v2454_v63  ;;  %v1973_v63 = vld [vmem:[%s3205_s1 + $0x60] sm:$0xff] }
  0xc8   :  { %1020 = vmatprep.mubr.f32.mxu0 %v1970_v46 }
  0xca   :  { %1121 = vmatmul.mubr.f32.gmra.mrb[32].mxu1 %v2481_v10  ;;  %v1974_v10 = vld [vmem:[%s3205_s1 + $0x88] sm:$0xff] }
  0xcb   :  { %1021 = vmatmul.mubr.f32.gmra.mrb[60].mxu0 %v1971_v51  ;;  %1437 = vmatprep.mubr.msk.f32.mxu1 %vm105_vm0, %v2488_v12  ;;  %v1975_v12 = vld [vmem:[%s3205_s1 + $0x80] sm:$0xff] }
  0xcc   :  { %1025 = vmatprep.mubr.f32.mxu0 %v1972_v61 }
  0xce   :  { %1126 = vmatmul.mubr.f32.gmra.mrb[34].mxu1 %v2515_v24  ;;  %v1976_v24 = vld [vmem:[%s3205_s1 + $0xa8] sm:$0xff] }
  0xcf   :  { %1026 = vmatmul.mubr.f32.gmra.mrb[62].mxu0 %v1973_v63  ;;  %1438 = vmatprep.mubr.msk.f32.mxu1 %vm105_vm0, %v2521_v27  ;;  %v1977_v27 = vld [vmem:[%s3205_s1 + $0xa0] sm:$0xff] }
  0xd0   :  { %1030 = vmatprep.mubr.f32.mxu0 %v1974_v10 }
  0xd2   :  { %1131 = vmatmul.mubr.f32.gmra.mrb[36].mxu1 %v2549_v41 }
  0xd3   :  { %1031 = vmatmul.mubr.f32.gmra.mrb[64].mxu0 %v1975_v12  ;;  %1439 = vmatprep.mubr.msk.f32.mxu1 %vm105_vm0, %v2555_v44 }
  0xd4   :  { %1035 = vmatprep.mubr.f32.mxu0 %v1976_v24 }
  0xd6   :  { %1136 = vmatmul.mubr.f32.gmra.mrb[38].mxu1 %v2583_v59 }
  0xd7   :  { %1036 = vmatmul.mubr.f32.gmra.mrb[66].mxu0 %v1977_v27  ;;  %1440 = vmatprep.mubr.msk.f32.mxu1 %vm105_vm0, %v2588_v62 }
  0xd8   :  { %1040 = vmatprep.mubr.f32.mxu0 %v2373_v25 }
  0xda   :  { %1141 = vmatmul.mubr.f32.gmra.mrb[40].mxu1 %v2617_v14 }
  0xdb   :  { %1041 = vmatmul.mubr.f32.gmra.mrb[68].mxu0 %v2378_v28 }
  0xf8   :  { %v1473_v41 = vpop.f32.mrb[0].mxu0 }
  0xf9   :  { %v1474_v44 = vpop.f32.mrb[1].mxu0 }
  0xfa   :  { %v1475_v19 = vadd.f32 %v1474_v44, %v1473_v41 }
  0xfc   :  { %v1476_v21 = vpop.f32.mrb[2].mxu0 }
  0xfd   :  { %v1477_v22 = vpop.f32.mrb[3].mxu0 }
  0xfe   :  { %v1478_v59 = vadd.f32 %v1477_v22, %v1476_v21 }
 0x100   :  { %v1479_v57 = vpop.f32.mrb[4].mxu0 }
 0x101   :  { %v1480_v2 = vpop.f32.mrb[5].mxu0 }
 0x102   :  { %v1481_v23 = vadd.f32 %v1480_v2, %v1479_v57 }
 0x104   :  { %v1482_v26 = vpop.f32.mrb[6].mxu0 }
 0x105   :  { %v1483_v29 = vpop.f32.mrb[7].mxu0 }
 0x106   :  { %v1484_v32 = vadd.f32 %v1483_v29, %v1482_v26 }
 0x108   :  { %v1485_v5 = vpop.f32.mrb[8].mxu0 }
 0x109   :  { %v1486_v62 = vpop.f32.mrb[9].mxu0 }
 0x10a   :  { %v1487_v13 = vadd.f32 %v1486_v62, %v1485_v5 }
 0x10c   :  { %v1488_v25 = vpop.f32.mrb[10].mxu0 }
 0x10d   :  { %v1489_v33 = vpop.f32.mrb[11].mxu0 }
 0x10e   :  { %v1490_v14 = vadd.f32 %v1489_v33, %v1488_v25 }
 0x110   :  { %v1491_v35 = vpop.f32.mrb[12].mxu0 }
 0x111   :  { %v1492_v28 = vpop.f32.mrb[13].mxu0 }
 0x112   :  { %v1493_v16 = vadd.f32 %v1492_v28, %v1491_v35 }
 0x115   :  { %v297_v36 = vpop.f32.mrb[0].mxu1 }
 0x116   :  { %v3150_v37 = vadd.f32 %v1475_v19, %v297_v36  ;;  %v299_v38 = vpop.f32.mrb[1].mxu1 }
 0x118   :  { %v1526_v31 = vpop.f32.mrb[14].mxu0 }
 0x119   :  { %v1527_v39 = vpop.f32.mrb[15].mxu0  ;;  %v302_v43 = vpop.f32.mrb[2].mxu1 }
 0x11a   :  { %v1528_v47 = vadd.f32 %v1527_v39, %v1526_v31  ;;  %v3152_v48 = vadd.f32 %v1478_v59, %v302_v43  ;;  %v304_v50 = vpop.f32.mrb[3].mxu1 }
 0x11c   :  { %v1529_v49 = vpop.f32.mrb[16].mxu0 }
 0x11d   :  { %v307_v52 = vpop.f32.mrb[4].mxu1  ;;  %v1530_v56 = vpop.f32.mrb[17].mxu0 }
 0x11e   :  { %v3154_v53 = vadd.f32 %v1481_v23, %v307_v52  ;;  %v309_v55 = vpop.f32.mrb[5].mxu1  ;;  %v1531_v58 = vadd.f32 %v1530_v56, %v1529_v49 }
 0x120   :  { %v1532_v60 = vpop.f32.mrb[18].mxu0 }
 0x121   :  { %v312_v20 = vpop.f32.mrb[6].mxu1  ;;  %v1533_v30 = vpop.f32.mrb[19].mxu0 }
 0x122   :  { %v3156_v1 = vadd.f32 %v1484_v32, %v312_v20  ;;  %v314_v3 = vpop.f32.mrb[7].mxu1  ;;  %v1534_v4 = vadd.f32 %v1533_v30, %v1532_v60 }
 0x124   :  { %v1535_v7 = vpop.f32.mrb[20].mxu0 }
 0x125   :  { %v317_v6 = vpop.f32.mrb[8].mxu1  ;;  %v1536_v42 = vpop.f32.mrb[21].mxu0 }
 0x126   :  { %v3158_v8 = vadd.f32 %v1487_v13, %v317_v6  ;;  %v319_v34 = vpop.f32.mrb[9].mxu1  ;;  %v1537_v9 = vadd.f32 %v1536_v42, %v1535_v7 }
 0x128   :  { %v1538_v15 = vpop.f32.mrb[22].mxu0 }
 0x129   :  { %v322_v11 = vpop.f32.mrb[10].mxu1  ;;  %v1539_v54 = vpop.f32.mrb[23].mxu0 }
 0x12a   :  { %v3160_v17 = vadd.f32 %v1490_v14, %v322_v11  ;;  %v324_v45 = vpop.f32.mrb[11].mxu1  ;;  %v1540_v0 = vadd.f32 %v1539_v54, %v1538_v15 }
 0x12c   :  { %v1541_v18 = vpop.f32.mrb[24].mxu0 }
 0x12d   :  { %v327_v40 = vpop.f32.mrb[12].mxu1  ;;  %v1542_v51 = vpop.f32.mrb[25].mxu0 }
 0x12e   :  { %v3162_v46 = vadd.f32 %v1493_v16, %v327_v40  ;;  %v329_v61 = vpop.f32.mrb[13].mxu1  ;;  %v1543_v63 = vadd.f32 %v1542_v51, %v1541_v18 }
 0x130   :  { %v1544_v10 = vpop.f32.mrb[26].mxu0 }
 0x131   :  { %v1545_v12 = vpop.f32.mrb[27].mxu0 }
 0x132   :  { %v1546_v24 = vadd.f32 %v1545_v12, %v1544_v10 }
 0x138   :  { %v1579_v27 = vpop.f32.mrb[28].mxu0 }
 0x139   :  { %v1580_v41 = vpop.f32.mrb[29].mxu0 }
 0x13a   :  { %v1581_v44 = vadd.f32 %v1580_v41, %v1579_v27 }
 0x13c   :  { %v1582_v19 = vpop.f32.mrb[30].mxu0 }
 0x13d   :  { %v1583_v21 = vpop.f32.mrb[31].mxu0 }
 0x13e   :  { %v1584_v22 = vadd.f32 %v1583_v21, %v1582_v19 }
 0x140   :  { %v1585_v59 = vpop.f32.mrb[32].mxu0 }
 0x141   :  { %v1586_v57 = vpop.f32.mrb[33].mxu0 }
 0x142   :  { %v1587_v2 = vadd.f32 %v1586_v57, %v1585_v59 }
 0x144   :  { %v1588_v23 = vpop.f32.mrb[34].mxu0 }
 0x145   :  { %v1589_v26 = vpop.f32.mrb[35].mxu0 }
 0x146   :  { %v1590_v29 = vadd.f32 %v1589_v26, %v1588_v23 }
 0x148   :  { %v1591_v32 = vpop.f32.mrb[36].mxu0 }
 0x149   :  { %v1592_v5 = vpop.f32.mrb[37].mxu0 }
 0x14a   :  { %v1593_v62 = vadd.f32 %v1592_v5, %v1591_v32 }
 0x14c   :  { %v1594_v13 = vpop.f32.mrb[38].mxu0 }
 0x14d   :  { %v1595_v25 = vpop.f32.mrb[39].mxu0 }
 0x14e   :  { %v1596_v33 = vadd.f32 %v1595_v25, %v1594_v13 }
 0x150   :  { %v1597_v14 = vpop.f32.mrb[40].mxu0 }
 0x151   :  { %v1598_v35 = vpop.f32.mrb[41].mxu0 }
 0x152   :  { %v1599_v28 = vadd.f32 %v1598_v35, %v1597_v14 }
 0x154   :  { %v564_v16 = vpop.f32.mrb[14].mxu1 }
 0x155   :  { %v565_v36 = vadd.f32 %v1528_v47, %v564_v16  ;;  %v566_v38 = vpop.f32.mrb[15].mxu1 }
 0x157   :  { %v598_v31 = vmax.f32 %v3150_v37, %v565_v36 }
 0x158   :  { %v569_v39 = vpop.f32.mrb[16].mxu1 }
 0x159   :  { %v570_v43 = vadd.f32 %v1531_v58, %v569_v39  ;;  %v571_v50 = vpop.f32.mrb[17].mxu1 }
 0x15b   :  { %v599_v52 = vmax.f32 %v3152_v48, %v570_v43 }
 0x15c   :  { %v574_v49 = vpop.f32.mrb[18].mxu1 }
 0x15d   :  { %v575_v55 = vadd.f32 %v1534_v4, %v574_v49  ;;  %v576_v56 = vpop.f32.mrb[19].mxu1 }
 0x15f   :  { %v600_v20 = vmax.f32 %v3154_v53, %v575_v55 }
 0x160   :  { %v579_v60 = vpop.f32.mrb[20].mxu1 }
 0x161   :  { %v580_v3 = vadd.f32 %v1537_v9, %v579_v60  ;;  %v581_v30 = vpop.f32.mrb[21].mxu1 }
 0x163   :  { %v601_v6 = vmax.f32 %v3156_v1, %v580_v3 }
 0x164   :  { %v584_v7 = vpop.f32.mrb[22].mxu1 }
 0x165   :  { %v585_v47 = vadd.f32 %v1540_v0, %v584_v7  ;;  %v586_v34 = vpop.f32.mrb[23].mxu1  ;;  %v1173_v7 = vpop.permute.xlu1 %1172 }
 0x167   :  { %v602_v37 = vmax.f32 %v3158_v8, %v585_v47 }
 0x168   :  { %v589_v42 = vpop.f32.mrb[24].mxu1 }
 0x169   :  { %v590_v58 = vadd.f32 %v1543_v63, %v589_v42  ;;  %v591_v11 = vpop.f32.mrb[25].mxu1 }
 0x16b   :  { %v603_v48 = vmax.f32 %v3160_v17, %v590_v58 }
 0x16c   :  { %v594_v15 = vpop.f32.mrb[26].mxu1 }
 0x16d   :  { %v595_v4 = vadd.f32 %v1546_v24, %v594_v15  ;;  %v596_v45 = vpop.f32.mrb[27].mxu1 }
 0x16f   :  { %v604_v53 = vmax.f32 %v3162_v46, %v595_v4 }
 0x176   :  { %v838_v54 = vpop.f32.mrb[42].mxu0 }
 0x177   :  { %v839_v9 = vadd.f32 %v1581_v44, %v838_v54  ;;  %v840_v40 = vpop.f32.mrb[43].mxu0 }
 0x179   :  { %v872_v18 = vmax.f32 %v598_v31, %v839_v9 }
 0x17a   :  { %v843_v1 = vpop.f32.mrb[44].mxu0 }
 0x17b   :  { %v844_v51 = vadd.f32 %v1584_v22, %v843_v1  ;;  %v845_v0 = vpop.f32.mrb[45].mxu0 }
 0x17d   :  { %v873_v61 = vmax.f32 %v599_v52, %v844_v51 }
 0x17e   :  { %v848_v10 = vpop.f32.mrb[46].mxu0 }
 0x17f   :  { %v849_v8 = vadd.f32 %v1587_v2, %v848_v10  ;;  %v850_v12 = vpop.f32.mrb[47].mxu0 }
 0x181   :  { %v874_v63 = vmax.f32 %v600_v20, %v849_v8 }
 0x182   :  { %v853_v27 = vpop.f32.mrb[48].mxu0 }
 0x183   :  { %v854_v41 = vadd.f32 %v1590_v29, %v853_v27  ;;  %v855_v17 = vpop.f32.mrb[49].mxu0 }
 0x185   :  { %v3171_v19 = vmax.f32 %v601_v6, %v854_v41 }
 0x186   :  { %v858_v24 = vpop.f32.mrb[50].mxu0 }
 0x187   :  { %v859_v21 = vadd.f32 %v1593_v62, %v858_v24  ;;  %v860_v46 = vpop.f32.mrb[51].mxu0  ;;  %v1163_v62 = vpop.permute.xlu0 %1162 }
 0x189   :  { %v3173_v59 = vmax.f32 %v602_v37, %v859_v21 }
 0x18a   :  { %v863_v44 = vpop.f32.mrb[52].mxu0 }
 0x18b   :  { %v864_v57 = vadd.f32 %v1596_v33, %v863_v44  ;;  %v865_v23 = vpop.f32.mrb[53].mxu0  ;;  %v1168_v20 = vpop.permute.xlu0 %1167 }
 0x18d   :  { %v3175_v22 = vmax.f32 %v603_v48, %v864_v57 }
 0x18e   :  { %v868_v26 = vpop.f32.mrb[54].mxu0 }
 0x18f   :  { %v869_v32 = vadd.f32 %v1599_v28, %v868_v26  ;;  %v870_v2 = vpop.f32.mrb[55].mxu0  ;;  %v1183_v21 = vpop.permute.xlu0 %1182 }
 0x191   :  { %v3177_v5 = vmax.f32 %v604_v53, %v869_v32 }
 0x195   :  { %v1112_v13 = vpop.f32.mrb[28].mxu1 }
 0x196   :  { %v1632_v29 = vpop.f32.mrb[56].mxu0  ;;  %v1114_v25 = vpop.f32.mrb[29].mxu1 }
 0x197   :  { %v1633_v14 = vpop.f32.mrb[57].mxu0 }
 0x198   :  { %v1634_v35 = vadd.f32 %v1633_v14, %v1632_v29 }
 0x199   :  { %v1117_v16 = vpop.f32.mrb[30].mxu1 }
 0x19a   :  { %v1113_v36 = vadd.f32 %v1634_v35, %v1112_v13  ;;  %v1635_v38 = vpop.f32.mrb[58].mxu0  ;;  %v1119_v31 = vpop.f32.mrb[31].mxu1 }
 0x19b   :  { %v1636_v39 = vpop.f32.mrb[59].mxu0 }
 0x19c   :  { %v1637_v33 = vadd.f32 %v1636_v39, %v1635_v38  ;;  %v1146_v43 = vmax.f32 %v872_v18, %v1113_v36  ;;  %v1178_v18 = vpop.permute.xlu1 %1177 }
 0x19d   :  { %v1122_v50 = vpop.f32.mrb[32].mxu1 }
 0x19e   :  { %v1118_v52 = vadd.f32 %v1637_v33, %v1117_v16  ;;  %v1195_v49 = vadd.f32 %v1163_v62, %v1146_v43  ;;  %v1638_v28 = vpop.f32.mrb[60].mxu0  ;;  %v1124_v55 = vpop.f32.mrb[33].mxu1 }
 0x19f   :  { %v1639_v56 = vpop.f32.mrb[61].mxu0  ;;  %v1193_v16 = vpop.permute.xlu0 %1192 }
 0x1a0   :  { %v1202_v60 = vmax.f32 %v1195_v49, 0.0  ;;  %v1640_v3 = vadd.f32 %v1639_v56, %v1638_v28  ;;  %v1147_v30 = vmax.f32 %v873_v61, %v1118_v52  ;;  %v1188_v29 = vpop.permute.xlu1 %1187 }
 0x1a1   :  { %v1127_v6 = vpop.f32.mrb[34].mxu1 }
 0x1a2   :  { %1209 = vst [vmem:[%s3207_s3] sm:$0xff] %v1202_v60  ;;  %v1123_v47 = vadd.f32 %v1640_v3, %v1122_v50  ;;  %v1196_v34 = vadd.f32 %v1168_v20, %v1147_v30  ;;  %v1641_v37 = vpop.f32.mrb[62].mxu0  ;;  %v1129_v42 = vpop.f32.mrb[35].mxu1 }
 0x1a3   :  { %v1642_v58 = vpop.f32.mrb[63].mxu0 }
 0x1a4   :  { %v1203_v11 = vmax.f32 %v1196_v34, 0.0  ;;  %v1643_v48 = vadd.f32 %v1642_v58, %v1641_v37  ;;  %v1148_v15 = vmax.f32 %v874_v63, %v1123_v47 }
 0x1a5   :  { %v1132_v4 = vpop.f32.mrb[36].mxu1 }
 0x1a6   :  { %1210 = vst [vmem:[%s3207_s3 + $0x8] sm:$0xff] %v1203_v11  ;;  %v1128_v45 = vadd.f32 %v1643_v48, %v1127_v6  ;;  %v1197_v53 = vadd.f32 %v1173_v7, %v1148_v15  ;;  %v1644_v54 = vpop.f32.mrb[64].mxu0  ;;  %v1134_v9 = vpop.f32.mrb[37].mxu1 }
 0x1a7   :  { %v1645_v40 = vpop.f32.mrb[65].mxu0 }
 0x1a8   :  { %v1204_v1 = vmax.f32 %v1197_v53, 0.0  ;;  %v1646_v51 = vadd.f32 %v1645_v40, %v1644_v54  ;;  %v1149_v0 = vmax.f32 %v3171_v19, %v1128_v45 }
 0x1a9   :  { %v1137_v61 = vpop.f32.mrb[38].mxu1 }
 0x1aa   :  { %1211 = vst [vmem:[%s3207_s3 + $0x10] sm:$0xff] %v1204_v1  ;;  %v1133_v10 = vadd.f32 %v1646_v51, %v1132_v4  ;;  %v1198_v8 = vadd.f32 %v1178_v18, %v1149_v0  ;;  %v1647_v12 = vpop.f32.mrb[66].mxu0  ;;  %v1139_v63 = vpop.f32.mrb[39].mxu1 }
 0x1ab   :  { %v1648_v27 = vpop.f32.mrb[67].mxu0 }
 0x1ac   :  { %v1150_v41 = vmax.f32 %v3173_v59, %v1133_v10  ;;  %v1205_v17 = vmax.f32 %v1198_v8, 0.0  ;;  %v1649_v24 = vadd.f32 %v1648_v27, %v1647_v12 }
 0x1ad   :  { %v1142_v46 = vpop.f32.mrb[40].mxu1 }
 0x1ae   :  { %v1199_v44 = vadd.f32 %v1183_v21, %v1150_v41  ;;  %1212 = vst [vmem:[%s3207_s3 + $0x18] sm:$0xff] %v1205_v17  ;;  %v1138_v19 = vadd.f32 %v1649_v24, %v1137_v61  ;;  %v1650_v57 = vpop.f32.mrb[68].mxu0  ;;  %v1144_v23 = vpop.f32.mrb[41].mxu1 }
 0x1af   :  { %v1651_v26 = vpop.f32.mrb[69].mxu0 }
 0x1b0   :  { %v1206_v32 = vmax.f32 %v1199_v44, 0.0  ;;  %v1151_v2 = vmax.f32 %v3175_v22, %v1138_v19  ;;  %v1652_v13 = vadd.f32 %v1651_v26, %v1650_v57 }
 0x1b2   :  { %1213 = vst [vmem:[%s3207_s3 + $0x20] sm:$0xff] %v1206_v32  ;;  %v1200_v59 = vadd.f32 %v1188_v29, %v1151_v2  ;;  %v1143_v25 = vadd.f32 %v1652_v13, %v1142_v46 }
 0x1b4   :  { %v1207_v14 = vmax.f32 %v1200_v59, 0.0  ;;  %v1152_v35 = vmax.f32 %v3177_v5, %v1143_v25 }
 0x1b6   :  { %1214 = vst [vmem:[%s3207_s3 + $0x28] sm:$0xff] %v1207_v14  ;;  %v1201_v62 = vadd.f32 %v1193_v16, %v1152_v35 }
 0x1b8   :  { %v1208_v36 = vmax.f32 %v1201_v62, 0.0 }
 0x1ba   :  { %1215 = vst [vmem:[%s3207_s3 + $0x30] sm:$0x3] %v1208_v36 }

// kernel: simple_classify_mil_forward.5
= control target key start
LH: loop header
LB: loop body
LE: loop exit
PB: predicated region body
PF: predicated region fallthrough
CT: control target
= control target key end

     0   :  { %s5092_s0 = inlined_call_operand.vmem [shape: f32[8,800], index: 0, kind: input, shape index: {}]   ;;  %s5093_s1 = inlined_call_operand.vmem [shape: f32[800,500], index: 1, kind: input, shape index: {}]   ;;  %s5094_s2 = inlined_call_operand.vmem [shape: f32[1,500], index: 2, kind: input, shape index: {}]   ;;  %s5095_s3 = inlined_call_operand.vmem [shape: f32[500,128], index: 3, kind: input, shape index: {}]   ;;  %s5096_s4 = inlined_call_operand.vmem [shape: f32[1,128], index: 4, kind: input, shape index: {}]   ;;  %s5097_s5 = inlined_call_operand.vmem [shape: f32[128,1], index: 5, kind: input, shape index: {}]   ;;  %s5098_s6 = inlined_call_operand.<no memory space> [shape: f32[1,1], index: 6, kind: input, shape index: {}]   ;;  %s5099_s7 = inlined_call_operand.vmem [shape: f32[500,340], index: 7, kind: input, shape index: {}]   ;;  %s5100_s8 = inlined_call_operand.vmem [shape: f32[1,340], index: 8, kind: input, shape index: {}]   ;;  %s5101_s9 = inlined_call_operand.hbm [shape: f32[1,340], index: 9, kind: output, shape index: {0}]   ;;  %s5102_s10 = inlined_call_operand.vmem [shape: f32[8,1], index: 10, kind: output, shape index: {1}]  }
   0x1   :  { %v16_v0 = vstv %s5098_s6 }
   0x2   :  { %17 = vst [vmem:[#allocation2] sm:$0x1] %v16_v0 }
   0x3   :  { %v45_v1 = vld [vmem:[%s5093_s1 + $0x8] sm:$0xff]  ;;  %v47_v3 = vld [vmem:[%s5093_s1 + $0x18] sm:$0xff]  ;;  %v44_v6 = vld [vmem:[%s5093_s1] sm:$0xff] }
   0x4   :  { %v49_v2 = vld [vmem:[%s5093_s1 + $0x28] sm:$0xff]  ;;  %v51_v5 = vld [vmem:[%s5093_s1 + $0x38] sm:$0xff]  ;;  %v48_v7 = vld [vmem:[%s5093_s1 + $0x20] sm:$0xff] }
   0x5   :  { %v2100_v4 = vpack.c.bf16 %v49_v2, %v45_v1  ;;  %v2300_v8 = vpack.c.bf16 %v51_v5, %v47_v3  ;;  %v2102_v9 = vpack.c.bf16 %v48_v7, %v44_v6  ;;  %v46_v10 = vld [vmem:[%s5093_s1 + $0x10] sm:$0xff]  ;;  %v53_v12 = vld [vmem:[%s5093_s1 + $0x48] sm:$0xff]  ;;  %v55_v15 = vld [vmem:[%s5093_s1 + $0x58] sm:$0xff] }
   0x6   :  { %v50_v11 = vld [vmem:[%s5093_s1 + $0x30] sm:$0xff]  ;;  %v57_v14 = vld [vmem:[%s5093_s1 + $0x68] sm:$0xff]  ;;  %v59_v16 = vld [vmem:[%s5093_s1 + $0x78] sm:$0xff] }
   0x7   :  { %2101 = vmatprep.subr.bf16.mxu0 %v2100_v4  ;;  %v2302_v13 = vpack.c.bf16 %v50_v11, %v46_v10  ;;  %2301 = vmatprep.subr.bf16.mxu1 %v2300_v8  ;;  %v2104_v17 = vpack.c.bf16 %v57_v14, %v53_v12  ;;  %v2304_v18 = vpack.c.bf16 %v59_v16, %v55_v15  ;;  %v52_v19 = vld [vmem:[%s5093_s1 + $0x40] sm:$0xff]  ;;  %v54_v21 = vld [vmem:[%s5093_s1 + $0x50] sm:$0xff]  ;;  %v61_v24 = vld [vmem:[%s5093_s1 + $0x88] sm:$0xff] }
   0x8   :  { %2103 = vmatpush1.bf16.msra.mxu0 %v2102_v9  ;;  %v56_v20 = vld [vmem:[%s5093_s1 + $0x60] sm:$0xff]  ;;  %v58_v23 = vld [vmem:[%s5093_s1 + $0x70] sm:$0xff]  ;;  %v65_v25 = vld [vmem:[%s5093_s1 + $0xa8] sm:$0xff] }
   0x9   :  { %2303 = vmatpush1.bf16.msra.mxu1 %v2302_v13  ;;  %v2106_v22 = vpack.c.bf16 %v56_v20, %v52_v19  ;;  %2105 = vmatprep.subr.bf16.mxu0 %v2104_v17  ;;  %v2306_v26 = vpack.c.bf16 %v58_v23, %v54_v21  ;;  %v2108_v27 = vpack.c.bf16 %v65_v25, %v61_v24  ;;  %v63_v28 = vld [vmem:[%s5093_s1 + $0x98] sm:$0xff]  ;;  %v60_v30 = vld [vmem:[%s5093_s1 + $0x80] sm:$0xff]  ;;  %v62_v33 = vld [vmem:[%s5093_s1 + $0x90] sm:$0xff] }
   0xa   :  { %2305 = vmatprep.subr.bf16.mxu1 %v2304_v18  ;;  %v67_v29 = vld [vmem:[%s5093_s1 + $0xb8] sm:$0xff]  ;;  %v64_v32 = vld [vmem:[%s5093_s1 + $0xa0] sm:$0xff]  ;;  %v66_v34 = vld [vmem:[%s5093_s1 + $0xb0] sm:$0xff] }
   0xb   :  { %v2308_v31 = vpack.c.bf16 %v67_v29, %v63_v28  ;;  %v2110_v35 = vpack.c.bf16 %v64_v32, %v60_v30  ;;  %v69_v36 = vld [vmem:[%s5093_s1 + $0xc8] sm:$0xff]  ;;  %v71_v38 = vld [vmem:[%s5093_s1 + $0xd8] sm:$0xff]  ;;  %v2310_v39 = vpack.c.bf16 %v66_v34, %v62_v33  ;;  %v68_v42 = vld [vmem:[%s5093_s1 + $0xc0] sm:$0xff] }
   0xc   :  { %2107 = vmatpush1.bf16.msra.mxu0 %v2106_v22  ;;  %v73_v37 = vld [vmem:[%s5093_s1 + $0xe8] sm:$0xff]  ;;  %v75_v41 = vld [vmem:[%s5093_s1 + $0xf8] sm:$0xff]  ;;  %v72_v43 = vld [vmem:[%s5093_s1 + $0xe0] sm:$0xff] }
   0xd   :  { %2307 = vmatpush1.bf16.msra.mxu1 %v2306_v26  ;;  %2109 = vmatprep.subr.bf16.mxu0 %v2108_v27  ;;  %v2112_v40 = vpack.c.bf16 %v73_v37, %v69_v36  ;;  %v2312_v44 = vpack.c.bf16 %v75_v41, %v71_v38  ;;  %v70_v45 = vld [vmem:[%s5093_s1 + $0xd0] sm:$0xff]  ;;  %v77_v47 = vld [vmem:[%s5093_s1 + $0x108] sm:$0xff]  ;;  %v79_v49 = vld [vmem:[%s5093_s1 + $0x118] sm:$0xff]  ;;  %v2114_v51 = vpack.c.bf16 %v72_v43, %v68_v42 }
   0xe   :  { %2309 = vmatprep.subr.bf16.mxu1 %v2308_v31  ;;  %v74_v46 = vld [vmem:[%s5093_s1 + $0xf0] sm:$0xff]  ;;  %v81_v48 = vld [vmem:[%s5093_s1 + $0x128] sm:$0xff]  ;;  %v83_v50 = vld [vmem:[%s5093_s1 + $0x138] sm:$0xff] }
   0xf   :  { %v2314_v52 = vpack.c.bf16 %v74_v46, %v70_v45  ;;  %v2116_v53 = vpack.c.bf16 %v81_v48, %v77_v47  ;;  %v76_v54 = vld [vmem:[%s5093_s1 + $0x100] sm:$0xff]  ;;  %v78_v56 = vld [vmem:[%s5093_s1 + $0x110] sm:$0xff]  ;;  %v2316_v57 = vpack.c.bf16 %v83_v50, %v79_v49  ;;  %v85_v59 = vld [vmem:[%s5093_s1 + $0x148] sm:$0xff] }
  0x10   :  { %2111 = vmatpush1.bf16.msra.mxu0 %v2110_v35  ;;  %v80_v55 = vld [vmem:[%s5093_s1 + $0x120] sm:$0xff]  ;;  %v82_v58 = vld [vmem:[%s5093_s1 + $0x130] sm:$0xff]  ;;  %v89_v60 = vld [vmem:[%s5093_s1 + $0x168] sm:$0xff] }
  0x11   :  { %2311 = vmatpush1.bf16.msra.mxu1 %v2310_v39  ;;  %2113 = vmatprep.subr.bf16.mxu0 %v2112_v40  ;;  %v87_v61 = vld [vmem:[%s5093_s1 + $0x158] sm:$0xff]  ;;  %v2118_v63 = vpack.c.bf16 %v80_v55, %v76_v54  ;;  %v2318_v0 = vpack.c.bf16 %v82_v58, %v78_v56  ;;  %v2120_v1 = vpack.c.bf16 %v89_v60, %v85_v59  ;;  %v84_v2 = vld [vmem:[%s5093_s1 + $0x140] sm:$0xff]  ;;  %v86_v4 = vld [vmem:[%s5093_s1 + $0x150] sm:$0xff] }
  0x12   :  { %2313 = vmatprep.subr.bf16.mxu1 %v2312_v44  ;;  %v91_v62 = vld [vmem:[%s5093_s1 + $0x178] sm:$0xff]  ;;  %v88_v3 = vld [vmem:[%s5093_s1 + $0x160] sm:$0xff]  ;;  %v90_v6 = vld [vmem:[%s5093_s1 + $0x170] sm:$0xff] }
  0x13   :  { %v2320_v5 = vpack.c.bf16 %v91_v62, %v87_v61  ;;  %v93_v7 = vld [vmem:[%s5093_s1 + $0x188] sm:$0xff]  ;;  %v95_v9 = vld [vmem:[%s5093_s1 + $0x198] sm:$0xff]  ;;  %v2122_v11 = vpack.c.bf16 %v88_v3, %v84_v2  ;;  %v2322_v12 = vpack.c.bf16 %v90_v6, %v86_v4  ;;  %v92_v14 = vld [vmem:[%s5093_s1 + $0x180] sm:$0xff] }
  0x14   :  { %2115 = vmatpush1.bf16.msra.mxu0 %v2114_v51  ;;  %v97_v8 = vld [vmem:[%s5093_s1 + $0x1a8] sm:$0xff]  ;;  %v99_v10 = vld [vmem:[%s5093_s1 + $0x1b8] sm:$0xff]  ;;  %v96_v15 = vld [vmem:[%s5093_s1 + $0x1a0] sm:$0xff] }
  0x15   :  { %2315 = vmatpush1.bf16.msra.mxu1 %v2314_v52  ;;  %2117 = vmatprep.subr.bf16.mxu0 %v2116_v53  ;;  %v2124_v13 = vpack.c.bf16 %v97_v8, %v93_v7  ;;  %v94_v16 = vld [vmem:[%s5093_s1 + $0x190] sm:$0xff]  ;;  %v2324_v17 = vpack.c.bf16 %v99_v10, %v95_v9  ;;  %v101_v19 = vld [vmem:[%s5093_s1 + $0x1c8] sm:$0xff]  ;;  %v103_v21 = vld [vmem:[%s5093_s1 + $0x1d8] sm:$0xff]  ;;  %v2126_v23 = vpack.c.bf16 %v96_v15, %v92_v14 }
  0x16   :  { %2317 = vmatprep.subr.bf16.mxu1 %v2316_v57  ;;  %v98_v18 = vld [vmem:[%s5093_s1 + $0x1b0] sm:$0xff]  ;;  %v105_v20 = vld [vmem:[%s5093_s1 + $0x1e8] sm:$0xff]  ;;  %v107_v22 = vld [vmem:[%s5093_s1 + $0x1f8] sm:$0xff] }
  0x17   :  { %v2326_v24 = vpack.c.bf16 %v98_v18, %v94_v16  ;;  %v2128_v25 = vpack.c.bf16 %v105_v20, %v101_v19  ;;  %v100_v26 = vld [vmem:[%s5093_s1 + $0x1c0] sm:$0xff]  ;;  %v102_v28 = vld [vmem:[%s5093_s1 + $0x1d0] sm:$0xff]  ;;  %v2328_v29 = vpack.c.bf16 %v107_v22, %v103_v21  ;;  %v109_v31 = vld [vmem:[%s5093_s1 + $0x208] sm:$0xff] }
  0x18   :  { %2119 = vmatpush1.bf16.msra.mxu0 %v2118_v63  ;;  %v104_v27 = vld [vmem:[%s5093_s1 + $0x1e0] sm:$0xff]  ;;  %v106_v30 = vld [vmem:[%s5093_s1 + $0x1f0] sm:$0xff]  ;;  %v113_v32 = vld [vmem:[%s5093_s1 + $0x228] sm:$0xff] }
  0x19   :  { %2319 = vmatpush1.bf16.msra.mxu1 %v2318_v0  ;;  %2121 = vmatprep.subr.bf16.mxu0 %v2120_v1  ;;  %v111_v33 = vld [vmem:[%s5093_s1 + $0x218] sm:$0xff]  ;;  %v2130_v35 = vpack.c.bf16 %v104_v27, %v100_v26  ;;  %v2330_v36 = vpack.c.bf16 %v106_v30, %v102_v28  ;;  %v2132_v37 = vpack.c.bf16 %v113_v32, %v109_v31  ;;  %v108_v38 = vld [vmem:[%s5093_s1 + $0x200] sm:$0xff]  ;;  %v110_v40 = vld [vmem:[%s5093_s1 + $0x210] sm:$0xff] }
  0x1a   :  { %2321 = vmatprep.subr.bf16.mxu1 %v2320_v5  ;;  %v115_v34 = vld [vmem:[%s5093_s1 + $0x238] sm:$0xff]  ;;  %v112_v39 = vld [vmem:[%s5093_s1 + $0x220] sm:$0xff]  ;;  %v114_v42 = vld [vmem:[%s5093_s1 + $0x230] sm:$0xff] }
  0x1b   :  { %v2332_v41 = vpack.c.bf16 %v115_v34, %v111_v33  ;;  %v117_v43 = vld [vmem:[%s5093_s1 + $0x248] sm:$0xff]  ;;  %v119_v45 = vld [vmem:[%s5093_s1 + $0x258] sm:$0xff]  ;;  %v2134_v47 = vpack.c.bf16 %v112_v39, %v108_v38  ;;  %v2334_v48 = vpack.c.bf16 %v114_v42, %v110_v40  ;;  %v116_v50 = vld [vmem:[%s5093_s1 + $0x240] sm:$0xff] }
  0x1c   :  { %2123 = vmatpush1.bf16.msra.mxu0 %v2122_v11  ;;  %v121_v44 = vld [vmem:[%s5093_s1 + $0x268] sm:$0xff]  ;;  %v123_v46 = vld [vmem:[%s5093_s1 + $0x278] sm:$0xff]  ;;  %v120_v51 = vld [vmem:[%s5093_s1 + $0x260] sm:$0xff] }
  0x1d   :  { %2323 = vmatpush1.bf16.msra.mxu1 %v2322_v12  ;;  %2125 = vmatprep.subr.bf16.mxu0 %v2124_v13  ;;  %v2136_v49 = vpack.c.bf16 %v121_v44, %v117_v43  ;;  %v118_v52 = vld [vmem:[%s5093_s1 + $0x250] sm:$0xff]  ;;  %v2336_v53 = vpack.c.bf16 %v123_v46, %v119_v45  ;;  %v125_v55 = vld [vmem:[%s5093_s1 + $0x288] sm:$0xff]  ;;  %v127_v57 = vld [vmem:[%s5093_s1 + $0x298] sm:$0xff]  ;;  %v2138_v59 = vpack.c.bf16 %v120_v51, %v116_v50 }
  0x1e   :  { %2325 = vmatprep.subr.bf16.mxu1 %v2324_v17  ;;  %v122_v54 = vld [vmem:[%s5093_s1 + $0x270] sm:$0xff]  ;;  %v129_v56 = vld [vmem:[%s5093_s1 + $0x2a8] sm:$0xff]  ;;  %v131_v58 = vld [vmem:[%s5093_s1 + $0x2b8] sm:$0xff] }
  0x1f   :  { %v2338_v60 = vpack.c.bf16 %v122_v54, %v118_v52  ;;  %v2140_v61 = vpack.c.bf16 %v129_v56, %v125_v55  ;;  %v124_v62 = vld [vmem:[%s5093_s1 + $0x280] sm:$0xff]  ;;  %v126_v0 = vld [vmem:[%s5093_s1 + $0x290] sm:$0xff]  ;;  %v2340_v1 = vpack.c.bf16 %v131_v58, %v127_v57  ;;  %v133_v3 = vld [vmem:[%s5093_s1 + $0x2c8] sm:$0xff] }
  0x20   :  { %2127 = vmatpush1.bf16.msra.mxu0 %v2126_v23  ;;  %v128_v63 = vld [vmem:[%s5093_s1 + $0x2a0] sm:$0xff]  ;;  %v130_v2 = vld [vmem:[%s5093_s1 + $0x2b0] sm:$0xff]  ;;  %v137_v4 = vld [vmem:[%s5093_s1 + $0x2e8] sm:$0xff] }
  0x21   :  { %2327 = vmatpush1.bf16.msra.mxu1 %v2326_v24  ;;  %2129 = vmatprep.subr.bf16.mxu0 %v2128_v25  ;;  %v135_v5 = vld [vmem:[%s5093_s1 + $0x2d8] sm:$0xff]  ;;  %v2142_v7 = vpack.c.bf16 %v128_v63, %v124_v62  ;;  %v132_v8 = vld [vmem:[%s5093_s1 + $0x2c0] sm:$0xff]  ;;  %v2342_v9 = vpack.c.bf16 %v130_v2, %v126_v0  ;;  %v2144_v10 = vpack.c.bf16 %v137_v4, %v133_v3  ;;  %v134_v12 = vld [vmem:[%s5093_s1 + $0x2d0] sm:$0xff] }
  0x22   :  { %2329 = vmatprep.subr.bf16.mxu1 %v2328_v29  ;;  %v139_v6 = vld [vmem:[%s5093_s1 + $0x2f8] sm:$0xff]  ;;  %v136_v11 = vld [vmem:[%s5093_s1 + $0x2e0] sm:$0xff]  ;;  %v138_v13 = vld [vmem:[%s5093_s1 + $0x2f0] sm:$0xff] }
  0x23   :  { %v2344_v14 = vpack.c.bf16 %v139_v6, %v135_v5  ;;  %v141_v15 = vld [vmem:[%s5093_s1 + $0x308] sm:$0xff]  ;;  %v143_v18 = vld [vmem:[%s5093_s1 + $0x318] sm:$0xff]  ;;  %v2146_v20 = vpack.c.bf16 %v136_v11, %v132_v8  ;;  %v2346_v21 = vpack.c.bf16 %v138_v13, %v134_v12  ;;  %v140_v23 = vld [vmem:[%s5093_s1 + $0x300] sm:$0xff] }
  0x24   :  { %2131 = vmatpush1.bf16.msra.mxu0 %v2130_v35  ;;  %v145_v16 = vld [vmem:[%s5093_s1 + $0x328] sm:$0xff]  ;;  %v147_v19 = vld [vmem:[%s5093_s1 + $0x338] sm:$0xff]  ;;  %v144_v24 = vld [vmem:[%s5093_s1 + $0x320] sm:$0xff] }
  0x25   :  { %2331 = vmatpush1.bf16.msra.mxu1 %v2330_v36  ;;  %2133 = vmatprep.subr.bf16.mxu0 %v2132_v37  ;;  %v38_v17 = vld [vmem:[%s5092_s0 + $0x8] sm:$0xff]  ;;  %v2148_v22 = vpack.c.bf16 %v145_v16, %v141_v15  ;;  %v142_v25 = vld [vmem:[%s5093_s1 + $0x310] sm:$0xff]  ;;  %v2348_v26 = vpack.c.bf16 %v147_v19, %v143_v18  ;;  %v151_v30 = vld [vmem:[%s5093_s1 + $0x358] sm:$0xff]  ;;  %v2150_v32 = vpack.c.bf16 %v144_v24, %v140_v23 }
  0x26   :  { %2333 = vmatprep.subr.bf16.mxu1 %v2332_v41  ;;  %534 = vmatprep.mubr.f32.mxu0 %v38_v17  ;;  %v146_v27 = vld [vmem:[%s5093_s1 + $0x330] sm:$0xff]  ;;  %v149_v28 = vld [vmem:[%s5093_s1 + $0x348] sm:$0xff]  ;;  %v155_v31 = vld [vmem:[%s5093_s1 + $0x378] sm:$0xff] }
  0x27   :  { %818 = vmatprep.mubr.f32.mxu1 %v38_v17  ;;  %v153_v29 = vld [vmem:[%s5093_s1 + $0x368] sm:$0xff]  ;;  %v2350_v33 = vpack.c.bf16 %v146_v27, %v142_v25  ;;  %v148_v35 = vld [vmem:[%s5093_s1 + $0x340] sm:$0xff]  ;;  %v150_v37 = vld [vmem:[%s5093_s1 + $0x350] sm:$0xff]  ;;  %v2352_v38 = vpack.c.bf16 %v155_v31, %v151_v30 }
  0x28   :  { %2135 = vmatpush1.bf16.msra.mxu0 %v2134_v47  ;;  %v2152_v34 = vpack.c.bf16 %v153_v29, %v149_v28  ;;  %v152_v36 = vld [vmem:[%s5093_s1 + $0x360] sm:$0xff]  ;;  %v154_v39 = vld [vmem:[%s5093_s1 + $0x370] sm:$0xff]  ;;  %v157_v40 = vld [vmem:[%s5093_s1 + $0x388] sm:$0xff] }
  0x29   :  { %2335 = vmatpush1.bf16.msra.mxu1 %v2334_v48  ;;  %2137 = vmatprep.subr.bf16.mxu0 %v2136_v49  ;;  %v161_v41 = vld [vmem:[%s5093_s1 + $0x3a8] sm:$0xff]  ;;  %v159_v42 = vld [vmem:[%s5093_s1 + $0x398] sm:$0xff]  ;;  %v2154_v44 = vpack.c.bf16 %v152_v36, %v148_v35  ;;  %v2354_v45 = vpack.c.bf16 %v154_v39, %v150_v37  ;;  %v156_v47 = vld [vmem:[%s5093_s1 + $0x380] sm:$0xff] }
  0x2a   :  { %2337 = vmatprep.subr.bf16.mxu1 %v2336_v53  ;;  %v163_v43 = vld [vmem:[%s5093_s1 + $0x3b8] sm:$0xff]  ;;  %v2156_v46 = vpack.c.bf16 %v161_v41, %v157_v40  ;;  %v160_v48 = vld [vmem:[%s5093_s1 + $0x3a0] sm:$0xff]  ;;  %v158_v49 = vld [vmem:[%s5093_s1 + $0x390] sm:$0xff] }
  0x2b   :  { %v2356_v50 = vpack.c.bf16 %v163_v43, %v159_v42  ;;  %v162_v51 = vld [vmem:[%s5093_s1 + $0x3b0] sm:$0xff]  ;;  %v165_v52 = vld [vmem:[%s5093_s1 + $0x3c8] sm:$0xff]  ;;  %v167_v54 = vld [vmem:[%s5093_s1 + $0x3d8] sm:$0xff]  ;;  %v2158_v56 = vpack.c.bf16 %v160_v48, %v156_v47 }
  0x2c   :  { %2139 = vmatpush1.bf16.msra.mxu0 %v2138_v59  ;;  %v169_v53 = vld [vmem:[%s5093_s1 + $0x3e8] sm:$0xff]  ;;  %v171_v55 = vld [vmem:[%s5093_s1 + $0x3f8] sm:$0xff]  ;;  %v2358_v57 = vpack.c.bf16 %v162_v51, %v158_v49  ;;  %v164_v59 = vld [vmem:[%s5093_s1 + $0x3c0] sm:$0xff] }
  0x2d   :  { %2339 = vmatpush1.bf16.msra.mxu1 %v2338_v60  ;;  %2141 = vmatprep.subr.bf16.mxu0 %v2140_v61  ;;  %v2160_v58 = vpack.c.bf16 %v169_v53, %v165_v52  ;;  %v168_v60 = vld [vmem:[%s5093_s1 + $0x3e0] sm:$0xff]  ;;  %v166_v61 = vld [vmem:[%s5093_s1 + $0x3d0] sm:$0xff]  ;;  %v2360_v62 = vpack.c.bf16 %v171_v55, %v167_v54  ;;  %v173_v0 = vld [vmem:[%s5093_s1 + $0x408] sm:$0xff] }
  0x2e   :  { %2341 = vmatprep.subr.bf16.mxu1 %v2340_v1  ;;  %v170_v63 = vld [vmem:[%s5093_s1 + $0x3f0] sm:$0xff]  ;;  %v177_v1 = vld [vmem:[%s5093_s1 + $0x428] sm:$0xff]  ;;  %v175_v2 = vld [vmem:[%s5093_s1 + $0x418] sm:$0xff]  ;;  %v2162_v4 = vpack.c.bf16 %v168_v60, %v164_v59 }
  0x2f   :  { %v179_v3 = vld [vmem:[%s5093_s1 + $0x438] sm:$0xff]  ;;  %v2362_v5 = vpack.c.bf16 %v170_v63, %v166_v61  ;;  %v2164_v6 = vpack.c.bf16 %v177_v1, %v173_v0  ;;  %v176_v8 = vld [vmem:[%s5093_s1 + $0x420] sm:$0xff]  ;;  %v178_v11 = vld [vmem:[%s5093_s1 + $0x430] sm:$0xff] }
  0x30   :  { %2143 = vmatpush1.bf16.msra.mxu0 %v2142_v7  ;;  %v172_v7 = vld [vmem:[%s5093_s1 + $0x400] sm:$0xff]  ;;  %v181_v12 = vld [vmem:[%s5093_s1 + $0x448] sm:$0xff]  ;;  %v187_v15 = vld [vmem:[%s5093_s1 + $0x478] sm:$0xff] }
  0x31   :  { %2343 = vmatpush1.bf16.msra.mxu1 %v2342_v9  ;;  %2145 = vmatprep.subr.bf16.mxu0 %v2144_v10  ;;  %v174_v9 = vld [vmem:[%s5093_s1 + $0x410] sm:$0xff]  ;;  %v2364_v10 = vpack.c.bf16 %v179_v3, %v175_v2  ;;  %v185_v13 = vld [vmem:[%s5093_s1 + $0x468] sm:$0xff]  ;;  %v37_v16 = vld [vmem:[%s5092_s0] sm:$0xff]  ;;  %v2166_v17 = vpack.c.bf16 %v176_v8, %v172_v7 }
  0x32   :  { %2345 = vmatprep.subr.bf16.mxu1 %v2344_v14  ;;  %v183_v14 = vld [vmem:[%s5093_s1 + $0x458] sm:$0xff]  ;;  %v2366_v18 = vpack.c.bf16 %v178_v11, %v174_v9  ;;  %v2168_v19 = vpack.c.bf16 %v185_v13, %v181_v12  ;;  %v186_v24 = vld [vmem:[%s5093_s1 + $0x470] sm:$0xff]  ;;  %v189_v25 = vld [vmem:[%s5093_s1 + $0x488] sm:$0xff] }
  0x33   :  { %v2368_v23 = vpack.c.bf16 %v187_v15, %v183_v14  ;;  %v191_v27 = vld [vmem:[%s5093_s1 + $0x498] sm:$0xff]  ;;  %v194_v36 = vld [vmem:[%s5093_s1 + $0x4b0] sm:$0xff]  ;;  %v197_v37 = vld [vmem:[%s5093_s1 + $0x4c8] sm:$0xff] }
  0x34   :  { %2147 = vmatpush1.bf16.msra.mxu0 %v2146_v20  ;;  %v180_v20 = vld [vmem:[%s5093_s1 + $0x440] sm:$0xff]  ;;  %v195_v28 = vld [vmem:[%s5093_s1 + $0x4b8] sm:$0xff]  ;;  %v202_v48 = vld [vmem:[%s5093_s1 + $0x4f0] sm:$0xff] }
  0x35   :  { %2347 = vmatpush1.bf16.msra.mxu1 %v2346_v21  ;;  %2149 = vmatprep.subr.bf16.mxu0 %v2148_v22  ;;  %v184_v21 = vld [vmem:[%s5093_s1 + $0x460] sm:$0xff]  ;;  %v182_v22 = vld [vmem:[%s5093_s1 + $0x450] sm:$0xff]  ;;  %v2372_v35 = vpack.c.bf16 %v195_v28, %v191_v27  ;;  %v199_v39 = vld [vmem:[%s5093_s1 + $0x4d8] sm:$0xff] }
  0x36   :  { %2349 = vmatprep.subr.bf16.mxu1 %v2348_v26  ;;  %v193_v26 = vld [vmem:[%s5093_s1 + $0x4a8] sm:$0xff]  ;;  %v2170_v29 = vpack.c.bf16 %v184_v21, %v180_v20  ;;  %v2370_v30 = vpack.c.bf16 %v186_v24, %v182_v22  ;;  %v203_v40 = vld [vmem:[%s5093_s1 + $0x4f8] sm:$0xff]  ;;  %v210_v60 = vld [vmem:[%s5093_s1 + $0x530] sm:$0xff] }
  0x37   :  { %v2172_v31 = vpack.c.bf16 %v193_v26, %v189_v25  ;;  %v2376_v47 = vpack.c.bf16 %v203_v40, %v199_v39  ;;  %v205_v49 = vld [vmem:[%s5093_s1 + $0x508] sm:$0xff]  ;;  %v207_v51 = vld [vmem:[%s5093_s1 + $0x518] sm:$0xff]  ;;  %v218_v8 = vld [vmem:[%s5093_s1 + $0x570] sm:$0xff] }
  0x38   :  { %2151 = vmatpush1.bf16.msra.mxu0 %v2150_v32  ;;  %v188_v32 = vld [vmem:[%s5093_s1 + $0x480] sm:$0xff]  ;;  %v211_v52 = vld [vmem:[%s5093_s1 + $0x538] sm:$0xff]  ;;  %v213_v61 = vld [vmem:[%s5093_s1 + $0x548] sm:$0xff] }
  0x39   :  { %2351 = vmatpush1.bf16.msra.mxu1 %v2350_v33  ;;  %2153 = vmatprep.subr.bf16.mxu0 %v2152_v34  ;;  %v192_v33 = vld [vmem:[%s5093_s1 + $0x4a0] sm:$0xff]  ;;  %v190_v34 = vld [vmem:[%s5093_s1 + $0x490] sm:$0xff]  ;;  %v2380_v59 = vpack.c.bf16 %v211_v52, %v207_v51  ;;  %v215_v63 = vld [vmem:[%s5093_s1 + $0x558] sm:$0xff] }
  0x3a   :  { %2353 = vmatprep.subr.bf16.mxu1 %v2352_v38  ;;  %v201_v38 = vld [vmem:[%s5093_s1 + $0x4e8] sm:$0xff]  ;;  %v2174_v41 = vpack.c.bf16 %v192_v33, %v188_v32  ;;  %v2374_v42 = vpack.c.bf16 %v194_v36, %v190_v34  ;;  %v219_v0 = vld [vmem:[%s5093_s1 + $0x578] sm:$0xff]  ;;  %v220_v14 = vld [vmem:[%s5093_s1 + $0x580] sm:$0xff] }
  0x3b   :  { %v2176_v43 = vpack.c.bf16 %v201_v38, %v197_v37  ;;  %v2384_v7 = vpack.c.bf16 %v219_v0, %v215_v63  ;;  %v221_v9 = vld [vmem:[%s5093_s1 + $0x588] sm:$0xff]  ;;  %v223_v11 = vld [vmem:[%s5093_s1 + $0x598] sm:$0xff]  ;;  %v234_v33 = vld [vmem:[%s5093_s1 + $0x5f0] sm:$0xff] }
  0x3c   :  { %2155 = vmatpush1.bf16.msra.mxu0 %v2154_v44  ;;  %v196_v44 = vld [vmem:[%s5093_s1 + $0x4c0] sm:$0xff]  ;;  %v227_v12 = vld [vmem:[%s5093_s1 + $0x5b8] sm:$0xff]  ;;  %v229_v21 = vld [vmem:[%s5093_s1 + $0x5c8] sm:$0xff] }
  0x3d   :  { %2355 = vmatpush1.bf16.msra.mxu1 %v2354_v45  ;;  %2157 = vmatprep.subr.bf16.mxu0 %v2156_v46  ;;  %v200_v45 = vld [vmem:[%s5093_s1 + $0x4e0] sm:$0xff]  ;;  %v198_v46 = vld [vmem:[%s5093_s1 + $0x4d0] sm:$0xff]  ;;  %v2388_v20 = vpack.c.bf16 %v227_v12, %v223_v11  ;;  %v233_v22 = vld [vmem:[%s5093_s1 + $0x5e8] sm:$0xff] }
  0x3e   :  { %2357 = vmatprep.subr.bf16.mxu1 %v2356_v50  ;;  %v209_v50 = vld [vmem:[%s5093_s1 + $0x528] sm:$0xff]  ;;  %v2178_v53 = vpack.c.bf16 %v200_v45, %v196_v44  ;;  %v2378_v54 = vpack.c.bf16 %v202_v48, %v198_v46  ;;  %v231_v24 = vld [vmem:[%s5093_s1 + $0x5d8] sm:$0xff]  ;;  %v2192_v28 = vpack.c.bf16 %v233_v22, %v229_v21  ;;  %v242_v45 = vld [vmem:[%s5093_s1 + $0x630] sm:$0xff] }
  0x3f   :  { %v2180_v55 = vpack.c.bf16 %v209_v50, %v205_v49  ;;  %v235_v25 = vld [vmem:[%s5093_s1 + $0x5f8] sm:$0xff]  ;;  %v237_v34 = vld [vmem:[%s5093_s1 + $0x608] sm:$0xff] }
  0x40   :  { %2159 = vmatpush1.bf16.msra.mxu0 %v2158_v56  ;;  %v204_v56 = vld [vmem:[%s5093_s1 + $0x500] sm:$0xff]  ;;  %v2392_v32 = vpack.c.bf16 %v235_v25, %v231_v24  ;;  %v239_v36 = vld [vmem:[%s5093_s1 + $0x618] sm:$0xff]  ;;  %v245_v46 = vld [vmem:[%s5093_s1 + $0x648] sm:$0xff] }
  0x41   :  { %2359 = vmatpush1.bf16.msra.mxu1 %v2358_v57  ;;  %2161 = vmatprep.subr.bf16.mxu0 %v2160_v58  ;;  %v208_v57 = vld [vmem:[%s5093_s1 + $0x520] sm:$0xff]  ;;  %v206_v58 = vld [vmem:[%s5093_s1 + $0x510] sm:$0xff]  ;;  %v243_v37 = vld [vmem:[%s5093_s1 + $0x638] sm:$0xff] }
  0x42   :  { %2361 = vmatprep.subr.bf16.mxu1 %v2360_v62  ;;  %v217_v62 = vld [vmem:[%s5093_s1 + $0x568] sm:$0xff]  ;;  %v2182_v1 = vpack.c.bf16 %v208_v57, %v204_v56  ;;  %v2382_v2 = vpack.c.bf16 %v210_v60, %v206_v58  ;;  %v2396_v44 = vpack.c.bf16 %v243_v37, %v239_v36  ;;  %v247_v48 = vld [vmem:[%s5093_s1 + $0x658] sm:$0xff]  ;;  %v250_v57 = vld [vmem:[%s5093_s1 + $0x670] sm:$0xff] }
  0x43   :  { %v2184_v3 = vpack.c.bf16 %v217_v62, %v213_v61  ;;  %v251_v49 = vld [vmem:[%s5093_s1 + $0x678] sm:$0xff]  ;;  %v253_v58 = vld [vmem:[%s5093_s1 + $0x688] sm:$0xff]  ;;  %v268_v25 = vld [vmem:[%s5093_s1 + $0x700] sm:$0xff] }
  0x44   :  { %2163 = vmatpush1.bf16.msra.mxu0 %v2162_v4  ;;  %v212_v4 = vld [vmem:[%s5093_s1 + $0x540] sm:$0xff]  ;;  %v2400_v56 = vpack.c.bf16 %v251_v49, %v247_v48  ;;  %v255_v60 = vld [vmem:[%s5093_s1 + $0x698] sm:$0xff] }
  0x45   :  { %2363 = vmatpush1.bf16.msra.mxu1 %v2362_v5  ;;  %2165 = vmatprep.subr.bf16.mxu0 %v2164_v6  ;;  %v216_v5 = vld [vmem:[%s5093_s1 + $0x560] sm:$0xff]  ;;  %v214_v6 = vld [vmem:[%s5093_s1 + $0x550] sm:$0xff]  ;;  %v259_v61 = vld [vmem:[%s5093_s1 + $0x6b8] sm:$0xff] }
  0x46   :  { %2365 = vmatprep.subr.bf16.mxu1 %v2364_v10  ;;  %v225_v10 = vld [vmem:[%s5093_s1 + $0x5a8] sm:$0xff]  ;;  %v2186_v13 = vpack.c.bf16 %v216_v5, %v212_v4  ;;  %v2386_v15 = vpack.c.bf16 %v218_v8, %v214_v6  ;;  %v2404_v4 = vpack.c.bf16 %v259_v61, %v255_v60  ;;  %v258_v5 = vld [vmem:[%s5093_s1 + $0x6b0] sm:$0xff]  ;;  %v263_v8 = vld [vmem:[%s5093_s1 + $0x6d8] sm:$0xff] }
  0x47   :  { %535 = vmatmul.mubr.f32.vlgmr.msra.gmra.mrb[0].mxu0 %v37_v16  ;;  %v261_v6 = vld [vmem:[%s5093_s1 + $0x6c8] sm:$0xff]  ;;  %v275_v21 = vld [vmem:[%s5093_s1 + $0x738] sm:$0xff]  ;;  %v276_v37 = vld [vmem:[%s5093_s1 + $0x740] sm:$0xff] }
  0x48   :  { %2167 = vmatpush1.bf16.msra.mxu0 %v2166_v17  ;;  %819 = vmatmul.mubr.f32.vlgmr.msra.gmra.mrb[0].mxu1 %v37_v16  ;;  %v2188_v16 = vpack.c.bf16 %v225_v10, %v221_v9  ;;  %v224_v17 = vld [vmem:[%s5093_s1 + $0x5a0] sm:$0xff]  ;;  %v267_v9 = vld [vmem:[%s5093_s1 + $0x6f8] sm:$0xff] }
  0x49   :  { %2367 = vmatpush1.bf16.msra.mxu1 %v2366_v18  ;;  %2169 = vmatprep.subr.bf16.mxu0 %v2168_v19  ;;  %v222_v18 = vld [vmem:[%s5093_s1 + $0x590] sm:$0xff]  ;;  %v2190_v26 = vpack.c.bf16 %v224_v17, %v220_v14  ;;  %v264_v14 = vld [vmem:[%s5093_s1 + $0x6e0] sm:$0xff] }
  0x4a   :  { %2369 = vmatprep.subr.bf16.mxu1 %v2368_v23  ;;  %v226_v19 = vld [vmem:[%s5093_s1 + $0x5b0] sm:$0xff]  ;;  %v40_v23 = vld [vmem:[%s5092_s0 + $0x18] sm:$0xff]  ;;  %v284_v49 = vld [vmem:[%s5093_s1 + $0x780] sm:$0xff] }
  0x4b   :  { %605 = vmatprep.mubr.f32.mxu0 %v40_v23  ;;  %889 = vmatprep.mubr.f32.mxu1 %v40_v23  ;;  %v2390_v27 = vpack.c.bf16 %v226_v19, %v222_v18  ;;  %v266_v17 = vld [vmem:[%s5093_s1 + $0x6f0] sm:$0xff]  ;;  %v269_v18 = vld [vmem:[%s5093_s1 + $0x708] sm:$0xff]  ;;  %v292_v61 = vld [vmem:[%s5093_s1 + $0x7c0] sm:$0xff] }
  0x4c   :  { %2171 = vmatpush1.bf16.msra.mxu0 %v2170_v29  ;;  %v228_v29 = vld [vmem:[%s5093_s1 + $0x5c0] sm:$0xff]  ;;  %v273_v19 = vld [vmem:[%s5093_s1 + $0x728] sm:$0xff] }
  0x4d   :  { %2371 = vmatpush1.bf16.msra.mxu1 %v2370_v30  ;;  %2173 = vmatprep.subr.bf16.mxu0 %v2172_v31  ;;  %v232_v30 = vld [vmem:[%s5093_s1 + $0x5e0] sm:$0xff]  ;;  %v230_v31 = vld [vmem:[%s5093_s1 + $0x5d0] sm:$0xff]  ;;  %v2212_v24 = vpack.c.bf16 %v273_v19, %v269_v18 }
  0x4e   :  { %2373 = vmatprep.subr.bf16.mxu1 %v2372_v35  ;;  %v241_v35 = vld [vmem:[%s5093_s1 + $0x628] sm:$0xff]  ;;  %v2194_v38 = vpack.c.bf16 %v232_v30, %v228_v29  ;;  %v2394_v39 = vpack.c.bf16 %v234_v33, %v230_v31  ;;  %v274_v29 = vld [vmem:[%s5093_s1 + $0x730] sm:$0xff]  ;;  %v283_v33 = vld [vmem:[%s5093_s1 + $0x778] sm:$0xff] }
  0x4f   :  { %v2196_v40 = vpack.c.bf16 %v241_v35, %v237_v34  ;;  %v277_v30 = vld [vmem:[%s5093_s1 + $0x748] sm:$0xff]  ;;  %v39_v18 = vld [vmem:[%s5092_s0 + $0x10] sm:$0xff] }
  0x50   :  { %2175 = vmatpush1.bf16.msra.mxu0 %v2174_v41  ;;  %v236_v41 = vld [vmem:[%s5093_s1 + $0x600] sm:$0xff]  ;;  %v281_v31 = vld [vmem:[%s5093_s1 + $0x768] sm:$0xff] }
  0x51   :  { %2375 = vmatpush1.bf16.msra.mxu1 %v2374_v42  ;;  %2177 = vmatprep.subr.bf16.mxu0 %v2176_v43  ;;  %v240_v42 = vld [vmem:[%s5093_s1 + $0x620] sm:$0xff]  ;;  %v238_v43 = vld [vmem:[%s5093_s1 + $0x610] sm:$0xff]  ;;  %v2216_v36 = vpack.c.bf16 %v281_v31, %v277_v30  ;;  %v323_v30 = vld [vmem:[%s5093_s1 + $0x8b8] sm:$0xff] }
  0x52   :  { %2377 = vmatprep.subr.bf16.mxu1 %v2376_v47  ;;  %v249_v47 = vld [vmem:[%s5093_s1 + $0x668] sm:$0xff]  ;;  %v2198_v50 = vpack.c.bf16 %v240_v42, %v236_v41  ;;  %v2398_v51 = vpack.c.bf16 %v242_v45, %v238_v43  ;;  %v282_v41 = vld [vmem:[%s5093_s1 + $0x770] sm:$0xff]  ;;  %v291_v45 = vld [vmem:[%s5093_s1 + $0x7b8] sm:$0xff] }
  0x53   :  { %v2200_v52 = vpack.c.bf16 %v249_v47, %v245_v46  ;;  %v285_v42 = vld [vmem:[%s5093_s1 + $0x788] sm:$0xff] }
  0x54   :  { %2179 = vmatpush1.bf16.msra.mxu0 %v2178_v53  ;;  %v244_v53 = vld [vmem:[%s5093_s1 + $0x640] sm:$0xff]  ;;  %v289_v43 = vld [vmem:[%s5093_s1 + $0x7a8] sm:$0xff] }
  0x55   :  { %2379 = vmatpush1.bf16.msra.mxu1 %v2378_v54  ;;  %2181 = vmatprep.subr.bf16.mxu0 %v2180_v55  ;;  %v248_v54 = vld [vmem:[%s5093_s1 + $0x660] sm:$0xff]  ;;  %v246_v55 = vld [vmem:[%s5093_s1 + $0x650] sm:$0xff]  ;;  %v2220_v48 = vpack.c.bf16 %v289_v43, %v285_v42  ;;  %v42_v31 = vld [vmem:[%s5092_s0 + $0x28] sm:$0xff] }
  0x56   :  { %2381 = vmatprep.subr.bf16.mxu1 %v2380_v59  ;;  %v257_v59 = vld [vmem:[%s5093_s1 + $0x6a8] sm:$0xff]  ;;  %v2202_v62 = vpack.c.bf16 %v248_v54, %v244_v53  ;;  %v2402_v63 = vpack.c.bf16 %v250_v57, %v246_v55  ;;  %v290_v53 = vld [vmem:[%s5093_s1 + $0x7b0] sm:$0xff]  ;;  %v299_v57 = vld [vmem:[%s5093_s1 + $0x7f8] sm:$0xff] }
  0x57   :  { %v2204_v0 = vpack.c.bf16 %v257_v59, %v253_v58  ;;  %v293_v54 = vld [vmem:[%s5093_s1 + $0x7c8] sm:$0xff]  ;;  %v327_v42 = vld [vmem:[%s5093_s1 + $0x8d8] sm:$0xff] }
  0x58   :  { %2183 = vmatpush1.bf16.msra.mxu0 %v2182_v1  ;;  %v252_v1 = vld [vmem:[%s5093_s1 + $0x680] sm:$0xff]  ;;  %v297_v55 = vld [vmem:[%s5093_s1 + $0x7e8] sm:$0xff]  ;;  %v331_v43 = vld [vmem:[%s5093_s1 + $0x8f8] sm:$0xff] }
  0x59   :  { %2383 = vmatpush1.bf16.msra.mxu1 %v2382_v2  ;;  %2185 = vmatprep.subr.bf16.mxu0 %v2184_v3  ;;  %v256_v2 = vld [vmem:[%s5093_s1 + $0x6a0] sm:$0xff]  ;;  %v254_v3 = vld [vmem:[%s5093_s1 + $0x690] sm:$0xff]  ;;  %v2224_v60 = vpack.c.bf16 %v297_v55, %v293_v54  ;;  %v335_v54 = vld [vmem:[%s5093_s1 + $0x918] sm:$0xff] }
  0x5a   :  { %2385 = vmatprep.subr.bf16.mxu1 %v2384_v7  ;;  %v265_v7 = vld [vmem:[%s5093_s1 + $0x6e8] sm:$0xff]  ;;  %v2206_v10 = vpack.c.bf16 %v256_v2, %v252_v1  ;;  %v2406_v11 = vpack.c.bf16 %v258_v5, %v254_v3  ;;  %v298_v1 = vld [vmem:[%s5093_s1 + $0x7f0] sm:$0xff]  ;;  %v307_v5 = vld [vmem:[%s5093_s1 + $0x838] sm:$0xff] }
  0x5b   :  { %v2208_v12 = vpack.c.bf16 %v265_v7, %v261_v6  ;;  %v301_v2 = vld [vmem:[%s5093_s1 + $0x808] sm:$0xff]  ;;  %v339_v55 = vld [vmem:[%s5093_s1 + $0x938] sm:$0xff] }
  0x5c   :  { %2187 = vmatpush1.bf16.msra.mxu0 %v2186_v13  ;;  %v260_v13 = vld [vmem:[%s5093_s1 + $0x6c0] sm:$0xff]  ;;  %v305_v3 = vld [vmem:[%s5093_s1 + $0x828] sm:$0xff] }
  0x5d   :  { %2387 = vmatpush1.bf16.msra.mxu1 %v2386_v15  ;;  %2189 = vmatprep.subr.bf16.mxu0 %v2188_v16  ;;  %v262_v15 = vld [vmem:[%s5093_s1 + $0x6d0] sm:$0xff]  ;;  %v2408_v16 = vpack.c.bf16 %v267_v9, %v263_v8  ;;  %v2210_v22 = vpack.c.bf16 %v264_v14, %v260_v13  ;;  %v2228_v8 = vpack.c.bf16 %v305_v3, %v301_v2  ;;  %v300_v9 = vld [vmem:[%s5093_s1 + $0x800] sm:$0xff]  ;;  %v309_v14 = vld [vmem:[%s5093_s1 + $0x848] sm:$0xff] }
  0x5e   :  { %2389 = vmatprep.subr.bf16.mxu1 %v2388_v20  ;;  %v271_v20 = vld [vmem:[%s5093_s1 + $0x718] sm:$0xff]  ;;  %v2410_v23 = vpack.c.bf16 %v266_v17, %v262_v15  ;;  %v306_v13 = vld [vmem:[%s5093_s1 + $0x830] sm:$0xff]  ;;  %v313_v15 = vld [vmem:[%s5093_s1 + $0x868] sm:$0xff] }
  0x5f   :  { %v315_v17 = vld [vmem:[%s5093_s1 + $0x878] sm:$0xff] }
  0x60   :  { %2191 = vmatpush1.bf16.msra.mxu0 %v2190_v26  ;;  %v272_v26 = vld [vmem:[%s5093_s1 + $0x720] sm:$0xff]  ;;  %v343_v2 = vld [vmem:[%s5093_s1 + $0x958] sm:$0xff] }
  0x61   :  { %2391 = vmatpush1.bf16.msra.mxu1 %v2390_v27  ;;  %2193 = vmatprep.subr.bf16.mxu0 %v2192_v28  ;;  %v270_v27 = vld [vmem:[%s5093_s1 + $0x710] sm:$0xff]  ;;  %v2412_v28 = vpack.c.bf16 %v275_v21, %v271_v20  ;;  %v2214_v34 = vpack.c.bf16 %v272_v26, %v268_v25  ;;  %v2232_v21 = vpack.c.bf16 %v313_v15, %v309_v14  ;;  %v347_v3 = vld [vmem:[%s5093_s1 + $0x978] sm:$0xff] }
  0x62   :  { %2393 = vmatprep.subr.bf16.mxu1 %v2392_v32  ;;  %v279_v32 = vld [vmem:[%s5093_s1 + $0x758] sm:$0xff]  ;;  %v2414_v35 = vpack.c.bf16 %v274_v29, %v270_v27  ;;  %v314_v26 = vld [vmem:[%s5093_s1 + $0x870] sm:$0xff]  ;;  %v317_v27 = vld [vmem:[%s5093_s1 + $0x888] sm:$0xff] }
  0x63   :  { %v319_v29 = vld [vmem:[%s5093_s1 + $0x898] sm:$0xff] }
  0x64   :  { %2195 = vmatpush1.bf16.msra.mxu0 %v2194_v38  ;;  %v280_v38 = vld [vmem:[%s5093_s1 + $0x760] sm:$0xff]  ;;  %v351_v14 = vld [vmem:[%s5093_s1 + $0x998] sm:$0xff] }
  0x65   :  { %2395 = vmatpush1.bf16.msra.mxu1 %v2394_v39  ;;  %2197 = vmatprep.subr.bf16.mxu0 %v2196_v40  ;;  %v278_v39 = vld [vmem:[%s5093_s1 + $0x750] sm:$0xff]  ;;  %v2416_v40 = vpack.c.bf16 %v283_v33, %v279_v32  ;;  %v2218_v46 = vpack.c.bf16 %v280_v38, %v276_v37  ;;  %v2436_v38 = vpack.c.bf16 %v323_v30, %v319_v29  ;;  %v355_v15 = vld [vmem:[%s5093_s1 + $0x9b8] sm:$0xff] }
  0x66   :  { %2397 = vmatprep.subr.bf16.mxu1 %v2396_v44  ;;  %v287_v44 = vld [vmem:[%s5093_s1 + $0x798] sm:$0xff]  ;;  %v2418_v47 = vpack.c.bf16 %v282_v41, %v278_v39  ;;  %v318_v37 = vld [vmem:[%s5093_s1 + $0x890] sm:$0xff]  ;;  %v329_v41 = vld [vmem:[%s5093_s1 + $0x8e8] sm:$0xff] }
  0x67   :  { %v322_v39 = vld [vmem:[%s5093_s1 + $0x8b0] sm:$0xff] }
  0x68   :  { %2199 = vmatpush1.bf16.msra.mxu0 %v2198_v50  ;;  %v288_v50 = vld [vmem:[%s5093_s1 + $0x7a0] sm:$0xff] }
  0x69   :  { %2399 = vmatpush1.bf16.msra.mxu1 %v2398_v51  ;;  %2201 = vmatprep.subr.bf16.mxu0 %v2200_v52  ;;  %v286_v51 = vld [vmem:[%s5093_s1 + $0x790] sm:$0xff]  ;;  %v2420_v52 = vpack.c.bf16 %v291_v45, %v287_v44  ;;  %v2222_v58 = vpack.c.bf16 %v288_v50, %v284_v49  ;;  %v2438_v45 = vpack.c.bf16 %v322_v39, %v318_v37 }
  0x6a   :  { %2401 = vmatprep.subr.bf16.mxu1 %v2400_v56  ;;  %v295_v56 = vld [vmem:[%s5093_s1 + $0x7d8] sm:$0xff]  ;;  %v2422_v59 = vpack.c.bf16 %v290_v53, %v286_v51  ;;  %v326_v49 = vld [vmem:[%s5093_s1 + $0x8d0] sm:$0xff]  ;;  %v2440_v50 = vpack.c.bf16 %v331_v43, %v327_v42  ;;  %v337_v53 = vld [vmem:[%s5093_s1 + $0x928] sm:$0xff] }
  0x6b   :  { %v330_v51 = vld [vmem:[%s5093_s1 + $0x8f0] sm:$0xff] }
  0x6c   :  { %2203 = vmatpush1.bf16.msra.mxu0 %v2202_v62  ;;  %v296_v62 = vld [vmem:[%s5093_s1 + $0x7e0] sm:$0xff] }
  0x6d   :  { %2403 = vmatpush1.bf16.msra.mxu1 %v2402_v63  ;;  %2205 = vmatprep.subr.bf16.mxu0 %v2204_v0  ;;  %v294_v63 = vld [vmem:[%s5093_s1 + $0x7d0] sm:$0xff]  ;;  %v2424_v0 = vpack.c.bf16 %v299_v57, %v295_v56  ;;  %v2226_v6 = vpack.c.bf16 %v296_v62, %v292_v61  ;;  %v2442_v57 = vpack.c.bf16 %v330_v51, %v326_v49 }
  0x6e   :  { %2405 = vmatprep.subr.bf16.mxu1 %v2404_v4  ;;  %v303_v4 = vld [vmem:[%s5093_s1 + $0x818] sm:$0xff]  ;;  %v2426_v7 = vpack.c.bf16 %v298_v1, %v294_v63  ;;  %v334_v61 = vld [vmem:[%s5093_s1 + $0x910] sm:$0xff]  ;;  %v2444_v62 = vpack.c.bf16 %v339_v55, %v335_v54  ;;  %v345_v1 = vld [vmem:[%s5093_s1 + $0x968] sm:$0xff] }
  0x6f   :  { %v338_v63 = vld [vmem:[%s5093_s1 + $0x930] sm:$0xff] }
  0x70   :  { %2207 = vmatpush1.bf16.msra.mxu0 %v2206_v10  ;;  %v304_v10 = vld [vmem:[%s5093_s1 + $0x820] sm:$0xff] }
  0x71   :  { %2407 = vmatpush1.bf16.msra.mxu1 %v2406_v11  ;;  %2209 = vmatprep.subr.bf16.mxu0 %v2208_v12  ;;  %v302_v11 = vld [vmem:[%s5093_s1 + $0x810] sm:$0xff]  ;;  %v2428_v12 = vpack.c.bf16 %v307_v5, %v303_v4  ;;  %v2230_v19 = vpack.c.bf16 %v304_v10, %v300_v9  ;;  %v2446_v5 = vpack.c.bf16 %v338_v63, %v334_v61 }
  0x72   :  { %2409 = vmatprep.subr.bf16.mxu1 %v2408_v16  ;;  %v311_v16 = vld [vmem:[%s5093_s1 + $0x858] sm:$0xff]  ;;  %v2430_v20 = vpack.c.bf16 %v306_v13, %v302_v11  ;;  %v342_v9 = vld [vmem:[%s5093_s1 + $0x950] sm:$0xff]  ;;  %v2448_v10 = vpack.c.bf16 %v347_v3, %v343_v2  ;;  %v353_v13 = vld [vmem:[%s5093_s1 + $0x9a8] sm:$0xff] }
  0x73   :  { %v2432_v25 = vpack.c.bf16 %v315_v17, %v311_v16  ;;  %v346_v11 = vld [vmem:[%s5093_s1 + $0x970] sm:$0xff] }
  0x74   :  { %2211 = vmatpush1.bf16.msra.mxu0 %v2210_v22  ;;  %v308_v22 = vld [vmem:[%s5093_s1 + $0x840] sm:$0xff] }
  0x75   :  { %2411 = vmatpush1.bf16.msra.mxu1 %v2410_v23  ;;  %2213 = vmatprep.subr.bf16.mxu0 %v2212_v24  ;;  %v312_v23 = vld [vmem:[%s5093_s1 + $0x860] sm:$0xff]  ;;  %v310_v24 = vld [vmem:[%s5093_s1 + $0x850] sm:$0xff] }
  0x76   :  { %2413 = vmatprep.subr.bf16.mxu1 %v2412_v28  ;;  %v321_v28 = vld [vmem:[%s5093_s1 + $0x8a8] sm:$0xff]  ;;  %v2234_v32 = vpack.c.bf16 %v312_v23, %v308_v22  ;;  %v2434_v33 = vpack.c.bf16 %v314_v26, %v310_v24 }
  0x78   :  { %2215 = vmatpush1.bf16.msra.mxu0 %v2214_v34  ;;  %v2236_v34 = vpack.c.bf16 %v321_v28, %v317_v27 }
  0x79   :  { %2415 = vmatpush1.bf16.msra.mxu1 %v2414_v35  ;;  %2217 = vmatprep.subr.bf16.mxu0 %v2216_v36  ;;  %v316_v35 = vld [vmem:[%s5093_s1 + $0x880] sm:$0xff] }
  0x7a   :  { %2417 = vmatprep.subr.bf16.mxu1 %v2416_v40  ;;  %v320_v36 = vld [vmem:[%s5093_s1 + $0x8a0] sm:$0xff]  ;;  %v325_v40 = vld [vmem:[%s5093_s1 + $0x8c8] sm:$0xff] }
  0x7b   :  { %v2238_v44 = vpack.c.bf16 %v320_v36, %v316_v35 }
  0x7c   :  { %2219 = vmatpush1.bf16.msra.mxu0 %v2218_v46  ;;  %v2240_v46 = vpack.c.bf16 %v329_v41, %v325_v40 }
  0x7d   :  { %2419 = vmatpush1.bf16.msra.mxu1 %v2418_v47  ;;  %2221 = vmatprep.subr.bf16.mxu0 %v2220_v48  ;;  %v324_v47 = vld [vmem:[%s5093_s1 + $0x8c0] sm:$0xff] }
  0x7e   :  { %2421 = vmatprep.subr.bf16.mxu1 %v2420_v52  ;;  %v328_v48 = vld [vmem:[%s5093_s1 + $0x8e0] sm:$0xff]  ;;  %v333_v52 = vld [vmem:[%s5093_s1 + $0x908] sm:$0xff] }
  0x7f   :  { %v2242_v56 = vpack.c.bf16 %v328_v48, %v324_v47 }
  0x80   :  { %2223 = vmatpush1.bf16.msra.mxu0 %v2222_v58  ;;  %v2244_v58 = vpack.c.bf16 %v337_v53, %v333_v52 }
  0x81   :  { %2423 = vmatpush1.bf16.msra.mxu1 %v2422_v59  ;;  %2225 = vmatprep.subr.bf16.mxu0 %v2224_v60  ;;  %v332_v59 = vld [vmem:[%s5093_s1 + $0x900] sm:$0xff] }
  0x82   :  { %2425 = vmatprep.subr.bf16.mxu1 %v2424_v0  ;;  %v336_v60 = vld [vmem:[%s5093_s1 + $0x920] sm:$0xff]  ;;  %v341_v0 = vld [vmem:[%s5093_s1 + $0x948] sm:$0xff] }
  0x83   :  { %v2246_v4 = vpack.c.bf16 %v336_v60, %v332_v59 }
  0x84   :  { %2227 = vmatpush1.bf16.msra.mxu0 %v2226_v6  ;;  %v2248_v6 = vpack.c.bf16 %v345_v1, %v341_v0 }
  0x85   :  { %2427 = vmatpush1.bf16.msra.mxu1 %v2426_v7  ;;  %2229 = vmatprep.subr.bf16.mxu0 %v2228_v8  ;;  %v340_v7 = vld [vmem:[%s5093_s1 + $0x940] sm:$0xff] }
  0x86   :  { %2429 = vmatprep.subr.bf16.mxu1 %v2428_v12  ;;  %v344_v8 = vld [vmem:[%s5093_s1 + $0x960] sm:$0xff]  ;;  %v349_v12 = vld [vmem:[%s5093_s1 + $0x988] sm:$0xff] }
  0x87   :  { %606 = vmatmul.mubr.f32.vlgmr.msra.gmra.mrb[0].mxu0 %v39_v18  ;;  %v2250_v16 = vpack.c.bf16 %v344_v8, %v340_v7 }
  0x88   :  { %2231 = vmatpush1.bf16.msra.mxu0 %v2230_v19  ;;  %890 = vmatmul.mubr.f32.vlgmr.msra.gmra.mrb[0].mxu1 %v39_v18 }
  0x89   :  { %2431 = vmatpush1.bf16.msra.mxu1 %v2430_v20  ;;  %2233 = vmatprep.subr.bf16.mxu0 %v2232_v21 }
  0x8a   :  { %2433 = vmatprep.subr.bf16.mxu1 %v2432_v25  ;;  %676 = vmatprep.mubr.f32.mxu0 %v42_v31 }
  0x8b   :  { %960 = vmatprep.mubr.f32.mxu1 %v42_v31 }
  0x8c   :  { %2235 = vmatpush1.bf16.msra.mxu0 %v2234_v32 }
  0x8d   :  { %2435 = vmatpush1.bf16.msra.mxu1 %v2434_v33  ;;  %2237 = vmatprep.subr.bf16.mxu0 %v2236_v34 }
  0x8e   :  { %2437 = vmatprep.subr.bf16.mxu1 %v2436_v38 }
  0x90   :  { %2239 = vmatpush1.bf16.msra.mxu0 %v2238_v44 }
  0x91   :  { %2439 = vmatpush1.bf16.msra.mxu1 %v2438_v45  ;;  %2241 = vmatprep.subr.bf16.mxu0 %v2240_v46 }
  0x92   :  { %2441 = vmatprep.subr.bf16.mxu1 %v2440_v50 }
  0x94   :  { %2243 = vmatpush1.bf16.msra.mxu0 %v2242_v56 }
  0x95   :  { %2443 = vmatpush1.bf16.msra.mxu1 %v2442_v57  ;;  %2245 = vmatprep.subr.bf16.mxu0 %v2244_v58 }
  0x96   :  { %2445 = vmatprep.subr.bf16.mxu1 %v2444_v62 }
  0x98   :  { %2247 = vmatpush1.bf16.msra.mxu0 %v2246_v4 }
  0x99   :  { %18 = vsyncpa [#allocation4], 0  ;;  %2447 = vmatpush1.bf16.msra.mxu1 %v2446_v5  ;;  %2249 = vmatprep.subr.bf16.mxu0 %v2248_v6  ;;  %v2450_v17 = vpack.c.bf16 %v346_v11, %v342_v9  ;;  %v2252_v18 = vpack.c.bf16 %v353_v13, %v349_v12  ;;  %v348_v19 = vld [vmem:[%s5093_s1 + $0x980] sm:$0xff]  ;;  %v350_v21 = vld [vmem:[%s5093_s1 + $0x990] sm:$0xff]  ;;  %v2452_v22 = vpack.c.bf16 %v355_v15, %v351_v14  ;;  %vm466_vm0 = vcmask 261120  }
  0x9a   :  { %v352_v20 = vld [vmem:[%s5093_s1 + $0x9a0] sm:$0xff]  ;;  %2449 = vmatprep.subr.bf16.mxu1 %v2448_v10  ;;  %v354_v23 = vld [vmem:[%s5093_s1 + $0x9b0] sm:$0xff]  ;;  %v357_v24 = vld [vmem:[%s5093_s1 + $0x9c8] sm:$0xff]  ;;  %vm1116_vm1 = vcmask 1043456   ;;  %vm1112_vm2 = vcmask 949248   ;;  %vm2866_vm3 = vmmov 0  }
  0x9b   :  { %v361_v25 = vld [vmem:[%s5093_s1 + $0x9e8] sm:$0xff]  ;;  %v359_v26 = vld [vmem:[%s5093_s1 + $0x9d8] sm:$0xff]  ;;  %v2254_v28 = vpack.c.bf16 %v352_v20, %v348_v19  ;;  %v2454_v29 = vpack.c.bf16 %v354_v23, %v350_v21  ;;  %v356_v31 = vld [vmem:[%s5093_s1 + $0x9c0] sm:$0xff]  ;;  %vm1354_vm4 = vcmask 7168  }
  0x9c   :  { %v363_v27 = vld [vmem:[%s5093_s1 + $0x9f8] sm:$0xff]  ;;  %2251 = vmatpush1.bf16.msra.mxu0 %v2250_v16  ;;  %v2256_v30 = vpack.c.bf16 %v361_v25, %v357_v24  ;;  %v360_v32 = vld [vmem:[%s5093_s1 + $0x9e0] sm:$0xff]  ;;  %v358_v33 = vld [vmem:[%s5093_s1 + $0x9d0] sm:$0xff] }
  0x9d   :  { %2451 = vmatpush1.bf16.msra.mxu1 %v2450_v17  ;;  %2253 = vmatprep.subr.bf16.mxu0 %v2252_v18  ;;  %v2456_v34 = vpack.c.bf16 %v363_v27, %v359_v26  ;;  %v362_v35 = vld [vmem:[%s5093_s1 + $0x9f0] sm:$0xff]  ;;  %v365_v36 = vld [vmem:[%s5093_s1 + $0xa08] sm:$0xff]  ;;  %v367_v38 = vld [vmem:[%s5093_s1 + $0xa18] sm:$0xff]  ;;  %v2258_v40 = vpack.c.bf16 %v360_v32, %v356_v31 }
  0x9e   :  { %2453 = vmatprep.subr.bf16.mxu1 %v2452_v22  ;;  %v369_v37 = vld [vmem:[%s5093_s1 + $0xa28] sm:$0xff]  ;;  %v371_v39 = vld [vmem:[%s5093_s1 + $0xa38] sm:$0xff]  ;;  %v2458_v41 = vpack.c.bf16 %v362_v35, %v358_v33  ;;  %v364_v43 = vld [vmem:[%s5093_s1 + $0xa00] sm:$0xff] }
  0x9f   :  { %v2260_v42 = vpack.c.bf16 %v369_v37, %v365_v36  ;;  %v368_v44 = vld [vmem:[%s5093_s1 + $0xa20] sm:$0xff]  ;;  %v366_v45 = vld [vmem:[%s5093_s1 + $0xa10] sm:$0xff]  ;;  %v2460_v46 = vpack.c.bf16 %v371_v39, %v367_v38  ;;  %v373_v48 = vld [vmem:[%s5093_s1 + $0xa48] sm:$0xff] }
  0xa0   :  { %2255 = vmatpush1.bf16.msra.mxu0 %v2254_v28  ;;  %v370_v47 = vld [vmem:[%s5093_s1 + $0xa30] sm:$0xff]  ;;  %v377_v49 = vld [vmem:[%s5093_s1 + $0xa68] sm:$0xff]  ;;  %v375_v50 = vld [vmem:[%s5093_s1 + $0xa58] sm:$0xff]  ;;  %v2262_v52 = vpack.c.bf16 %v368_v44, %v364_v43 }
  0xa1   :  { %2455 = vmatpush1.bf16.msra.mxu1 %v2454_v29  ;;  %2257 = vmatprep.subr.bf16.mxu0 %v2256_v30  ;;  %v379_v51 = vld [vmem:[%s5093_s1 + $0xa78] sm:$0xff]  ;;  %v2462_v53 = vpack.c.bf16 %v370_v47, %v366_v45  ;;  %v2264_v54 = vpack.c.bf16 %v377_v49, %v373_v48  ;;  %v372_v55 = vld [vmem:[%s5093_s1 + $0xa40] sm:$0xff]  ;;  %v374_v57 = vld [vmem:[%s5093_s1 + $0xa50] sm:$0xff] }
  0xa2   :  { %2457 = vmatprep.subr.bf16.mxu1 %v2456_v34  ;;  %v376_v56 = vld [vmem:[%s5093_s1 + $0xa60] sm:$0xff]  ;;  %v2464_v58 = vpack.c.bf16 %v379_v51, %v375_v50  ;;  %v378_v59 = vld [vmem:[%s5093_s1 + $0xa70] sm:$0xff]  ;;  %v381_v60 = vld [vmem:[%s5093_s1 + $0xa88] sm:$0xff] }
  0xa3   :  { %v385_v61 = vld [vmem:[%s5093_s1 + $0xaa8] sm:$0xff]  ;;  %v383_v62 = vld [vmem:[%s5093_s1 + $0xa98] sm:$0xff]  ;;  %v2266_v0 = vpack.c.bf16 %v376_v56, %v372_v55  ;;  %v2466_v1 = vpack.c.bf16 %v378_v59, %v374_v57  ;;  %v380_v3 = vld [vmem:[%s5093_s1 + $0xa80] sm:$0xff] }
  0xa4   :  { %2259 = vmatpush1.bf16.msra.mxu0 %v2258_v40  ;;  %v387_v63 = vld [vmem:[%s5093_s1 + $0xab8] sm:$0xff]  ;;  %v2268_v2 = vpack.c.bf16 %v385_v61, %v381_v60  ;;  %v384_v4 = vld [vmem:[%s5093_s1 + $0xaa0] sm:$0xff]  ;;  %v382_v5 = vld [vmem:[%s5093_s1 + $0xa90] sm:$0xff] }
  0xa5   :  { %2459 = vmatpush1.bf16.msra.mxu1 %v2458_v41  ;;  %2261 = vmatprep.subr.bf16.mxu0 %v2260_v42  ;;  %v2468_v6 = vpack.c.bf16 %v387_v63, %v383_v62  ;;  %v386_v7 = vld [vmem:[%s5093_s1 + $0xab0] sm:$0xff]  ;;  %v389_v8 = vld [vmem:[%s5093_s1 + $0xac8] sm:$0xff]  ;;  %v391_v10 = vld [vmem:[%s5093_s1 + $0xad8] sm:$0xff]  ;;  %v2270_v12 = vpack.c.bf16 %v384_v4, %v380_v3 }
  0xa6   :  { %2461 = vmatprep.subr.bf16.mxu1 %v2460_v46  ;;  %v393_v9 = vld [vmem:[%s5093_s1 + $0xae8] sm:$0xff]  ;;  %v395_v11 = vld [vmem:[%s5093_s1 + $0xaf8] sm:$0xff]  ;;  %v2470_v13 = vpack.c.bf16 %v386_v7, %v382_v5  ;;  %v388_v15 = vld [vmem:[%s5093_s1 + $0xac0] sm:$0xff] }
  0xa7   :  { %v2272_v14 = vpack.c.bf16 %v393_v9, %v389_v8  ;;  %v392_v16 = vld [vmem:[%s5093_s1 + $0xae0] sm:$0xff]  ;;  %v390_v17 = vld [vmem:[%s5093_s1 + $0xad0] sm:$0xff]  ;;  %v2472_v18 = vpack.c.bf16 %v395_v11, %v391_v10  ;;  %v397_v20 = vld [vmem:[%s5093_s1 + $0xb08] sm:$0xff] }
  0xa8   :  { %2263 = vmatpush1.bf16.msra.mxu0 %v2262_v52  ;;  %v394_v19 = vld [vmem:[%s5093_s1 + $0xaf0] sm:$0xff]  ;;  %v401_v21 = vld [vmem:[%s5093_s1 + $0xb28] sm:$0xff]  ;;  %v399_v22 = vld [vmem:[%s5093_s1 + $0xb18] sm:$0xff]  ;;  %v2274_v24 = vpack.c.bf16 %v392_v16, %v388_v15 }
  0xa9   :  { %2463 = vmatpush1.bf16.msra.mxu1 %v2462_v53  ;;  %2265 = vmatprep.subr.bf16.mxu0 %v2264_v54  ;;  %v403_v23 = vld [vmem:[%s5093_s1 + $0xb38] sm:$0xff]  ;;  %v2474_v25 = vpack.c.bf16 %v394_v19, %v390_v17  ;;  %v2276_v26 = vpack.c.bf16 %v401_v21, %v397_v20  ;;  %v396_v27 = vld [vmem:[%s5093_s1 + $0xb00] sm:$0xff]  ;;  %v398_v29 = vld [vmem:[%s5093_s1 + $0xb10] sm:$0xff] }
  0xaa   :  { %2465 = vmatprep.subr.bf16.mxu1 %v2464_v58  ;;  %v400_v28 = vld [vmem:[%s5093_s1 + $0xb20] sm:$0xff]  ;;  %v2476_v30 = vpack.c.bf16 %v403_v23, %v399_v22  ;;  %v402_v31 = vld [vmem:[%s5093_s1 + $0xb30] sm:$0xff]  ;;  %v405_v32 = vld [vmem:[%s5093_s1 + $0xb48] sm:$0xff]  ;;  %v2864_v22 = vmov 0.0|0.0  }
  0xab   :  { %v409_v33 = vld [vmem:[%s5093_s1 + $0xb68] sm:$0xff]  ;;  %v407_v34 = vld [vmem:[%s5093_s1 + $0xb58] sm:$0xff]  ;;  %v2278_v36 = vpack.c.bf16 %v400_v28, %v396_v27  ;;  %v2478_v37 = vpack.c.bf16 %v402_v31, %v398_v29  ;;  %v404_v39 = vld [vmem:[%s5093_s1 + $0xb40] sm:$0xff]  ;;  %v2865_v27 = vmov 0.0  }
  0xac   :  { %2267 = vmatpush1.bf16.msra.mxu0 %v2266_v0  ;;  %v411_v35 = vld [vmem:[%s5093_s1 + $0xb78] sm:$0xff]  ;;  %v2280_v38 = vpack.c.bf16 %v409_v33, %v405_v32  ;;  %v408_v40 = vld [vmem:[%s5093_s1 + $0xb60] sm:$0xff]  ;;  %v406_v41 = vld [vmem:[%s5093_s1 + $0xb50] sm:$0xff] }
  0xad   :  { %2467 = vmatpush1.bf16.msra.mxu1 %v2466_v1  ;;  %2269 = vmatprep.subr.bf16.mxu0 %v2268_v2  ;;  %v2480_v42 = vpack.c.bf16 %v411_v35, %v407_v34  ;;  %v410_v43 = vld [vmem:[%s5093_s1 + $0xb70] sm:$0xff]  ;;  %v413_v44 = vld [vmem:[%s5093_s1 + $0xb88] sm:$0xff]  ;;  %v415_v46 = vld [vmem:[%s5093_s1 + $0xb98] sm:$0xff]  ;;  %v2282_v48 = vpack.c.bf16 %v408_v40, %v404_v39 }
  0xae   :  { %2469 = vmatprep.subr.bf16.mxu1 %v2468_v6  ;;  %v417_v45 = vld [vmem:[%s5093_s1 + $0xba8] sm:$0xff]  ;;  %v419_v47 = vld [vmem:[%s5093_s1 + $0xbb8] sm:$0xff]  ;;  %v2482_v49 = vpack.c.bf16 %v410_v43, %v406_v41  ;;  %v412_v51 = vld [vmem:[%s5093_s1 + $0xb80] sm:$0xff] }
  0xaf   :  { %v2284_v50 = vpack.c.bf16 %v417_v45, %v413_v44  ;;  %v416_v52 = vld [vmem:[%s5093_s1 + $0xba0] sm:$0xff]  ;;  %v414_v53 = vld [vmem:[%s5093_s1 + $0xb90] sm:$0xff]  ;;  %v2484_v54 = vpack.c.bf16 %v419_v47, %v415_v46  ;;  %v421_v56 = vld [vmem:[%s5093_s1 + $0xbc8] sm:$0xff] }
  0xb0   :  { %2271 = vmatpush1.bf16.msra.mxu0 %v2270_v12  ;;  %v418_v55 = vld [vmem:[%s5093_s1 + $0xbb0] sm:$0xff]  ;;  %v425_v57 = vld [vmem:[%s5093_s1 + $0xbe8] sm:$0xff]  ;;  %v423_v58 = vld [vmem:[%s5093_s1 + $0xbd8] sm:$0xff]  ;;  %v2286_v60 = vpack.c.bf16 %v416_v52, %v412_v51 }
  0xb1   :  { %2471 = vmatpush1.bf16.msra.mxu1 %v2470_v13  ;;  %2273 = vmatprep.subr.bf16.mxu0 %v2272_v14  ;;  %v427_v59 = vld [vmem:[%s5093_s1 + $0xbf8] sm:$0xff]  ;;  %v2486_v61 = vpack.c.bf16 %v418_v55, %v414_v53  ;;  %v2288_v62 = vpack.c.bf16 %v425_v57, %v421_v56  ;;  %v420_v63 = vld [vmem:[%s5093_s1 + $0xbc0] sm:$0xff]  ;;  %v422_v1 = vld [vmem:[%s5093_s1 + $0xbd0] sm:$0xff] }
  0xb2   :  { %2473 = vmatprep.subr.bf16.mxu1 %v2472_v18  ;;  %v424_v0 = vld [vmem:[%s5093_s1 + $0xbe0] sm:$0xff]  ;;  %v2488_v2 = vpack.c.bf16 %v427_v59, %v423_v58  ;;  %v426_v3 = vld [vmem:[%s5093_s1 + $0xbf0] sm:$0xff]  ;;  %v429_v4 = vld [vmem:[%s5093_s1 + $0xc08] sm:$0xff] }
  0xb3   :  { %v433_v5 = vld [vmem:[%s5093_s1 + $0xc28] sm:$0xff]  ;;  %v2290_v6 = vpack.c.bf16 %v424_v0, %v420_v63  ;;  %v2490_v7 = vpack.c.bf16 %v426_v3, %v422_v1  ;;  %v428_v9 = vld [vmem:[%s5093_s1 + $0xc00] sm:$0xff]  ;;  %v431_v20 = vld [vmem:[%s5093_s1 + $0xc18] sm:$0xff] }
  0xb4   :  { %2275 = vmatpush1.bf16.msra.mxu0 %v2274_v24  ;;  %v2292_v8 = vpack.c.bf16 %v433_v5, %v429_v4  ;;  %v432_v10 = vld [vmem:[%s5093_s1 + $0xc20] sm:$0xff]  ;;  %v437_v11 = vld [vmem:[%s5093_s1 + $0xc48] sm:$0xff]  ;;  %v435_v21 = vld [vmem:[%s5093_s1 + $0xc38] sm:$0xff] }
  0xb5   :  { %2475 = vmatpush1.bf16.msra.mxu1 %v2474_v25  ;;  %2277 = vmatprep.subr.bf16.mxu0 %v2276_v26  ;;  %v441_v12 = vld [vmem:[%s5093_s1 + $0xc68] sm:$0xff]  ;;  %v1074_v13 = vld [vmem:[%s5095_s3 + $0x100] sm:$0xff]  ;;  %v2294_v16 = vpack.c.bf16 %v432_v10, %v428_v9  ;;  %v1076_v24 = vld [vmem:[%s5095_s3 + $0x110] sm:$0xff]  ;;  %v2492_v28 = vpack.c.bf16 %v435_v21, %v431_v20 }
  0xb6   :  { %2477 = vmatprep.subr.bf16.mxu1 %v2476_v30  ;;  %v1075_v14 = vld [vmem:[%s5095_s3 + $0x108] sm:$0xff]  ;;  %v41_v15 = vld [vmem:[%s5092_s0 + $0x20] sm:$0xff]  ;;  %v2296_v17 = vpack.c.bf16 %v441_v12, %v437_v11  ;;  %v1077_v25 = vld [vmem:[%s5095_s3 + $0x118] sm:$0xff] }
  0xb7   :  { %v436_v18 = vld [vmem:[%s5093_s1 + $0xc40] sm:$0xff]  ;;  %v2533_v23 = vpack.c.bf16 %v1075_v14, %v1074_v13  ;;  %v430_v29 = vld [vmem:[%s5093_s1 + $0xc10] sm:$0xff]  ;;  %v439_v31 = vld [vmem:[%s5093_s1 + $0xc58] sm:$0xff]  ;;  %v2536_v33 = vpack.c.bf16 %v1077_v25, %v1076_v24 }
  0xb8   :  { %2279 = vmatpush1.bf16.msra.mxu0 %v2278_v36  ;;  %v440_v19 = vld [vmem:[%s5093_s1 + $0xc60] sm:$0xff]  ;;  %v434_v30 = vld [vmem:[%s5093_s1 + $0xc30] sm:$0xff]  ;;  %v443_v32 = vld [vmem:[%s5093_s1 + $0xc78] sm:$0xff] }
  0xb9   :  { %2479 = vmatpush1.bf16.msra.mxu1 %v2478_v37  ;;  %2281 = vmatprep.subr.bf16.mxu0 %v2280_v38  ;;  %v2298_v26 = vpack.c.bf16 %v440_v19, %v436_v18  ;;  %v1078_v34 = vld [vmem:[%s5095_s3 + $0x120] sm:$0xff]  ;;  %v1079_v35 = vld [vmem:[%s5095_s3 + $0x128] sm:$0xff]  ;;  %v43_v36 = vld [vmem:[%s5092_s0 + $0x30] sm:$0xff]  ;;  %v2494_v37 = vpack.c.bf16 %v434_v30, %v430_v29  ;;  %v2496_v38 = vpack.c.bf16 %v443_v32, %v439_v31 }
  0xba   :  { %2481 = vmatprep.subr.bf16.mxu1 %v2480_v42  ;;  %v438_v39 = vld [vmem:[%s5093_s1 + $0xc50] sm:$0xff]  ;;  %v2539_v41 = vpack.c.bf16 %v1079_v35, %v1078_v34  ;;  %v1058_v42 = vld [vmem:[%s5095_s3 + $0x80] sm:$0xff]  ;;  %v1059_v43 = vld [vmem:[%s5095_s3 + $0x88] sm:$0xff] }
  0xbb   :  { %v442_v40 = vld [vmem:[%s5093_s1 + $0xc70] sm:$0xff]  ;;  %v1081_v45 = vld [vmem:[%s5095_s3 + $0x138] sm:$0xff]  ;;  %v2500_v47 = vpack.c.bf16 %v1059_v43, %v1058_v42  ;;  %v1082_v53 = vld [vmem:[%s5095_s3 + $0x140] sm:$0xff] }
  0xbc   :  { %2283 = vmatpush1.bf16.msra.mxu0 %v2282_v48  ;;  %v1080_v44 = vld [vmem:[%s5095_s3 + $0x130] sm:$0xff]  ;;  %v2498_v46 = vpack.c.bf16 %v442_v40, %v438_v39  ;;  %v1042_v48 = vld [vmem:[%s5095_s3] sm:$0xff]  ;;  %v1061_v52 = vld [vmem:[%s5095_s3 + $0x98] sm:$0xff] }
  0xbd   :  { %2483 = vmatpush1.bf16.msra.mxu1 %v2482_v49  ;;  %2285 = vmatprep.subr.bf16.mxu0 %v2284_v50  ;;  %v1043_v49 = vld [vmem:[%s5095_s3 + $0x8] sm:$0xff]  ;;  %v2542_v50 = vpack.c.bf16 %v1081_v45, %v1080_v44  ;;  %v1060_v51 = vld [vmem:[%s5095_s3 + $0x90] sm:$0xff]  ;;  %v1045_v58 = vld [vmem:[%s5095_s3 + $0x18] sm:$0xff] }
  0xbe   :  { %2485 = vmatprep.subr.bf16.mxu1 %v2484_v54  ;;  %v1083_v54 = vld [vmem:[%s5095_s3 + $0x148] sm:$0xff]  ;;  %v2502_v55 = vpack.c.bf16 %v1043_v49, %v1042_v48  ;;  %v2504_v56 = vpack.c.bf16 %v1061_v52, %v1060_v51  ;;  %v1044_v57 = vld [vmem:[%s5095_s3 + $0x10] sm:$0xff]  ;;  %v1085_v63 = vld [vmem:[%s5095_s3 + $0x158] sm:$0xff] }
  0xbf   :  { %v2545_v59 = vpack.c.bf16 %v1083_v54, %v1082_v53  ;;  %v2506_v0 = vpack.c.bf16 %v1045_v58, %v1044_v57  ;;  %v1047_v3 = vld [vmem:[%s5095_s3 + $0x28] sm:$0xff]  ;;  %v1064_v5 = vld [vmem:[%s5095_s3 + $0xb0] sm:$0xff]  ;;  %v1049_v12 = vld [vmem:[%s5095_s3 + $0x38] sm:$0xff] }
  0xc0   :  { %2287 = vmatpush1.bf16.msra.mxu0 %v2286_v60  ;;  %v1062_v60 = vld [vmem:[%s5095_s3 + $0xa0] sm:$0xff]  ;;  %v1048_v11 = vld [vmem:[%s5095_s3 + $0x30] sm:$0xff]  ;;  %v1051_v30 = vld [vmem:[%s5095_s3 + $0x48] sm:$0xff] }
  0xc1   :  { %2487 = vmatpush1.bf16.msra.mxu1 %v2486_v61  ;;  %2289 = vmatprep.subr.bf16.mxu0 %v2288_v62  ;;  %v1063_v61 = vld [vmem:[%s5095_s3 + $0xa8] sm:$0xff]  ;;  %v1084_v62 = vld [vmem:[%s5095_s3 + $0x150] sm:$0xff]  ;;  %v1066_v14 = vld [vmem:[%s5095_s3 + $0xc0] sm:$0xff]  ;;  %v2514_v18 = vpack.c.bf16 %v1049_v12, %v1048_v11 }
  0xc2   :  { %2489 = vmatprep.subr.bf16.mxu1 %v2488_v2  ;;  %v2508_v1 = vpack.c.bf16 %v1063_v61, %v1062_v60  ;;  %v1046_v2 = vld [vmem:[%s5095_s3 + $0x20] sm:$0xff]  ;;  %v2548_v4 = vpack.c.bf16 %v1085_v63, %v1084_v62  ;;  %v1092_v25 = vld [vmem:[%s5095_s3 + $0x190] sm:$0xff]  ;;  %v1053_v39 = vld [vmem:[%s5095_s3 + $0x58] sm:$0xff] }
  0xc3   :  { %v2510_v9 = vpack.c.bf16 %v1047_v3, %v1046_v2  ;;  %v1090_v21 = vld [vmem:[%s5095_s3 + $0x180] sm:$0xff]  ;;  %v1068_v35 = vld [vmem:[%s5095_s3 + $0xd0] sm:$0xff]  ;;  %v1097_v42 = vld [vmem:[%s5095_s3 + $0x1b8] sm:$0xff]  ;;  %v446_v2 = vlaneseq }
  0xc4   :  { %2291 = vmatpush1.bf16.msra.mxu0 %v2290_v6  ;;  %v1065_v6 = vld [vmem:[%s5095_s3 + $0xb8] sm:$0xff]  ;;  %v1050_v29 = vld [vmem:[%s5095_s3 + $0x40] sm:$0xff]  ;;  %v1071_v45 = vld [vmem:[%s5095_s3 + $0xe8] sm:$0xff] }
  0xc5   :  { %2491 = vmatpush1.bf16.msra.mxu1 %v2490_v7  ;;  %2293 = vmatprep.subr.bf16.mxu0 %v2292_v8  ;;  %v1086_v7 = vld [vmem:[%s5095_s3 + $0x160] sm:$0xff]  ;;  %v1087_v8 = vld [vmem:[%s5095_s3 + $0x168] sm:$0xff]  ;;  %v2512_v10 = vpack.c.bf16 %v1065_v6, %v1064_v5  ;;  %v2518_v31 = vpack.c.bf16 %v1051_v30, %v1050_v29  ;;  %v1072_v53 = vld [vmem:[%s5095_s3 + $0xf0] sm:$0xff]  ;;  %v4361_v3 = vshrl.u32 %v446_v2, 7  ;;  %vm1946_vm5 = vcmp.lt.s32.totalorder %v446_v2, 340 }
  0xc6   :  { %2532 = vmatprep.subr.bf16.mxu1 %v2864_v22  ;;  %v2551_v13 = vpack.c.bf16 %v1087_v8, %v1086_v7  ;;  %v1094_v32 = vld [vmem:[%s5095_s3 + $0x1a0] sm:$0xff]  ;;  %v1055_v48 = vld [vmem:[%s5095_s3 + $0x68] sm:$0xff]  ;;  %v1073_v54 = vld [vmem:[%s5095_s3 + $0xf8] sm:$0xff] }
  0xc7   :  { %677 = vmatmul.mubr.f32.vlgmr.msra.gmra.mrb[0].mxu0 %v41_v15  ;;  %v1070_v43 = vld [vmem:[%s5095_s3 + $0xe0] sm:$0xff]  ;;  %v1099_v51 = vld [vmem:[%s5095_s3 + $0x1c8] sm:$0xff]  ;;  %v1057_v57 = vld [vmem:[%s5095_s3 + $0x78] sm:$0xff]  ;;  %v448_v5 = vsub.s32 0, %v4361_v3  ;;  %v452_v7 = vsub.s32 1, %v4361_v3  ;;  %v456_v11 = vsub.s32 2, %v4361_v3 }
  0xc8   :  { %961 = vmatmul.mubr.f32.vlgmr.msra.gmra.mrb[0].mxu1 %v41_v15  ;;  %2295 = vmatpush1.bf16.msra.mxu0 %v2294_v16  ;;  %v1067_v15 = vld [vmem:[%s5095_s3 + $0xc8] sm:$0xff]  ;;  %v1088_v16 = vld [vmem:[%s5095_s3 + $0x170] sm:$0xff]  ;;  %v1101_v60 = vld [vmem:[%s5095_s3 + $0x1d8] sm:$0xff]  ;;  %v460_v12 = vsub.s32 3, %v4361_v3 }
  0xc9   :  { %2297 = vmatprep.subr.bf16.mxu0 %v2296_v17  ;;  %747 = vmatprep.mubr.f32.mxu0 %v2865_v27  ;;  %v1089_v17 = vld [vmem:[%s5095_s3 + $0x178] sm:$0xff]  ;;  %v2516_v19 = vpack.c.bf16 %v1067_v15, %v1066_v14  ;;  %v1102_v62 = vld [vmem:[%s5095_s3 + $0x1e0] sm:$0xff]  ;;  %v1103_v63 = vld [vmem:[%s5095_s3 + $0x1e8] sm:$0xff] }
  0xca   :  { %2534 = vmatpush1.bf16.msra.mxu1 %v2533_v23  ;;  %v2554_v20 = vpack.c.bf16 %v1089_v17, %v1088_v16  ;;  %v1091_v23 = vld [vmem:[%s5095_s3 + $0x188] sm:$0xff]  ;;  %v444_v8 = vld [vmem:[%s5094_s2] sm:$0xf] }
  0xcb   :  { %2535 = vmatprep.subr.bf16.mxu1 %v2864_v22  ;;  %v2557_v24 = vpack.c.bf16 %v1091_v23, %v1090_v21  ;;  %v1261_v16 = vld [vmem:[%s5097_s5] sm:$0xff]  ;;  %v1262_v17 = vld [vmem:[%s5097_s5 + $0x8] sm:$0xff] }
  0xcc   :  { %2299 = vmatpush1.bf16.msra.mxu0 %v2298_v26  ;;  %v1093_v26 = vld [vmem:[%s5095_s3 + $0x198] sm:$0xff]  ;;  %v2578_v23 = vpack.c.bf16 %v1262_v17, %v1261_v16 }
  0xcd   :  { %2493 = vmatprep.subr.bf16.mxu0 %v2492_v28  ;;  %v2560_v28 = vpack.c.bf16 %v1093_v26, %v1092_v25  ;;  %v1263_v25 = vld [vmem:[%s5097_s5 + $0x10] sm:$0xff]  ;;  %v1264_v26 = vld [vmem:[%s5097_s5 + $0x18] sm:$0xff] }
  0xce   :  { %2537 = vmatpush1.bf16.msra.mxu1 %v2536_v33  ;;  %v1095_v33 = vld [vmem:[%s5095_s3 + $0x1a8] sm:$0xff] }
  0xcf   :  { %1967 = vmatmul.mubr.msk.f32.vlgmr.msra.gmra.mrb[0].mxu0 %vm466_vm0, %v43_v36  ;;  %2538 = vmatprep.subr.bf16.mxu1 %v2864_v22  ;;  %v2563_v34 = vpack.c.bf16 %v1095_v33, %v1094_v32 }
  0xd0   :  { %2495 = vmatpush1.bf16.msra.mxu0 %v2494_v37  ;;  %1031 = vmatprep.mubr.f32.mxu0 %v2865_v27 }
  0xd1   :  { %2497 = vmatprep.subr.bf16.mxu0 %v2496_v38  ;;  %v1052_v38 = vld [vmem:[%s5095_s3 + $0x50] sm:$0xff] }
  0xd2   :  { %2540 = vmatpush1.bf16.msra.mxu1 %v2539_v41  ;;  %v2522_v40 = vpack.c.bf16 %v1053_v39, %v1052_v38  ;;  %v1096_v41 = vld [vmem:[%s5095_s3 + $0x1b0] sm:$0xff] }
  0xd3   :  { %2541 = vmatprep.subr.bf16.mxu1 %v2864_v22  ;;  %v2566_v44 = vpack.c.bf16 %v1097_v42, %v1096_v41  ;;  %v1268_v41 = vld [vmem:[%s5097_s5 + $0x38] sm:$0xff] }
  0xd4   :  { %2499 = vmatpush1.bf16.msra.mxu0 %v2498_v46  ;;  %v2524_v46 = vpack.c.bf16 %v1071_v45, %v1070_v43  ;;  %v1269_v43 = vld [vmem:[%s5097_s5 + $0x40] sm:$0xff] }
  0xd5   :  { %2501 = vmatprep.subr.bf16.mxu0 %v2500_v47  ;;  %v1054_v47 = vld [vmem:[%s5095_s3 + $0x60] sm:$0xff] }
  0xd6   :  { %2543 = vmatpush1.bf16.msra.mxu1 %v2542_v50  ;;  %v2526_v49 = vpack.c.bf16 %v1055_v48, %v1054_v47  ;;  %v1098_v50 = vld [vmem:[%s5095_s3 + $0x1c0] sm:$0xff]  ;;  %v1272_v47 = vld [vmem:[%s5097_s5 + $0x58] sm:$0xff] }
  0xd7   :  { %1968 = vmatmul.mubr.msk.f32.vlgmr.msra.gmra.mrb[2].mxu0 %vm466_vm0, %v43_v36  ;;  %2544 = vmatprep.subr.bf16.mxu1 %v2864_v22  ;;  %v1069_v36 = vld [vmem:[%s5095_s3 + $0xd8] sm:$0xff]  ;;  %v2569_v52 = vpack.c.bf16 %v1099_v51, %v1098_v50  ;;  %v1274_v50 = vld [vmem:[%s5097_s5 + $0x68] sm:$0xff] }
  0xd8   :  { %2503 = vmatpush3.bf16.msra.mxu0 %v2502_v55  ;;  %v2520_v37 = vpack.c.bf16 %v1069_v36, %v1068_v35  ;;  %v2528_v55 = vpack.c.bf16 %v1073_v54, %v1072_v53  ;;  %v1266_v35 = vld [vmem:[%s5097_s5 + $0x28] sm:$0xff]  ;;  %v1276_v53 = vld [vmem:[%s5097_s5 + $0x78] sm:$0xff] }
  0xd9   :  { %2505 = vmatprep.subr.bf16.mxu0 %v2504_v56  ;;  %v1056_v56 = vld [vmem:[%s5095_s3 + $0x70] sm:$0xff] }
  0xda   :  { %2546 = vmatpush1.bf16.msra.mxu1 %v2545_v59  ;;  %v2530_v58 = vpack.c.bf16 %v1057_v57, %v1056_v56  ;;  %v1100_v59 = vld [vmem:[%s5095_s3 + $0x1d0] sm:$0xff] }
  0xdb   :  { %2547 = vmatprep.subr.bf16.mxu1 %v2864_v22  ;;  %v2572_v61 = vpack.c.bf16 %v1101_v60, %v1100_v59 }
  0xdc   :  { %2507 = vmatpush3.bf16.msra.mxu0 %v2506_v0  ;;  %v2575_v0 = vpack.c.bf16 %v1103_v63, %v1102_v62 }
  0xdd   :  { %2509 = vmatprep.subr.bf16.mxu0 %v2508_v1  ;;  %v1104_v1 = vld [vmem:[%s5095_s3 + $0x1f0] sm:$0xf] }
  0xde   :  { %2549 = vmatpush1.bf16.msra.mxu1 %v2548_v4 }
  0xdf   :  { %2550 = vmatprep.subr.bf16.mxu1 %v2864_v22 }
  0xe0   :  { %2511 = vmatpush3.bf16.msra.mxu0 %v2510_v9  ;;  %v449_v9 = vrot.slane %v444_v8, %v448_v5 }
  0xe1   :  { %2513 = vmatprep.subr.bf16.mxu0 %v2512_v10  ;;  %v453_v10 = vrot.slane %v444_v8, %v452_v7 }
  0xe2   :  { %2552 = vmatpush1.bf16.msra.mxu1 %v2551_v13 }
  0xe3   :  { %2553 = vmatprep.subr.bf16.mxu1 %v2864_v22 }
  0xe4   :  { %2515 = vmatpush3.bf16.msra.mxu0 %v2514_v18 }
  0xe5   :  { %2517 = vmatprep.subr.bf16.mxu0 %v2516_v19  ;;  %v457_v19 = vrot.slane %v444_v8, %v456_v11 }
  0xe6   :  { %2555 = vmatpush1.bf16.msra.mxu1 %v2554_v20  ;;  %v461_v20 = vrot.slane %v444_v8, %v460_v12 }
  0xe7   :  { %2556 = vmatprep.subr.bf16.mxu1 %v2864_v22 }
  0xe8   :  { %2519 = vmatpush3.bf16.msra.mxu0 %v2518_v31  ;;  %v2581_v31 = vpack.c.bf16 %v1264_v26, %v1263_v25 }
  0xe9   :  { %2521 = vmatprep.subr.bf16.mxu0 %v2520_v37 }
  0xea   :  { %2558 = vmatpush1.bf16.msra.mxu1 %v2557_v24 }
  0xeb   :  { %2559 = vmatprep.subr.bf16.mxu1 %v2864_v22 }
  0xec   :  { %2523 = vmatpush3.bf16.msra.mxu0 %v2522_v40  ;;  %v1267_v40 = vld [vmem:[%s5097_s5 + $0x30] sm:$0xff] }
  0xed   :  { %2525 = vmatprep.subr.bf16.mxu0 %v2524_v46  ;;  %v2587_v42 = vpack.c.bf16 %v1268_v41, %v1267_v40  ;;  %v1271_v46 = vld [vmem:[%s5097_s5 + $0x50] sm:$0xff] }
  0xee   :  { %2561 = vmatpush1.bf16.msra.mxu1 %v2560_v28  ;;  %v2593_v48 = vpack.c.bf16 %v1272_v47, %v1271_v46 }
  0xef   :  { %2562 = vmatprep.subr.bf16.mxu1 %v2864_v22 }
  0xf0   :  { %2527 = vmatpush3.bf16.msra.mxu0 %v2526_v49  ;;  %v1273_v49 = vld [vmem:[%s5097_s5 + $0x60] sm:$0xff] }
  0xf1   :  { %2529 = vmatprep.subr.bf16.mxu0 %v2528_v55  ;;  %v2596_v51 = vpack.c.bf16 %v1274_v50, %v1273_v49  ;;  %v1432_v49 = vld [vmem:[%s5099_s7 + $0x78] sm:$0xff] }
  0xf2   :  { %2564 = vmatpush1.bf16.msra.mxu1 %v2563_v34  ;;  %v1265_v34 = vld [vmem:[%s5097_s5 + $0x20] sm:$0xff]  ;;  %v1436_v50 = vld [vmem:[%s5099_s7 + $0x98] sm:$0xff] }
  0xf3   :  { %2565 = vmatprep.subr.bf16.mxu1 %v2864_v22  ;;  %v2584_v38 = vpack.c.bf16 %v1266_v35, %v1265_v34  ;;  %v1420_v34 = vld [vmem:[%s5099_s7 + $0x18] sm:$0xff] }
  0xf4   :  { %2531 = vmatpush3.bf16.msra.mxu0 %v2530_v58  ;;  %v1969_v58 = vld [vmem:[%s5096_s4] ss:$0 sm:$0xff]  ;;  %v1424_v35 = vld [vmem:[%s5099_s7 + $0x38] sm:$0xff] }
  0xf5   :  { %2577 = vmatprep.subr.bf16.mxu0 %v2864_v22 }
  0xf6   :  { %2567 = vmatpush1.bf16.msra.mxu1 %v2566_v44  ;;  %v1270_v44 = vld [vmem:[%s5097_s5 + $0x48] sm:$0xff] }
  0xf7   :  { %2568 = vmatprep.subr.bf16.mxu1 %v2864_v22  ;;  %v2590_v45 = vpack.c.bf16 %v1270_v44, %v1269_v43  ;;  %v1426_v43 = vld [vmem:[%s5099_s7 + $0x48] sm:$0xff] }
  0xf8   :  { %v1430_v44 = vld [vmem:[%s5099_s7 + $0x68] sm:$0xff] }
  0xfa   :  { %2570 = vmatpush1.bf16.msra.mxu1 %v2569_v52  ;;  %v1275_v52 = vld [vmem:[%s5097_s5 + $0x70] sm:$0xff] }
  0xfb   :  { %2571 = vmatprep.subr.bf16.mxu1 %v2864_v22  ;;  %v2599_v54 = vpack.c.bf16 %v1276_v53, %v1275_v52 }
  0xfe   :  { %2573 = vmatpush1.bf16.msra.mxu1 %v2572_v61 }
  0xff   :  { %2574 = vmatprep.subr.bf16.mxu1 %v2864_v22 }
 0x102   :  { %2576 = vmatpush1.bf16.msra.mxu1 %v2575_v0  ;;  %v1972_v0 = vld [vmem:[#allocation2] ss:$0 sm:$0xff] }
 0x103   :  { %1250 = vmatprep.subr.mxu1 %v2865_v27 }
 0x106   :  { %1970 = vmatpush1.msk.msra.mxu1 %vm1116_vm1, %v1104_v1 }
 0x19b   :  { %v962_v4 = vpop.f32.mrb[0].mxu1 }
 0x19c   :  { %v964_v6 = vpop.f32.mrb[1].mxu1  ;;  %v2804_v28 = vadd.f32 %v962_v4, %v457_v19 }
 0x19d   :  { %v2806_v29 = vadd.f32 %v964_v6, %v461_v20 }
 0x1a2   :  { %v749_v13 = vpop.f32.mrb[0].mxu0 }
 0x1a3   :  { %v4374_v14 = vadd.f32 %v749_v13, %v449_v9  ;;  %v751_v15 = vpop.f32.mrb[1].mxu0 }
 0x1a4   :  { %v4382_v18 = vadd.f32 %v751_v15, %v453_v10 }
 0x1a5   :  { %v1038_v24 = vmax.f32 %v4374_v14, 0.0 }
 0x1a6   :  { %v1039_v21 = vmax.f32 %v4382_v18, 0.0  ;;  %v1513_v18 = vld [vmem:[%s5099_s7 + $0x300] sm:$0xff] }
 0x1a8   :  { %1184 = vmatprep.mubr.f32.mxu0 %v1039_v21 }
 0x1a9   :  { %1185 = vmatmul.mubr.f32.vlgmr.msra.gmra.mrb[4].mxu0 %v1038_v24 }
 0x1aa   :  { %v1033_v30 = vpop.f32.mrb[2].mxu0  ;;  %2579 = vmatpush3.bf16.msra.mxu0 %v2578_v23  ;;  %2097 = vmatprep.mubr.msk.f32.mxu0 %vm2866_vm3, %v2865_v27 }
 0x1ab   :  { %v4398_v32 = vadd.f32 %v2804_v28, %v1033_v30  ;;  %v1035_v33 = vpop.f32.mrb[3].mxu0  ;;  %2580 = vmatprep.subr.bf16.mxu0 %v2864_v22  ;;  %v2867_v28 = vmov 0   ;;  %v1421_v30 = vld [vmem:[%s5099_s7 + $0x20] sm:$0xff] }
 0x1ac   :  { %v4407_v36 = vadd.f32 %v2806_v29, %v1035_v33  ;;  %2832 = vset.pattern.permute.xlu1 %v2867_v28  ;;  %2833 = vset.pattern.permute.xlu0 %v2867_v28  ;;  %v1418_v29 = vld [vmem:[%s5099_s7 + $0x8] sm:$0xff] }
 0x1ad   :  { %v1040_v39 = vmax.f32 %v4398_v32, 0.0  ;;  %v2601_v33 = vpack.c.bf16 %v1421_v30, %v1418_v29  ;;  %v1450_v28 = vld [vmem:[%s5099_s7 + $0x108] sm:$0xff]  ;;  %v1581_v32 = vld [vmem:[%s5099_s7 + $0x520] sm:$0xff] }
 0x1ae   :  { %v1041_v37 = vmax.f32 %v4407_v36, 0.0  ;;  %2582 = vmatpush3.bf16.msra.mxu0 %v2581_v31  ;;  %v1417_v31 = vld [vmem:[%s5099_s7] sm:$0xff]  ;;  %v1454_v29 = vld [vmem:[%s5099_s7 + $0x128] sm:$0xff]  ;;  %v1516_v36 = vld [vmem:[%s5099_s7 + $0x318] sm:$0xff] }
 0x1af   :  { %2583 = vmatprep.subr.bf16.mxu0 %v2864_v22  ;;  %v2603_v40 = vpack.c.bf16 %v1420_v34, %v1417_v31  ;;  %2602 = vmatprep.subr.bf16.mxu1 %v2601_v33  ;;  %v1482_v30 = vld [vmem:[%s5099_s7 + $0x208] sm:$0xff]  ;;  %v1457_v31 = vld [vmem:[%s5099_s7 + $0x140] sm:$0xff]  ;;  %v1431_v34 = vld [vmem:[%s5099_s7 + $0x70] sm:$0xff] }
 0x1b0   :  { %1971 = vmatprep.mubr.msk.f32.mxu1 %vm1112_vm2, %v1041_v37 }
 0x1b1   :  { %1255 = vmatmul.mubr.f32.vlgmr.msra.gmra.mrb[2].mxu1 %v1040_v39 }
 0x1b2   :  { %2585 = vmatpush3.bf16.msra.mxu0 %v2584_v38  ;;  %v1427_v38 = vld [vmem:[%s5099_s7 + $0x50] sm:$0xff]  ;;  %2604 = vmatpush1.bf16.msra.mxu1 %v2603_v40  ;;  %v1488_v40 = vld [vmem:[%s5099_s7 + $0x238] sm:$0xff] }
 0x1b3   :  { %2586 = vmatprep.subr.bf16.mxu0 %v2864_v22  ;;  %v2605_v41 = vpack.c.bf16 %v1427_v38, %v1424_v35  ;;  %v1434_v35 = vld [vmem:[%s5099_s7 + $0x88] sm:$0xff]  ;;  %v1485_v38 = vld [vmem:[%s5099_s7 + $0x220] sm:$0xff] }
 0x1b5   :  { %2606 = vmatprep.subr.bf16.mxu1 %v2605_v41 }
 0x1b6   :  { %2588 = vmatpush3.bf16.msra.mxu0 %v2587_v42  ;;  %v1423_v42 = vld [vmem:[%s5099_s7 + $0x30] sm:$0xff] }
 0x1b7   :  { %2589 = vmatprep.subr.bf16.mxu0 %v2864_v22  ;;  %v2607_v46 = vpack.c.bf16 %v1426_v43, %v1423_v42  ;;  %v1453_v42 = vld [vmem:[%s5099_s7 + $0x120] sm:$0xff]  ;;  %v1456_v43 = vld [vmem:[%s5099_s7 + $0x138] sm:$0xff] }
 0x1b9   :  { %2608 = vmatpush1.bf16.msra.mxu1 %v2607_v46  ;;  %v1460_v46 = vld [vmem:[%s5099_s7 + $0x158] sm:$0xff] }
 0x1ba   :  { %2591 = vmatpush3.bf16.msra.mxu0 %v2590_v45  ;;  %v1433_v45 = vld [vmem:[%s5099_s7 + $0x80] sm:$0xff] }
 0x1bb   :  { %2592 = vmatprep.subr.bf16.mxu0 %v2864_v22  ;;  %v2609_v47 = vpack.c.bf16 %v1433_v45, %v1430_v44  ;;  %v2735_v44 = vpack.c.bf16 %v1434_v35, %v1431_v34  ;;  %v2625_v45 = vpack.c.bf16 %v1457_v31, %v1454_v29  ;;  %v1487_v29 = vld [vmem:[%s5099_s7 + $0x230] sm:$0xff]  ;;  %v1486_v34 = vld [vmem:[%s5099_s7 + $0x228] sm:$0xff] }
 0x1bc   :  { %v1490_v35 = vld [vmem:[%s5099_s7 + $0x248] sm:$0xff] }
 0x1bd   :  { %2610 = vmatprep.subr.bf16.mxu1 %v2609_v47  ;;  %v2737_v47 = vpack.c.bf16 %v1488_v40, %v1485_v38  ;;  %v1493_v38 = vld [vmem:[%s5099_s7 + $0x260] sm:$0xff] }
 0x1be   :  { %2594 = vmatpush3.bf16.msra.mxu0 %v2593_v48  ;;  %v1429_v48 = vld [vmem:[%s5099_s7 + $0x60] sm:$0xff] }
 0x1bf   :  { %2595 = vmatprep.subr.bf16.mxu0 %v2864_v22  ;;  %v2611_v52 = vpack.c.bf16 %v1432_v49, %v1429_v48  ;;  %v1437_v48 = vld [vmem:[%s5099_s7 + $0xa0] sm:$0xff]  ;;  %v1440_v49 = vld [vmem:[%s5099_s7 + $0xb8] sm:$0xff] }
 0x1c1   :  { %2612 = vmatpush1.bf16.msra.mxu1 %v2611_v52  ;;  %v1494_v52 = vld [vmem:[%s5099_s7 + $0x268] sm:$0xff] }
 0x1c2   :  { %2597 = vmatpush3.bf16.msra.mxu0 %v2596_v51  ;;  %v1439_v51 = vld [vmem:[%s5099_s7 + $0xb0] sm:$0xff] }
 0x1c3   :  { %2598 = vmatprep.subr.bf16.mxu0 %v2864_v22  ;;  %v2613_v53 = vpack.c.bf16 %v1439_v51, %v1436_v50  ;;  %v1463_v50 = vld [vmem:[%s5099_s7 + $0x170] sm:$0xff] }
 0x1c4   :  { %v1491_v51 = vld [vmem:[%s5099_s7 + $0x250] sm:$0xff] }
 0x1c5   :  { %2614 = vmatprep.subr.bf16.mxu1 %v2613_v53  ;;  %v2627_v53 = vpack.c.bf16 %v1456_v43, %v1453_v42  ;;  %v1489_v42 = vld [vmem:[%s5099_s7 + $0x240] sm:$0xff]  ;;  %v1492_v43 = vld [vmem:[%s5099_s7 + $0x258] sm:$0xff] }
 0x1c6   :  { %2600 = vmatpush3.bf16.msra.mxu0 %v2599_v54  ;;  %v1435_v54 = vld [vmem:[%s5099_s7 + $0x90] sm:$0xff] }
 0x27c   :  { %v2010_v55 = vpop.f32.mrb[4].mxu0 }
 0x27d   :  { %v2011_v56 = vpop.f32.mrb[5].mxu0 }
 0x27e   :  { %v2012_v57 = vadd.f32 %v2011_v56, %v2010_v55  ;;  %v1438_v55 = vld [vmem:[%s5099_s7 + $0xa8] sm:$0xff] }
 0x27f   :  { %v1442_v56 = vld [vmem:[%s5099_s7 + $0xc8] sm:$0xff] }
 0x280   :  { %v1187_v59 = vadd.f32 %v2012_v57, %v1969_v58  ;;  %v1445_v57 = vld [vmem:[%s5099_s7 + $0xe0] sm:$0xff]  ;;  %v1467_v58 = vld [vmem:[%s5099_s7 + $0x190] sm:$0xff] }
 0x284   :  { %v1256_v60 = vpop.f32.mrb[2].mxu1 }
 0x285   :  { %v1257_v61 = vadd.f32 %v1256_v60, %v1187_v59  ;;  %v1258_v62 = vpop.f32.mrb[3].mxu1  ;;  %v1470_v59 = vld [vmem:[%s5099_s7 + $0x1a8] sm:$0xff]  ;;  %v2615_v60 = vpack.c.bf16 %v1438_v55, %v1435_v54  ;;  %v1459_v54 = vld [vmem:[%s5099_s7 + $0x150] sm:$0xff]  ;;  %v2739_v55 = vpack.c.bf16 %v1440_v49, %v1437_v48 }
 0x286   :  { %v2725_v62 = vpack.c.bf16 %v1470_v59, %v1467_v58  ;;  %v2741_v58 = vpack.c.bf16 %v1494_v52, %v1491_v51  ;;  %v1443_v59 = vld [vmem:[%s5099_s7 + $0xd0] sm:$0xff] }
 0x287   :  { %2834 = vtanh.f32 %v1257_v61  ;;  %v1441_v61 = vld [vmem:[%s5099_s7 + $0xc0] sm:$0xff]  ;;  %2616 = vmatpush1.bf16.msra.mxu1 %v2615_v60  ;;  %v1446_v60 = vld [vmem:[%s5099_s7 + $0xe8] sm:$0xff] }
 0x288   :  { %2726 = vmatprep.subr.bf16.mxu0 %v2725_v62  ;;  %v1469_v62 = vld [vmem:[%s5099_s7 + $0x1a0] sm:$0xff] }
 0x291   :  { %v2835_v63 = vpop.eup %2834 }
 0x292   :  { %2098 = vmatmul.mubr.f32.vlgmr.msra.gmra.mrb[6].mxu0 %v2835_v63  ;;  %v1419_v63 = vld [vmem:[%s5099_s7 + $0x10] sm:$0xff] }
 0x365   :  { %v1350_v1 = vpop.f32.mrb[6].mxu0 }
 0x366   :  { %v1351_v4 = vadd.f32 %v1972_v0, %v1350_v1  ;;  %v2099_v6 = vpop.f32.mrb[7].mxu0  ;;  %v2617_v0 = vpack.c.bf16 %v1445_v57, %v1442_v56  ;;  %v1444_v1 = vld [vmem:[%s5099_s7 + $0xd8] sm:$0xff]  ;;  %v2629_v56 = vpack.c.bf16 %v1463_v50, %v1460_v46  ;;  %v1462_v57 = vld [vmem:[%s5099_s7 + $0x168] sm:$0xff] }
 0x367   :  { %v1422_v6 = vld [vmem:[%s5099_s7 + $0x28] sm:$0xff] }
 0x368   :  { %v1355_v8 = vsel %vm1354_vm4, %v1351_v4, -inf  ;;  %2618 = vmatprep.subr.bf16.mxu1 %v2617_v0  ;;  %v2743_v0 = vpack.c.bf16 %v1446_v60, %v1443_v59  ;;  %v1495_v59 = vld [vmem:[%s5099_s7 + $0x270] sm:$0xff]  ;;  %v1498_v60 = vld [vmem:[%s5099_s7 + $0x288] sm:$0xff] }
 0x369   :  { %1356 = vmax.xlane.f32.xlu0 %v1355_v8  ;;  %v1451_v8 = vld [vmem:[%s5099_s7 + $0x110] sm:$0xff] }
 0x3f6   :  { %v1357_v9 = vpop.xlane.xlu0 %1356 }
 0x3f7   :  { %v1358_v10 = vrot.slane %v1357_v9, 4 }
 0x3f9   :  { %v1359_v12 = vmax.f32 %v1357_v9, %v1358_v10  ;;  %v2727_v9 = vpack.c.bf16 %v1422_v6, %v1419_v63  ;;  %v1473_v10 = vld [vmem:[%s5099_s7 + $0x1c0] sm:$0xff]  ;;  %v2631_v63 = vpack.c.bf16 %v1462_v57, %v1459_v54  ;;  %v1468_v6 = vld [vmem:[%s5099_s7 + $0x198] sm:$0xff] }
 0x3fa   :  { %v1497_v57 = vld [vmem:[%s5099_s7 + $0x280] sm:$0xff] }
 0x3fb   :  { %v1360_v13 = vrot.slane %v1359_v12, 2  ;;  %2728 = vmatpush3.bf16.msra.mxu0 %v2727_v9  ;;  %v1475_v9 = vld [vmem:[%s5099_s7 + $0x1d0] sm:$0xff] }
 0x3fd   :  { %v1361_v15 = vmax.f32 %v1359_v12, %v1360_v13  ;;  %v1476_v12 = vld [vmem:[%s5099_s7 + $0x1d8] sm:$0xff] }
 0x3fe   :  { %v2729_v13 = vpack.c.bf16 %v1476_v12, %v1473_v10 }
 0x3ff   :  { %v1362_v16 = vrot.slane %v1361_v15, 1 }
 0x400   :  { %2730 = vmatprep.subr.bf16.mxu0 %v2729_v13  ;;  %v1471_v13 = vld [vmem:[%s5099_s7 + $0x1b0] sm:$0xff] }
 0x401   :  { %v1363_v17 = vmax.f32 %v1361_v15, %v1362_v16  ;;  %v1425_v15 = vld [vmem:[%s5099_s7 + $0x40] sm:$0xff]  ;;  %v1428_v16 = vld [vmem:[%s5099_s7 + $0x58] sm:$0xff] }
 0x403   :  { %2822 = vpush %v1363_v17  ;;  %v2619_v17 = vpack.c.bf16 %v1444_v1, %v1441_v61  ;;  %v1466_v61 = vld [vmem:[%s5099_s7 + $0x188] sm:$0xff] }
 0x404   :  { %v2633_v1 = vpack.c.bf16 %v1469_v62, %v1466_v61  ;;  %v2655_v62 = vpack.c.bf16 %v1498_v60, %v1495_v59 }
 0x405   :  { %2620 = vmatpush1.bf16.msra.mxu1 %v2619_v17  ;;  %v1481_v17 = vld [vmem:[%s5099_s7 + $0x200] sm:$0xff] }
 0x434   :  { %s2823_s4 = spop %2822 }
 0x435   :  { %v1365_v19 = vstv %s2823_s4 }
 0x436   :  { %v1366_v20 = vsub.f32 %v1351_v4, %v1365_v19  ;;  %v1448_v4 = vld [vmem:[%s5099_s7 + $0xf8] sm:$0xff]  ;;  %v1447_v19 = vld [vmem:[%s5099_s7 + $0xf0] sm:$0xff] }
 0x437   :  { %v2623_v41 = vpack.c.bf16 %v1450_v28, %v1447_v19  ;;  %v1484_v28 = vld [vmem:[%s5099_s7 + $0x218] sm:$0xff] }
 0x438   :  { %v1367_v23 = vmul.f32 1.442695, %v1366_v20  ;;  %v2731_v20 = vpack.c.bf16 %v1428_v16, %v1425_v15  ;;  %v1474_v15 = vld [vmem:[%s5099_s7 + $0x1c8] sm:$0xff]  ;;  %v2645_v31 = vpack.c.bf16 %v1487_v29, %v1484_v28  ;;  %v1509_v28 = vld [vmem:[%s5099_s7 + $0x2e0] sm:$0xff] }
 0x439   :  { %v1478_v16 = vld [vmem:[%s5099_s7 + $0x1e8] sm:$0xff]  ;;  %v2639_v19 = vpack.c.bf16 %v1474_v15, %v1471_v13  ;;  %v1504_v13 = vld [vmem:[%s5099_s7 + $0x2b8] sm:$0xff] }
 0x43a   :  { %2836 = vpow2.f32 %v1367_v23  ;;  %v1479_v23 = vld [vmem:[%s5099_s7 + $0x1f0] sm:$0xff]  ;;  %2732 = vmatpush3.bf16.msra.mxu0 %v2731_v20  ;;  %v2641_v20 = vpack.c.bf16 %v1481_v17, %v1478_v16 }
 0x43b   :  { %v2733_v33 = vpack.c.bf16 %v1482_v30, %v1479_v23  ;;  %v1477_v23 = vld [vmem:[%s5099_s7 + $0x1e0] sm:$0xff]  ;;  %v1455_v17 = vld [vmem:[%s5099_s7 + $0x130] sm:$0xff] }
 0x43d   :  { %2734 = vmatprep.subr.bf16.mxu0 %v2733_v33  ;;  %v1483_v33 = vld [vmem:[%s5099_s7 + $0x210] sm:$0xff] }
 0x43e   :  { %2736 = vmatpush3.bf16.msra.mxu0 %v2735_v44  ;;  %v2647_v40 = vpack.c.bf16 %v1486_v34, %v1483_v33  ;;  %v2651_v44 = vpack.c.bf16 %v1492_v43, %v1489_v42  ;;  %v1510_v33 = vld [vmem:[%s5099_s7 + $0x2e8] sm:$0xff]  ;;  %v1517_v43 = vld [vmem:[%s5099_s7 + $0x320] sm:$0xff] }
 0x43f   :  { %2738 = vmatprep.subr.bf16.mxu0 %v2737_v47  ;;  %v1514_v42 = vld [vmem:[%s5099_s7 + $0x308] sm:$0xff] }
 0x442   :  { %2740 = vmatpush3.bf16.msra.mxu0 %v2739_v55  ;;  %v1496_v55 = vld [vmem:[%s5099_s7 + $0x278] sm:$0xff] }
 0x443   :  { %2742 = vmatprep.subr.bf16.mxu0 %v2741_v58 }
 0x444   :  { %v4457_v25 = vpop.eup %2836 }
 0x445   :  { %v1369_v26 = vsel %vm1354_vm4, %v4457_v25, 0.0 }
 0x446   :  { %1370 = vadd.xlane.f32.xlu0 %v1369_v26  ;;  %v2621_v26 = vpack.c.bf16 %v1451_v8, %v1448_v4  ;;  %v1465_v4 = vld [vmem:[%s5099_s7 + $0x180] sm:$0xff]  ;;  %v1472_v8 = vld [vmem:[%s5099_s7 + $0x1b8] sm:$0xff]  ;;  %2744 = vmatpush3.bf16.msra.mxu0 %v2743_v0 }
 0x447   :  { %v2635_v10 = vpack.c.bf16 %v1468_v6, %v1465_v4  ;;  %v2637_v12 = vpack.c.bf16 %v1475_v9, %v1472_v8  ;;  %v1452_v0 = vld [vmem:[%s5099_s7 + $0x118] sm:$0xff]  ;;  %v1502_v4 = vld [vmem:[%s5099_s7 + $0x2a8] sm:$0xff]  ;;  %v1505_v6 = vld [vmem:[%s5099_s7 + $0x2c0] sm:$0xff] }
 0x448   :  { %2622 = vmatprep.subr.bf16.mxu1 %v2621_v26  ;;  %v1480_v26 = vld [vmem:[%s5099_s7 + $0x1f8] sm:$0xff]  ;;  %v1503_v8 = vld [vmem:[%s5099_s7 + $0x2b0] sm:$0xff]  ;;  %v2657_v9 = vpack.c.bf16 %v1505_v6, %v1502_v4  ;;  %v2667_v4 = vpack.c.bf16 %v1516_v36, %v1513_v18  ;;  %v1545_v18 = vld [vmem:[%s5099_s7 + $0x400] sm:$0xff] }
 0x449   :  { %2624 = vmatpush1.bf16.msra.mxu1 %v2623_v41  ;;  %v2643_v30 = vpack.c.bf16 %v1480_v26, %v1477_v23  ;;  %v2649_v41 = vpack.c.bf16 %v1493_v38, %v1490_v35  ;;  %v1508_v23 = vld [vmem:[%s5099_s7 + $0x2d8] sm:$0xff]  ;;  %v1511_v26 = vld [vmem:[%s5099_s7 + $0x2f0] sm:$0xff]  ;;  %v1461_v38 = vld [vmem:[%s5099_s7 + $0x160] sm:$0xff] }
 0x44a   :  { %2626 = vmatprep.subr.bf16.mxu1 %v2625_v45  ;;  %v2661_v29 = vpack.c.bf16 %v1511_v26, %v1508_v23  ;;  %v1525_v23 = vld [vmem:[%s5099_s7 + $0x360] sm:$0xff]  ;;  %v1550_v36 = vld [vmem:[%s5099_s7 + $0x428] sm:$0xff] }
 0x44d   :  { %2628 = vmatpush1.bf16.msra.mxu1 %v2627_v53 }
 0x44e   :  { %2630 = vmatprep.subr.bf16.mxu1 %v2629_v56  ;;  %v1499_v56 = vld [vmem:[%s5099_s7 + $0x290] sm:$0xff] }
 0x44f   :  { %v2653_v58 = vpack.c.bf16 %v1499_v56, %v1496_v55 }
 0x451   :  { %2632 = vmatpush1.bf16.msra.mxu1 %v2631_v63  ;;  %v1449_v63 = vld [vmem:[%s5099_s7 + $0x100] sm:$0xff] }
 0x452   :  { %2634 = vmatprep.subr.bf16.mxu1 %v2633_v1  ;;  %v2747_v1 = vpack.c.bf16 %v1452_v0, %v1449_v63  ;;  %v1523_v63 = vld [vmem:[%s5099_s7 + $0x350] sm:$0xff] }
 0x455   :  { %2636 = vmatpush1.bf16.msra.mxu1 %v2635_v10  ;;  %v1506_v10 = vld [vmem:[%s5099_s7 + $0x2c8] sm:$0xff] }
 0x456   :  { %2638 = vmatprep.subr.bf16.mxu1 %v2637_v12  ;;  %v1501_v12 = vld [vmem:[%s5099_s7 + $0x2a0] sm:$0xff]  ;;  %v2749_v15 = vpack.c.bf16 %v1506_v10, %v1503_v8  ;;  %v1519_v8 = vld [vmem:[%s5099_s7 + $0x330] sm:$0xff]  ;;  %v1522_v10 = vld [vmem:[%s5099_s7 + $0x348] sm:$0xff] }
 0x457   :  { %v2659_v16 = vpack.c.bf16 %v1504_v13, %v1501_v12  ;;  %v1521_v12 = vld [vmem:[%s5099_s7 + $0x340] sm:$0xff]  ;;  %v1524_v13 = vld [vmem:[%s5099_s7 + $0x358] sm:$0xff] }
 0x459   :  { %2640 = vmatpush1.bf16.msra.mxu1 %v2639_v19  ;;  %v1458_v19 = vld [vmem:[%s5099_s7 + $0x148] sm:$0xff] }
 0x45a   :  { %2642 = vmatprep.subr.bf16.mxu1 %v2641_v20  ;;  %v2751_v20 = vpack.c.bf16 %v1458_v19, %v1455_v17  ;;  %v1529_v17 = vld [vmem:[%s5099_s7 + $0x380] sm:$0xff]  ;;  %v2671_v19 = vpack.c.bf16 %v1522_v10, %v1519_v8 }
 0x45d   :  { %2644 = vmatpush1.bf16.msra.mxu1 %v2643_v30  ;;  %v1512_v30 = vld [vmem:[%s5099_s7 + $0x2f8] sm:$0xff] }
 0x45e   :  { %2646 = vmatprep.subr.bf16.mxu1 %v2645_v31  ;;  %v1507_v31 = vld [vmem:[%s5099_s7 + $0x2d0] sm:$0xff]  ;;  %v2753_v34 = vpack.c.bf16 %v1512_v30, %v1509_v28  ;;  %v1528_v28 = vld [vmem:[%s5099_s7 + $0x378] sm:$0xff]  ;;  %v1530_v30 = vld [vmem:[%s5099_s7 + $0x388] sm:$0xff] }
 0x45f   :  { %v2663_v35 = vpack.c.bf16 %v1510_v33, %v1507_v31  ;;  %v1532_v31 = vld [vmem:[%s5099_s7 + $0x398] sm:$0xff]  ;;  %v1535_v33 = vld [vmem:[%s5099_s7 + $0x3b0] sm:$0xff] }
 0x461   :  { %2648 = vmatpush1.bf16.msra.mxu1 %v2647_v40  ;;  %v1464_v40 = vld [vmem:[%s5099_s7 + $0x178] sm:$0xff] }
 0x462   :  { %2650 = vmatprep.subr.bf16.mxu1 %v2649_v41  ;;  %v2755_v41 = vpack.c.bf16 %v1464_v40, %v1461_v38  ;;  %v1531_v38 = vld [vmem:[%s5099_s7 + $0x390] sm:$0xff]  ;;  %v2677_v40 = vpack.c.bf16 %v1535_v33, %v1532_v31  ;;  %v1568_v31 = vld [vmem:[%s5099_s7 + $0x4b8] sm:$0xff] }
 0x463   :  { %v1571_v33 = vld [vmem:[%s5099_s7 + $0x4d0] sm:$0xff] }
 0x465   :  { %2652 = vmatpush1.bf16.msra.mxu1 %v2651_v44  ;;  %v2665_v44 = vpack.c.bf16 %v1517_v43, %v1514_v42  ;;  %v1533_v42 = vld [vmem:[%s5099_s7 + $0x3a0] sm:$0xff]  ;;  %v1536_v43 = vld [vmem:[%s5099_s7 + $0x3b8] sm:$0xff] }
 0x466   :  { %2654 = vmatprep.subr.bf16.mxu1 %v2653_v58 }
 0x469   :  { %2656 = vmatpush1.bf16.msra.mxu1 %v2655_v62  ;;  %v1520_v62 = vld [vmem:[%s5099_s7 + $0x338] sm:$0xff] }
 0x46a   :  { %2658 = vmatprep.subr.bf16.mxu1 %v2657_v9 }
 0x46d   :  { %2660 = vmatpush1.bf16.msra.mxu1 %v2659_v16  ;;  %v1526_v16 = vld [vmem:[%s5099_s7 + $0x368] sm:$0xff] }
 0x46e   :  { %2662 = vmatprep.subr.bf16.mxu1 %v2661_v29  ;;  %v2673_v26 = vpack.c.bf16 %v1529_v17, %v1526_v16  ;;  %v1527_v29 = vld [vmem:[%s5099_s7 + $0x370] sm:$0xff]  ;;  %v1562_v16 = vld [vmem:[%s5099_s7 + $0x488] sm:$0xff]  ;;  %v1565_v17 = vld [vmem:[%s5099_s7 + $0x4a0] sm:$0xff] }
 0x471   :  { %2664 = vmatpush1.bf16.msra.mxu1 %v2663_v35  ;;  %v2764_v35 = vpack.c.bf16 %v1530_v30, %v1527_v29  ;;  %v1563_v29 = vld [vmem:[%s5099_s7 + $0x490] sm:$0xff]  ;;  %v1566_v30 = vld [vmem:[%s5099_s7 + $0x4a8] sm:$0xff] }
 0x472   :  { %2666 = vmatprep.subr.bf16.mxu1 %v2665_v44  ;;  %v1538_v44 = vld [vmem:[%s5099_s7 + $0x3c8] sm:$0xff] }
 0x4d3   :  { %v1371_v45 = vpop.xlane.xlu0 %1370 }
 0x4d4   :  { %v1372_v46 = vrot.slane %v1371_v45, 4 }
 0x4d6   :  { %v1373_v47 = vadd.f32 %v1372_v46, %v1371_v45 }
 0x4d8   :  { %v1374_v48 = vrot.slane %v1373_v47, 2 }
 0x4da   :  { %v1375_v49 = vadd.f32 %v1374_v48, %v1373_v47 }
 0x4dc   :  { %v1376_v50 = vrot.slane %v1375_v49, 1 }
 0x4de   :  { %v1377_v51 = vadd.f32 %v1376_v50, %v1375_v49 }
 0x4e0   :  { %2824 = vpush %v1377_v51 }
 0x511   :  { %s2825_s15 = spop %2824 }
 0x512   :  { %v1379_v52 = vstv %s2825_s15 }
 0x513   :  { %2838 = vrcp.f32 %v1379_v52 }
 0x51d   :  { %v2839_v53 = vpop.eup %2838 }
 0x51e   :  { %v1381_v54 = vmul.f32 %v2839_v53, %v4457_v25  ;;  %v1500_v25 = vld [vmem:[%s5099_s7 + $0x298] sm:$0xff] }
 0x51f   :  { %v2745_v61 = vpack.c.bf16 %v1500_v25, %v1497_v57  ;;  %v1518_v25 = vld [vmem:[%s5099_s7 + $0x328] sm:$0xff] }
 0x520   :  { %1385 = vperm.xlu1 %2832, %v1381_v54   ;;  %1382 = vst.msk [vmem:[%s5102_s10] sm:$0xff] %vm1354_vm4, %v1381_v54 }
 0x521   :  { %2746 = vmatprep.subr.bf16.mxu0 %v2745_v61 }
 0x522   :  { %2748 = vmatpush3.bf16.msra.mxu0 %v2747_v1 }
 0x523   :  { %2750 = vmatprep.subr.bf16.mxu0 %v2749_v15  ;;  %v2669_v15 = vpack.c.bf16 %v1523_v63, %v1520_v62  ;;  %v1552_v62 = vld [vmem:[%s5099_s7 + $0x438] sm:$0xff]  ;;  %v1551_v63 = vld [vmem:[%s5099_s7 + $0x430] sm:$0xff] }
 0x526   :  { %2752 = vmatpush3.bf16.msra.mxu0 %v2751_v20  ;;  %v2761_v20 = vpack.c.bf16 %v1524_v13, %v1521_v12  ;;  %v1558_v12 = vld [vmem:[%s5099_s7 + $0x468] sm:$0xff]  ;;  %v1557_v13 = vld [vmem:[%s5099_s7 + $0x460] sm:$0xff] }
 0x527   :  { %2754 = vmatprep.subr.bf16.mxu0 %v2753_v34  ;;  %v2675_v34 = vpack.c.bf16 %v1528_v28, %v1525_v23  ;;  %v1561_v23 = vld [vmem:[%s5099_s7 + $0x480] sm:$0xff]  ;;  %v1564_v28 = vld [vmem:[%s5099_s7 + $0x498] sm:$0xff] }
 0x52a   :  { %2756 = vmatpush3.bf16.msra.mxu0 %v2755_v41  ;;  %v1534_v41 = vld [vmem:[%s5099_s7 + $0x3a8] sm:$0xff] }
 0x52b   :  { %2757 = vmatprep.subr.bf16.mxu0 %v2864_v22 }
 0x59f   :  { %v4761_v45 = vpop.permute.xlu1 %1385 }
 0x5a0   :  { %v1388_v46 = vmul.f32 %v4761_v45, %v1038_v24  ;;  %v1389_v47 = vmul.f32 %v4761_v45, %v1039_v21  ;;  %v1391_v48 = vmul.f32 %v4761_v45, %v1041_v37  ;;  %v1515_v37 = vld [vmem:[%s5099_s7 + $0x310] sm:$0xff] }
 0x5a1   :  { %v2758_v6 = vpack.c.bf16 %v1518_v25, %v1515_v37  ;;  %v1553_v37 = vld [vmem:[%s5099_s7 + $0x440] sm:$0xff] }
 0x5a2   :  { %v1392_v49 = vrot.slane %v1388_v46, 4  ;;  %v1398_v50 = vrot.slane %v1389_v47, 4  ;;  %v1410_v51 = vsel %vm1112_vm2, %v1391_v48, 0.0  ;;  %v2767_v48 = vpack.c.bf16 %v1536_v43, %v1533_v42  ;;  %v1569_v42 = vld [vmem:[%s5099_s7 + $0x4c0] sm:$0xff]  ;;  %v1572_v43 = vld [vmem:[%s5099_s7 + $0x4d8] sm:$0xff] }
 0x5a3   :  { %v1411_v52 = vrot.slane %v1410_v51, 4 }
 0x5a4   :  { %v1393_v53 = vadd.f32 %v1392_v49, %v1388_v46  ;;  %v1399_v54 = vadd.f32 %v1398_v50, %v1389_v47  ;;  %v1541_v46 = vld [vmem:[%s5099_s7 + $0x3e0] sm:$0xff]  ;;  %v2679_v47 = vpack.c.bf16 %v1534_v41, %v1531_v38  ;;  %v1567_v38 = vld [vmem:[%s5099_s7 + $0x4b0] sm:$0xff]  ;;  %v1570_v41 = vld [vmem:[%s5099_s7 + $0x4c8] sm:$0xff] }
 0x5a5   :  { %v1412_v55 = vadd.f32 %v1411_v52, %v1410_v51  ;;  %v1537_v49 = vld [vmem:[%s5099_s7 + $0x3c0] sm:$0xff]  ;;  %v2681_v50 = vpack.c.bf16 %v1541_v46, %v1538_v44  ;;  %v1540_v51 = vld [vmem:[%s5099_s7 + $0x3d8] sm:$0xff]  ;;  %v1539_v52 = vld [vmem:[%s5099_s7 + $0x3d0] sm:$0xff] }
 0x5a6   :  { %v1394_v56 = vrot.slane %v1393_v53, 2  ;;  %v1400_v14 = vrot.slane %v1399_v54, 2  ;;  %v1574_v44 = vld [vmem:[%s5099_s7 + $0x4e8] sm:$0xff]  ;;  %v1577_v46 = vld [vmem:[%s5099_s7 + $0x500] sm:$0xff] }
 0x5a7   :  { %v1413_v57 = vrot.slane %v1412_v55, 2 }
 0x5a8   :  { %v1395_v24 = vadd.f32 %v1394_v56, %v1393_v53  ;;  %v1401_v58 = vadd.f32 %v1400_v14, %v1399_v54  ;;  %v1542_v53 = vld [vmem:[%s5099_s7 + $0x3e8] sm:$0xff]  ;;  %v1544_v54 = vld [vmem:[%s5099_s7 + $0x3f8] sm:$0xff]  ;;  %v2683_v56 = vpack.c.bf16 %v1540_v51, %v1537_v49  ;;  %v1573_v49 = vld [vmem:[%s5099_s7 + $0x4e0] sm:$0xff] }
 0x5a9   :  { %v1414_v21 = vadd.f32 %v1413_v57, %v1412_v55  ;;  %v1547_v55 = vld [vmem:[%s5099_s7 + $0x410] sm:$0xff]  ;;  %v2770_v14 = vpack.c.bf16 %v1542_v53, %v1539_v52  ;;  %v1576_v51 = vld [vmem:[%s5099_s7 + $0x4f8] sm:$0xff]  ;;  %v1578_v53 = vld [vmem:[%s5099_s7 + $0x508] sm:$0xff] }
 0x5aa   :  { %v1402_v59 = vrot.slane %v1401_v58, 1  ;;  %v1396_v60 = vrot.slane %v1395_v24, 1  ;;  %v1543_v57 = vld [vmem:[%s5099_s7 + $0x3f0] sm:$0xff] }
 0x5ab   :  { %v1415_v61 = vrot.slane %v1414_v21, 1  ;;  %v1575_v52 = vld [vmem:[%s5099_s7 + $0x4f0] sm:$0xff] }
 0x5ac   :  { %v1403_v0 = vadd.f32 %v1402_v59, %v1401_v58  ;;  %v1397_v1 = vadd.f32 %v1396_v60, %v1395_v24  ;;  %v2685_v24 = vpack.c.bf16 %v1547_v55, %v1544_v54  ;;  %v1546_v58 = vld [vmem:[%s5099_s7 + $0x408] sm:$0xff]  ;;  %v1549_v60 = vld [vmem:[%s5099_s7 + $0x420] sm:$0xff]  ;;  %v1580_v54 = vld [vmem:[%s5099_s7 + $0x518] sm:$0xff] }
 0x5ad   :  { %v1416_v9 = vadd.f32 %v1415_v61, %v1414_v21  ;;  %v1548_v21 = vld [vmem:[%s5099_s7 + $0x418] sm:$0xff]  ;;  %v2687_v25 = vpack.c.bf16 %v1546_v58, %v1543_v57  ;;  %v2689_v61 = vpack.c.bf16 %v1553_v37, %v1550_v36  ;;  %v1583_v55 = vld [vmem:[%s5099_s7 + $0x530] sm:$0xff]  ;;  %v2788_v57 = vpack.c.bf16 %v1578_v53, %v1575_v52 }
 0x5ae   :  { %1699 = vmatprep.mubr.f32.mxu1 %v1403_v0  ;;  %1841 = vmatprep.mubr.f32.mxu0 %v1403_v0  ;;  %v2773_v59 = vpack.c.bf16 %v1548_v21, %v1545_v18  ;;  %v1554_v0 = vld [vmem:[%s5099_s7 + $0x448] sm:$0xff]  ;;  %v2709_v58 = vpack.c.bf16 %v1583_v55, %v1580_v54  ;;  %v1589_v21 = vld [vmem:[%s5099_s7 + $0x560] sm:$0xff] }
 0x5af   :  { %1700 = vmatmul.mubr.f32.vlgmr.msra.gmra.mrb[4].mxu1 %v1397_v1  ;;  %1842 = vmatmul.mubr.f32.vlgmr.msra.gmra.mrb[8].mxu0 %v1397_v1  ;;  %v1556_v1 = vld [vmem:[%s5099_s7 + $0x458] sm:$0xff]  ;;  %v2776_v8 = vpack.c.bf16 %v1554_v0, %v1551_v63  ;;  %v1582_v18 = vld [vmem:[%s5099_s7 + $0x528] sm:$0xff] }
 0x5b0   :  { %2668 = vmatpush1.bf16.msra.mxu1 %v2667_v4  ;;  %2759 = vmatpush1.bf16.msra.mxu0 %v2758_v6  ;;  %v1559_v4 = vld [vmem:[%s5099_s7 + $0x470] sm:$0xff]  ;;  %v2691_v6 = vpack.c.bf16 %v1552_v62, %v1549_v60  ;;  %v1590_v63 = vld [vmem:[%s5099_s7 + $0x568] sm:$0xff]  ;;  %v1592_v0 = vld [vmem:[%s5099_s7 + $0x578] sm:$0xff] }
 0x5b1   :  { %1975 = vmatprep.mubr.msk.f32.mxu1 %vm1112_vm2, %v1416_v9  ;;  %1977 = vmatprep.mubr.msk.f32.mxu0 %vm1112_vm2, %v1416_v9  ;;  %v1555_v9 = vld [vmem:[%s5099_s7 + $0x450] sm:$0xff]  ;;  %v2693_v10 = vpack.c.bf16 %v1559_v4, %v1556_v1 }
 0x5b2   :  { %2670 = vmatprep.subr.bf16.mxu1 %v2669_v15  ;;  %2760 = vmatprep.subr.bf16.mxu0 %v2864_v22  ;;  %v1560_v15 = vld [vmem:[%s5099_s7 + $0x478] sm:$0xff]  ;;  %v1587_v62 = vld [vmem:[%s5099_s7 + $0x550] sm:$0xff] }
 0x5b3   :  { %v1595_v1 = vld [vmem:[%s5099_s7 + $0x590] sm:$0xff] }
 0x5b4   :  { %2672 = vmatpush1.bf16.msra.mxu1 %v2671_v19  ;;  %2762 = vmatpush1.bf16.msra.mxu0 %v2761_v20  ;;  %v2695_v19 = vpack.c.bf16 %v1558_v12, %v1555_v9  ;;  %v2779_v20 = vpack.c.bf16 %v1560_v15, %v1557_v13  ;;  %v1591_v9 = vld [vmem:[%s5099_s7 + $0x570] sm:$0xff]  ;;  %v1594_v12 = vld [vmem:[%s5099_s7 + $0x588] sm:$0xff]  ;;  %v1593_v13 = vld [vmem:[%s5099_s7 + $0x580] sm:$0xff] }
 0x5b5   :  { %2674 = vmatprep.subr.bf16.mxu1 %v2673_v26  ;;  %2763 = vmatprep.subr.bf16.mxu0 %v2864_v22  ;;  %v2697_v26 = vpack.c.bf16 %v1565_v17, %v1562_v16  ;;  %v1596_v15 = vld [vmem:[%s5099_s7 + $0x598] sm:$0xff]  ;;  %v1598_v16 = vld [vmem:[%s5099_s7 + $0x5a8] sm:$0xff]  ;;  %v1601_v17 = vld [vmem:[%s5099_s7 + $0x5c0] sm:$0xff] }
 0x5b8   :  { %2676 = vmatpush1.bf16.msra.mxu1 %v2675_v34  ;;  %2765 = vmatpush1.bf16.msra.mxu0 %v2764_v35  ;;  %v2699_v34 = vpack.c.bf16 %v1564_v28, %v1561_v23  ;;  %v2782_v35 = vpack.c.bf16 %v1566_v30, %v1563_v29  ;;  %v2797_v23 = vpack.c.bf16 %v1596_v15, %v1593_v13  ;;  %v1600_v29 = vld [vmem:[%s5099_s7 + $0x5b8] sm:$0xff]  ;;  %v1599_v30 = vld [vmem:[%s5099_s7 + $0x5b0] sm:$0xff] }
 0x5b9   :  { %2678 = vmatprep.subr.bf16.mxu1 %v2677_v40  ;;  %2766 = vmatprep.subr.bf16.mxu0 %v2864_v22  ;;  %v2701_v40 = vpack.c.bf16 %v1571_v33, %v1568_v31  ;;  %v2721_v28 = vpack.c.bf16 %v1601_v17, %v1598_v16  ;;  %v1602_v31 = vld [vmem:[%s5099_s7 + $0x5c8] sm:$0xff] }
 0x5bc   :  { %2680 = vmatpush1.bf16.msra.mxu1 %v2679_v47  ;;  %2768 = vmatpush1.bf16.msra.mxu0 %v2767_v48  ;;  %v2703_v47 = vpack.c.bf16 %v1570_v41, %v1567_v38  ;;  %v2785_v48 = vpack.c.bf16 %v1572_v43, %v1569_v42  ;;  %v1604_v38 = vld [vmem:[%s5099_s7 + $0x5d8] sm:$0xf]  ;;  %v1603_v41 = vld [vmem:[%s5099_s7 + $0x5d0] sm:$0xf]  ;;  %v1605_v42 = vld [vmem:[%s5099_s7 + $0x5e0] sm:$0xf] }
 0x5bd   :  { %2682 = vmatprep.subr.bf16.mxu1 %v2681_v50  ;;  %2769 = vmatprep.subr.bf16.mxu0 %v2864_v22  ;;  %v2705_v50 = vpack.c.bf16 %v1577_v46, %v1574_v44 }
 0x5c0   :  { %2684 = vmatpush1.bf16.msra.mxu1 %v2683_v56  ;;  %2771 = vmatpush1.bf16.msra.mxu0 %v2770_v14  ;;  %v1390_v56 = vmul.f32 %v4761_v45, %v1040_v39  ;;  %v2707_v14 = vpack.c.bf16 %v1576_v51, %v1573_v49  ;;  %v1584_v39 = vld [vmem:[%s5099_s7 + $0x538] sm:$0xff]  ;;  %v1586_v45 = vld [vmem:[%s5099_s7 + $0x548] sm:$0xff] }
 0x5c1   :  { %2686 = vmatprep.subr.bf16.mxu1 %v2685_v24  ;;  %2772 = vmatprep.subr.bf16.mxu0 %v2864_v22  ;;  %v1579_v24 = vld [vmem:[%s5099_s7 + $0x510] sm:$0xff]  ;;  %v2713_v60 = vpack.c.bf16 %v1589_v21, %v1586_v45 }
 0x5c2   :  { %v1404_v36 = vrot.slane %v1390_v56, 4  ;;  %v2711_v37 = vpack.c.bf16 %v1582_v18, %v1579_v24 }
 0x5c4   :  { %2688 = vmatpush1.bf16.msra.mxu1 %v2687_v25  ;;  %2774 = vmatpush1.bf16.msra.mxu0 %v2773_v59  ;;  %v2791_v25 = vpack.c.bf16 %v1584_v39, %v1581_v32  ;;  %v1585_v59 = vld [vmem:[%s5099_s7 + $0x540] sm:$0xff]  ;;  %v1405_v4 = vadd.f32 %v1404_v36, %v1390_v56 }
 0x5c5   :  { %2690 = vmatprep.subr.bf16.mxu1 %v2689_v61  ;;  %2775 = vmatprep.subr.bf16.mxu0 %v2864_v22  ;;  %v1588_v61 = vld [vmem:[%s5099_s7 + $0x558] sm:$0xff] }
 0x5c8   :  { %2692 = vmatpush1.bf16.msra.mxu1 %v2691_v6  ;;  %2777 = vmatpush1.bf16.msra.mxu0 %v2776_v8  ;;  %v2715_v6 = vpack.c.bf16 %v1588_v61, %v1585_v59  ;;  %v2794_v8 = vpack.c.bf16 %v1590_v63, %v1587_v62 }
 0x5c9   :  { %2694 = vmatprep.subr.bf16.mxu1 %v2693_v10  ;;  %2778 = vmatprep.subr.bf16.mxu0 %v2864_v22  ;;  %v2717_v10 = vpack.c.bf16 %v1595_v1, %v1592_v0 }
 0x5cc   :  { %2696 = vmatpush1.bf16.msra.mxu1 %v2695_v19  ;;  %2780 = vmatpush1.bf16.msra.mxu0 %v2779_v20  ;;  %v1406_v19 = vrot.slane %v1405_v4, 2  ;;  %v2719_v20 = vpack.c.bf16 %v1594_v12, %v1591_v9 }
 0x5cd   :  { %2698 = vmatprep.subr.bf16.mxu1 %v2697_v26  ;;  %2781 = vmatprep.subr.bf16.mxu0 %v2864_v22  ;;  %v1597_v26 = vld [vmem:[%s5099_s7 + $0x5a0] sm:$0xff]  ;;  %s2869_s7 = smov [#allocation3]  }
 0x5ce   :  { %v1407_v33 = vadd.f32 %v1406_v19, %v1405_v4 }
 0x5d0   :  { %2700 = vmatpush1.bf16.msra.mxu1 %v2699_v34  ;;  %2783 = vmatpush1.bf16.msra.mxu0 %v2782_v35  ;;  %v2723_v34 = vpack.c.bf16 %v1600_v29, %v1597_v26  ;;  %v2800_v35 = vpack.c.bf16 %v1602_v31, %v1599_v30 }
 0x5d1   :  { %2702 = vmatprep.subr.bf16.mxu1 %v2701_v40  ;;  %2784 = vmatprep.subr.bf16.mxu0 %v2864_v22  ;;  %v1408_v40 = vrot.slane %v1407_v33, 1 }
 0x5d4   :  { %2704 = vmatpush1.bf16.msra.mxu1 %v2703_v47  ;;  %2786 = vmatpush1.bf16.msra.mxu0 %v2785_v48  ;;  %v2868_v47 = vmov 1966171168  }
 0x5d5   :  { %2706 = vmatprep.subr.bf16.mxu1 %v2705_v50  ;;  %2787 = vmatprep.subr.bf16.mxu0 %v2864_v22  ;;  %v1922_v48 = vunpack.c.l.s4 %v2868_v47 }
 0x5d7   :  { %v1923_v51 = vunpack.c.0.s8 %v1922_v48 }
 0x5d8   :  { %2708 = vmatpush1.bf16.msra.mxu1 %v2707_v14  ;;  %2789 = vmatpush1.bf16.msra.mxu0 %v2788_v57 }
 0x5d9   :  { %2710 = vmatprep.subr.bf16.mxu1 %v2709_v58  ;;  %2790 = vmatprep.subr.bf16.mxu0 %v2864_v22  ;;  %v1926_v58 = vsub.s32 %v1923_v51, %v4361_v3 }
 0x5dc   :  { %2712 = vmatpush1.bf16.msra.mxu1 %v2711_v37  ;;  %2792 = vmatpush1.bf16.msra.mxu0 %v2791_v25 }
 0x5dd   :  { %2714 = vmatprep.subr.bf16.mxu1 %v2713_v60  ;;  %2793 = vmatprep.subr.bf16.mxu0 %v2864_v22 }
 0x5e0   :  { %2716 = vmatpush1.bf16.msra.mxu1 %v2715_v6  ;;  %2795 = vmatpush1.bf16.msra.mxu0 %v2794_v8 }
 0x5e1   :  { %2718 = vmatprep.subr.bf16.mxu1 %v2717_v10  ;;  %2796 = vmatprep.subr.bf16.mxu0 %v2864_v22 }
 0x5e4   :  { %2720 = vmatpush1.bf16.msra.mxu1 %v2719_v20  ;;  %2798 = vmatpush1.bf16.msra.mxu0 %v2797_v23 }
 0x5e5   :  { %2722 = vmatprep.subr.bf16.mxu1 %v2721_v28  ;;  %2799 = vmatprep.subr.bf16.mxu0 %v2864_v22  ;;  %v1409_v22 = vadd.f32 %v1408_v40, %v1407_v33 }
 0x5e8   :  { %2724 = vmatpush1.bf16.msra.mxu1 %v2723_v34  ;;  %2801 = vmatpush1.bf16.msra.mxu0 %v2800_v35 }
 0x5e9   :  { %1973 = vmatprep.subr.msk.mxu1 %vm1116_vm1, %v1604_v38  ;;  %1907 = vmatprep.subr.mxu0 %v2865_v27  ;;  %v1606_v27 = vld [vmem:[%s5100_s8] sm:$0x7]  ;;  %s1955_s8 = sshll.u32 %s2869_s7, 4  ;;  %s1956_s8 = int_to_ptr.vmem [resolvable:$true] %s1955_s8 }
 0x5ea   :  { %v1619_v49 = vrot.slane %v1606_v27, %v456_v11  ;;  %v1611_v50 = vrot.slane %v1606_v27, %v448_v5  ;;  %v1615_v52 = vrot.slane %v1606_v27, %v452_v7  ;;  %s2840_s25 = scalar_lea.vmem %s1956_s8, 48  ;;  %s2844_s26 = scalar_lea.vmem %s1956_s8, 64 }
 0x5eb   :  { %p2841_p0 = scmp.ne.s32.totalorder %s1956_s8, %s2840_s25  ;;  %p2845_p1 = scmp.lt.s32.totalorder %s1956_s8, %s1956_s8 }
 0x5ec   :  { %1974 = vmatpush1.msk.msra.mxu1 %vm1116_vm1, %v1603_v41  ;;  %1976 = vmatpush1.msk.msra.mxu0 %vm1116_vm1, %v1605_v42  ;;  %p2846_p2 = scmp.lt.s32.totalorder %s2844_s26, %s2840_s25 }
 0x5ed   :  { %1771 = vmatmul.mubr.f32.vlgmr.msra.gmra.mrb[4].mxu1 %v1409_v22  ;;  %1912 = vmatmul.mubr.f32.vlgmr.msra.gmra.mrb[10].mxu0 %v1409_v22 }
 0x5ee   :  { %p2847_p3 = por %p2846_p2, %p2845_p1 }
 0x5f0   :  { %p2848_p4 = pnand %p2847_p3, %p2841_p0 }
 0x682   :  { %v2062_v43 = vpop.f32.mrb[8].mxu0 }
 0x683   :  { %v2063_v44 = vpop.f32.mrb[9].mxu0 }
 0x684   :  { %v2064_v46 = vadd.f32 %v2063_v44, %v2062_v43 }
 0x686   :  { %v1844_v53 = vadd.f32 %v2064_v46, %v1619_v49 }
 0x6c0   :  { %v1772_v54 = vpop.f32.mrb[4].mxu1  ;;  %v1913_v55 = vpop.f32.mrb[10].mxu0 }
 0x6c1   :  { %v2808_v56 = vadd.f32 %v1772_v54, %v1611_v50  ;;  %v1914_v14 = vadd.f32 %v1913_v55, %v1844_v53  ;;  %v1774_v57 = vpop.f32.mrb[5].mxu1  ;;  %v1915_v24 = vpop.f32.mrb[11].mxu0 }
 0x6c2   :  { %v2809_v18 = vadd.f32 %v1774_v57, %v1615_v52 }
 0x6c3   :  { %v1934_v39 = vrot.slane %v1914_v14, %v1926_v58 }
 0x6c4   :  { %v1920_v32 = vcombine.low %v2808_v56, %v2809_v18 }
 0x6c6   :  { %v1927_v11 = vrot.slane %v1920_v32, %v1926_v58 }
 0x6c8   :  { %v1935_v5 = vcombine.low %v1927_v11, %v1934_v39 }
 0x6ca   :  { %v1942_v45 = vrot.slane %v1935_v5, %v1926_v58 }
 0x6cc   :  { %1948 = vst.msk [vmem:[#allocation3] sm:$0x7] %vm1946_vm5, %v1942_v45 }
 0x6cd   :  { %2851 = shalt.err (!%p2848_p4)
}
 0x6ce   :  { %s2852_s5 = scalar_lea.hbm %s5101_s9, 48 }
 0x6cf   :  { %p2853_p5 = scmp.ne.s32.totalorder %s5101_s9, %s2852_s5  ;;  %p2856_p6 = scmp.lt.u32.totalorder %s2852_s5, %s5101_s9 }
 0x6d1   :  { %p2858_p7 = pnand %p2856_p6, %p2853_p5 }
 0x6d3   :  { %2861 = shalt.err (!%p2858_p7)
}
 0x6d4   :  { %1958 = dma.vmem_to_hbm [thread:$0]  %s1956_s8, 48, %s5101_s9, [#allocation4]  }
 0x6d5   :  { %2862 = dma.done.wait [#allocation4], 48  }
 0x6d6   :  { %2863 = vsyncadd [#allocation4], 4294967248 }
 0x6d7   :  { %1966 = vsyncpa [#allocation4], 1 }

</bundles_post_ra>
